<compile_context>
chip_gen: v7x
topology: tpu7x:2x2x1
jax: 0.10.0
libtpu: 0.0.40
codegen_flags: <defaults>
</compile_context>

<pallas_src>
import functools

import jax
import jax.numpy as jnp
import numpy as np
from jax import lax
from jax.experimental import pallas as pl
from jax.experimental.pallas import tpu as pltpu


# -----------------------------------------------------------------------------
# The single fused kernel
# -----------------------------------------------------------------------------
def _net_kernel(p1g_ref, w1c_ref, b1_ref, w2t_ref, b2_ref, s2_ref,
                fc1w_ref, fc1b_ref, fc2w_ref, fc2b_ref, o_ref, *, batch):
    f32 = jnp.float32
    B = batch
    N1 = 144 * B        # rows of the (pool-offset grouped) conv1 output grid
    NC2 = 96 * B - 4    # rows of the conv2 output accumulator grid

    # ---- conv1: one MXU matmul over all four pool offsets, then max + bias + relu
    c1all = jnp.dot(p1g_ref[...], w1c_ref[...], preferred_element_type=f32)  # (4*N1, 10)
    c1 = jnp.maximum(
        jnp.maximum(c1all[0 * N1:1 * N1, :], c1all[1 * N1:2 * N1, :]),
        jnp.maximum(c1all[2 * N1:3 * N1, :], c1all[3 * N1:4 * N1, :]))
    a1 = jnp.maximum(c1 + b1_ref[...], 0.0)          # (N1, 10), row = y*(12B)+b*12+x

    # ---- conv2: direct convolution as 25 tap-wise matmuls on shifted row-slices
    c2 = jnp.zeros((NC2, 20), f32)
    for dy in range(5):
        for dx in range(5):
            t = dy * 5 + dx
            shift = dy * (12 * B) + dx
            win = a1[shift:shift + NC2, :]            # (NC2, 10) contiguous rows
            c2 = c2 + jnp.dot(win, w2t_ref[t], preferred_element_type=f32)
    # TODO(synk): nn.Dropout2d on the conv2 output is identity (inference mode).

    # ---- 2x2 maxpool of conv2: constant 0/1 selection matmul + max of 4 chunks
    sp = jnp.dot(s2_ref[...], c2, preferred_element_type=f32)    # (64*B, 20)

    b2v = b2_ref[...]
    fc1b = fc1b_ref[...]
    for b in range(B):
        base = b * 16
        ch = [sp[s * (16 * B) + base:s * (16 * B) + base + 16, :] for s in range(4)]
        pooled = jnp.maximum(jnp.maximum(ch[0], ch[1]), jnp.maximum(ch[2], ch[3]))
        pooled = jnp.maximum(pooled + b2v, 0.0)       # (16, 20): rows=y*4+x, cols=chan

        # ---- fc1 (torch's NCHW flatten folded into the pre-permuted weight) + relu
        h = fc1b                                      # (1, 50)
        for hw in range(16):
            h = h + jnp.dot(pooled[hw:hw + 1, :], fc1w_ref[hw],
                            preferred_element_type=f32)
        h = jnp.maximum(h, 0.0)
        # TODO(synk): F.dropout on the fc1 output is identity (inference mode).

        # ---- fc2 + numerically stable log_softmax
        z = jnp.dot(h, fc2w_ref[...], preferred_element_type=f32) + fc2b_ref[...]
        m = jnp.max(z, axis=-1, keepdims=True)
        lse = jnp.log(jnp.sum(jnp.exp(z - m), axis=-1, keepdims=True))
        o_ref[b:b + 1, :] = z - m - lse


def _vmem_spec():
    return pl.BlockSpec(memory_space=pltpu.MemorySpace.VMEM)


# -----------------------------------------------------------------------------
# One-time parameter re-layout (kept out of the per-step graph)
# -----------------------------------------------------------------------------
def prepare_params(params, batch):
    B = batch
    w1c = params["conv1_w"].reshape(10, 25).T.astype(jnp.bfloat16)            # (25, 10)
    b1 = params["conv1_b"].reshape(1, 10).astype(jnp.float32)
    # conv2 weight as 25 per-tap (Cin, Cout) blocks, t = dy*5+dx
    w2t = jnp.transpose(params["conv2_w"], (2, 3, 1, 0)).reshape(25, 10, 20)
    w2t = w2t.astype(jnp.float32)
    b2 = params["conv2_b"].reshape(1, 20).astype(jnp.float32)

    # 0/1 selection matrix implementing the 2x2-pool row subsampling of the
    # conv2 output grid (grid row = y*(12B) + b*12 + x).
    nc2 = 96 * B - 4
    s2 = np.zeros((64 * B, nc2), np.float32)
    for sy in range(2):
        for sx in range(2):
            s = sy * 2 + sx
            for b in range(B):
                for yp in range(4):
                    for xp in range(4):
                        i = s * (16 * B) + b * 16 + yp * 4 + xp
                        j = (2 * yp + sy) * (12 * B) + b * 12 + (2 * xp + sx)
                        s2[i, j] = 1.0

    # fc1 weight permuted so the kernel's (spatial-row, channel-lane) layout is
    # contracted without any in-kernel transpose: fc1_wp[hw, c, j] = W[j, c*16+hw]
    fc1_wp = jnp.transpose(params["fc1_w"].reshape(50, 20, 4, 4), (2, 3, 1, 0))
    fc1_wp = fc1_wp.reshape(16, 20, 50).astype(jnp.float32)
    fc1_b = params["fc1_b"].reshape(1, 50).astype(jnp.float32)
    fc2_wt = params["fc2_w"].T.astype(jnp.float32)                            # (50, 10)
    fc2_b = params["fc2_b"].reshape(1, 10).astype(jnp.float32)

    return {"w1c": w1c, "b1": b1, "w2t": w2t, "b2": b2, "s2": jnp.asarray(s2),
            "fc1_wp": fc1_wp, "fc1_b": fc1_b, "fc2_wt": fc2_wt, "fc2_b": fc2_b}


# -----------------------------------------------------------------------------
# Forward: tiny XLA glue on the input + ONE fused pallas_call
# -----------------------------------------------------------------------------
def net_forward(x_nchw, prepped):
    B = x_nchw.shape[0]
    x = x_nchw.astype(jnp.float32)

    # conv1 im2col patches, pre-grouped by 2x2-pool offset.
    patches = lax.conv_general_dilated_patches(
        x, (5, 5), (1, 1), "VALID",
        dimension_numbers=("NCHW", "OIHW", "NCHW"))          # (B, 25, 24, 24)
    pr = patches.reshape(B, 25, 12, 2, 12, 2)                # (b, t, yp, sy, xp, sx)
    pg = jnp.transpose(pr, (3, 5, 2, 0, 4, 1))               # (sy, sx, yp, b, xp, t)
    p1g = pg.reshape(4 * 144 * B, 25).astype(jnp.bfloat16)   # row = s*144B + y*12B + b*12 + x

    kernel = functools.partial(_net_kernel, batch=B)
    return pl.pallas_call(
        kernel,
        out_shape=jax.ShapeDtypeStruct((B, 10), jnp.float32),
        in_specs=[_vmem_spec() for _ in range(10)],
        out_specs=_vmem_spec(),
    )(p1g, prepped["w1c"], prepped["b1"], prepped["w2t"], prepped["b2"],
      prepped["s2"], prepped["fc1_wp"], prepped["fc1_b"], prepped["fc2_wt"],
      prepped["fc2_b"])


# -----------------------------------------------------------------------------
# Plain-XLA reference (eval-mode PyTorch semantics) for a correctness check
# -----------------------------------------------------------------------------
def _reference(x, params):
    dn = ("NCHW", "OIHW", "NCHW")
    c1 = lax.conv_general_dilated(x, params["conv1_w"], (1, 1), "VALID",
                                  dimension_numbers=dn)
    c1 = c1 + params["conv1_b"].reshape(1, 10, 1, 1)
    p1 = lax.reduce_window(c1, -jnp.inf, lax.max, (1, 1, 2, 2), (1, 1, 2, 2), "VALID")
    a1 = jnp.maximum(p1, 0.0)
    c2 = lax.conv_general_dilated(a1, params["conv2_w"], (1, 1), "VALID",
                                  dimension_numbers=dn)
    c2 = c2 + params["conv2_b"].reshape(1, 20, 1, 1)
    p2 = lax.reduce_window(c2, -jnp.inf, lax.max, (1, 1, 2, 2), (1, 1, 2, 2), "VALID")
    a2 = jnp.maximum(p2, 0.0)
    flat = a2.reshape(a2.shape[0], 320)                      # torch .view(-1, 320)
    h = jnp.maximum(flat @ params["fc1_w"].T + params["fc1_b"], 0.0)
    z = h @ params["fc2_w"].T + params["fc2_b"]
    return jax.nn.log_softmax(z, axis=-1)


# -----------------------------------------------------------------------------
if __name__ == "__main__":
    key = jax.random.PRNGKey(0)
    ks = jax.random.split(key, 9)
    params = {
        "conv1_w": jax.random.normal(ks[0], (10, 1, 5, 5), jnp.float32) * 0.10,
        "conv1_b": jax.random.normal(ks[1], (10,), jnp.float32) * 0.10,
        "conv2_w": jax.random.normal(ks[2], (20, 10, 5, 5), jnp.float32) * 0.05,
        "conv2_b": jax.random.normal(ks[3], (20,), jnp.float32) * 0.10,
        "fc1_w":   jax.random.normal(ks[4], (50, 320), jnp.float32) * 0.05,
        "fc1_b":   jax.random.normal(ks[5], (50,), jnp.float32) * 0.10,
        "fc2_w":   jax.random.normal(ks[6], (10, 50), jnp.float32) * 0.10,
        "fc2_b":   jax.random.normal(ks[7], (10,), jnp.float32) * 0.10,
    }
    # MNIST-style input (28x28 is forced by the 320 = 20*4*4 flatten).
    x = jax.random.normal(ks[8], (2, 1, 28, 28), jnp.float32)

    prepped = prepare_params(params, batch=x.shape[0])
    fwd = jax.jit(net_forward)
    out = jax.block_until_ready(fwd(x, prepped))

    assert out.shape == (2, 10), out.shape
    assert bool(jnp.all(jnp.isfinite(out)))
    # log_softmax rows must exponentiate to a probability simplex
    assert bool(jnp.allclose(jnp.exp(out).sum(axis=-1), 1.0, atol=1e-3))
    # match the plain-XLA reference (bf16 conv1 operands -> loose tolerance)
    ref = _reference(x, params)
    assert bool(jnp.allclose(out, ref, atol=0.1)), float(jnp.max(jnp.abs(out - ref)))
    print("KERNEL_OK")
</pallas_src>

<mosaic_0001>
module attributes {stable_mosaic.version = 11 : i64} {
  func.func @_net_kernel(%arg0: memref<1152x25xbf16, #tpu.memory_space<vmem>>, %arg1: memref<25x10xbf16, #tpu.memory_space<vmem>>, %arg2: memref<1x10xf32, #tpu.memory_space<vmem>>, %arg3: memref<25x10x20xf32, #tpu.memory_space<vmem>>, %arg4: memref<1x20xf32, #tpu.memory_space<vmem>>, %arg5: memref<128x188xf32, #tpu.memory_space<vmem>>, %arg6: memref<16x20x50xf32, #tpu.memory_space<vmem>>, %arg7: memref<1x50xf32, #tpu.memory_space<vmem>>, %arg8: memref<50x10xf32, #tpu.memory_space<vmem>>, %arg9: memref<1x10xf32, #tpu.memory_space<vmem>>, %arg10: memref<2x10xf32, #tpu.memory_space<vmem>>) attributes {dimension_semantics = [], scalar_prefetch = 0 : i64, scratch_operands = 0 : i64, tpu.core_type = #tpu.core_type<tc>} {
    %c0 = arith.constant 0 : index
    %c0_0 = arith.constant 0 : index
    %0 = vector.load %arg0[%c0, %c0_0] : memref<1152x25xbf16, #tpu.memory_space<vmem>>, vector<1152x25xbf16>
    %c0_1 = arith.constant 0 : index
    %c0_2 = arith.constant 0 : index
    %1 = vector.load %arg1[%c0_1, %c0_2] : memref<25x10xbf16, #tpu.memory_space<vmem>>, vector<25x10xbf16>
    %cst = arith.constant dense<0.000000e+00> : vector<1152x10xf32>
    %2 = tpu.matmul %0, %1, %cst {dimension_numbers = #tpu.dot_dimension_numbers<[1], [0], [0], [1], [0, 0, 1, 1], [], []>} : vector<1152x25xbf16>, vector<25x10xbf16>, vector<1152x10xf32> -> vector<1152x10xf32>
    %3 = vector.extract_strided_slice %2 {offsets = [0, 0], sizes = [288, 10], strides = [1, 1]} : vector<1152x10xf32> to vector<288x10xf32>
    %4 = vector.extract_strided_slice %2 {offsets = [288, 0], sizes = [288, 10], strides = [1, 1]} : vector<1152x10xf32> to vector<288x10xf32>
    %5 = arith.maximumf %3, %4 : vector<288x10xf32>
    %6 = vector.extract_strided_slice %2 {offsets = [576, 0], sizes = [288, 10], strides = [1, 1]} : vector<1152x10xf32> to vector<288x10xf32>
    %7 = vector.extract_strided_slice %2 {offsets = [864, 0], sizes = [288, 10], strides = [1, 1]} : vector<1152x10xf32> to vector<288x10xf32>
    %8 = arith.maximumf %6, %7 : vector<288x10xf32>
    %9 = arith.maximumf %5, %8 : vector<288x10xf32>
    %c0_3 = arith.constant 0 : index
    %c0_4 = arith.constant 0 : index
    %10 = vector.load %arg2[%c0_3, %c0_4] : memref<1x10xf32, #tpu.memory_space<vmem>>, vector<1x10xf32>
    %11 = vector.broadcast %10 : vector<1x10xf32> to vector<288x10xf32>
    %12 = arith.addf %9, %11 : vector<288x10xf32>
    %cst_5 = arith.constant 0.000000e+00 : f32
    %13 = vector.broadcast %cst_5 : f32 to vector<288x10xf32>
    %14 = arith.maximumf %12, %13 : vector<288x10xf32>
    %cst_6 = arith.constant 0.000000e+00 : f32
    %15 = vector.broadcast %cst_6 : f32 to vector<188x20xf32>
    %16 = vector.extract_strided_slice %14 {offsets = [0, 0], sizes = [188, 10], strides = [1, 1]} : vector<288x10xf32> to vector<188x10xf32>
    %c0_7 = arith.constant 0 : index
    %c0_8 = arith.constant 0 : index
    %c0_9 = arith.constant 0 : index
    %17 = vector.load %arg3[%c0_7, %c0_8, %c0_9] : memref<25x10x20xf32, #tpu.memory_space<vmem>>, vector<1x10x20xf32>
    %18 = vector.shape_cast %17 : vector<1x10x20xf32> to vector<10x20xf32>
    %cst_10 = arith.constant dense<0.000000e+00> : vector<188x20xf32>
    %19 = tpu.matmul %16, %18, %cst_10 {dimension_numbers = #tpu.dot_dimension_numbers<[1], [0], [0], [1], [0, 0, 1, 1], [], []>} : vector<188x10xf32>, vector<10x20xf32>, vector<188x20xf32> -> vector<188x20xf32>
    %20 = arith.addf %15, %19 : vector<188x20xf32>
    %21 = vector.extract_strided_slice %14 {offsets = [1, 0], sizes = [188, 10], strides = [1, 1]} : vector<288x10xf32> to vector<188x10xf32>
    %c1 = arith.constant 1 : index
    %c0_11 = arith.constant 0 : index
    %c0_12 = arith.constant 0 : index
    %22 = vector.load %arg3[%c1, %c0_11, %c0_12] : memref<25x10x20xf32, #tpu.memory_space<vmem>>, vector<1x10x20xf32>
    %23 = vector.shape_cast %22 : vector<1x10x20xf32> to vector<10x20xf32>
    %cst_13 = arith.constant dense<0.000000e+00> : vector<188x20xf32>
    %24 = tpu.matmul %21, %23, %cst_13 {dimension_numbers = #tpu.dot_dimension_numbers<[1], [0], [0], [1], [0, 0, 1, 1], [], []>} : vector<188x10xf32>, vector<10x20xf32>, vector<188x20xf32> -> vector<188x20xf32>
    %25 = arith.addf %20, %24 : vector<188x20xf32>
    %26 = vector.extract_strided_slice %14 {offsets = [2, 0], sizes = [188, 10], strides = [1, 1]} : vector<288x10xf32> to vector<188x10xf32>
    %c2 = arith.constant 2 : index
    %c0_14 = arith.constant 0 : index
    %c0_15 = arith.constant 0 : index
    %27 = vector.load %arg3[%c2, %c0_14, %c0_15] : memref<25x10x20xf32, #tpu.memory_space<vmem>>, vector<1x10x20xf32>
    %28 = vector.shape_cast %27 : vector<1x10x20xf32> to vector<10x20xf32>
    %cst_16 = arith.constant dense<0.000000e+00> : vector<188x20xf32>
    %29 = tpu.matmul %26, %28, %cst_16 {dimension_numbers = #tpu.dot_dimension_numbers<[1], [0], [0], [1], [0, 0, 1, 1], [], []>} : vector<188x10xf32>, vector<10x20xf32>, vector<188x20xf32> -> vector<188x20xf32>
    %30 = arith.addf %25, %29 : vector<188x20xf32>
    %31 = vector.extract_strided_slice %14 {offsets = [3, 0], sizes = [188, 10], strides = [1, 1]} : vector<288x10xf32> to vector<188x10xf32>
    %c3 = arith.constant 3 : index
    %c0_17 = arith.constant 0 : index
    %c0_18 = arith.constant 0 : index
    %32 = vector.load %arg3[%c3, %c0_17, %c0_18] : memref<25x10x20xf32, #tpu.memory_space<vmem>>, vector<1x10x20xf32>
    %33 = vector.shape_cast %32 : vector<1x10x20xf32> to vector<10x20xf32>
    %cst_19 = arith.constant dense<0.000000e+00> : vector<188x20xf32>
    %34 = tpu.matmul %31, %33, %cst_19 {dimension_numbers = #tpu.dot_dimension_numbers<[1], [0], [0], [1], [0, 0, 1, 1], [], []>} : vector<188x10xf32>, vector<10x20xf32>, vector<188x20xf32> -> vector<188x20xf32>
    %35 = arith.addf %30, %34 : vector<188x20xf32>
    %36 = vector.extract_strided_slice %14 {offsets = [4, 0], sizes = [188, 10], strides = [1, 1]} : vector<288x10xf32> to vector<188x10xf32>
    %c4 = arith.constant 4 : index
    %c0_20 = arith.constant 0 : index
    %c0_21 = arith.constant 0 : index
    %37 = vector.load %arg3[%c4, %c0_20, %c0_21] : memref<25x10x20xf32, #tpu.memory_space<vmem>>, vector<1x10x20xf32>
    %38 = vector.shape_cast %37 : vector<1x10x20xf32> to vector<10x20xf32>
    %cst_22 = arith.constant dense<0.000000e+00> : vector<188x20xf32>
    %39 = tpu.matmul %36, %38, %cst_22 {dimension_numbers = #tpu.dot_dimension_numbers<[1], [0], [0], [1], [0, 0, 1, 1], [], []>} : vector<188x10xf32>, vector<10x20xf32>, vector<188x20xf32> -> vector<188x20xf32>
    %40 = arith.addf %35, %39 : vector<188x20xf32>
    %41 = vector.extract_strided_slice %14 {offsets = [24, 0], sizes = [188, 10], strides = [1, 1]} : vector<288x10xf32> to vector<188x10xf32>
    %c5 = arith.constant 5 : index
    %c0_23 = arith.constant 0 : index
    %c0_24 = arith.constant 0 : index
    %42 = vector.load %arg3[%c5, %c0_23, %c0_24] : memref<25x10x20xf32, #tpu.memory_space<vmem>>, vector<1x10x20xf32>
    %43 = vector.shape_cast %42 : vector<1x10x20xf32> to vector<10x20xf32>
    %cst_25 = arith.constant dense<0.000000e+00> : vector<188x20xf32>
    %44 = tpu.matmul %41, %43, %cst_25 {dimension_numbers = #tpu.dot_dimension_numbers<[1], [0], [0], [1], [0, 0, 1, 1], [], []>} : vector<188x10xf32>, vector<10x20xf32>, vector<188x20xf32> -> vector<188x20xf32>
    %45 = arith.addf %40, %44 : vector<188x20xf32>
    %46 = vector.extract_strided_slice %14 {offsets = [25, 0], sizes = [188, 10], strides = [1, 1]} : vector<288x10xf32> to vector<188x10xf32>
    %c6 = arith.constant 6 : index
    %c0_26 = arith.constant 0 : index
    %c0_27 = arith.constant 0 : index
    %47 = vector.load %arg3[%c6, %c0_26, %c0_27] : memref<25x10x20xf32, #tpu.memory_space<vmem>>, vector<1x10x20xf32>
    %48 = vector.shape_cast %47 : vector<1x10x20xf32> to vector<10x20xf32>
    %cst_28 = arith.constant dense<0.000000e+00> : vector<188x20xf32>
    %49 = tpu.matmul %46, %48, %cst_28 {dimension_numbers = #tpu.dot_dimension_numbers<[1], [0], [0], [1], [0, 0, 1, 1], [], []>} : vector<188x10xf32>, vector<10x20xf32>, vector<188x20xf32> -> vector<188x20xf32>
    %50 = arith.addf %45, %49 : vector<188x20xf32>
    %51 = vector.extract_strided_slice %14 {offsets = [26, 0], sizes = [188, 10], strides = [1, 1]} : vector<288x10xf32> to vector<188x10xf32>
    %c7 = arith.constant 7 : index
    %c0_29 = arith.constant 0 : index
    %c0_30 = arith.constant 0 : index
    %52 = vector.load %arg3[%c7, %c0_29, %c0_30] : memref<25x10x20xf32, #tpu.memory_space<vmem>>, vector<1x10x20xf32>
    %53 = vector.shape_cast %52 : vector<1x10x20xf32> to vector<10x20xf32>
    %cst_31 = arith.constant dense<0.000000e+00> : vector<188x20xf32>
    %54 = tpu.matmul %51, %53, %cst_31 {dimension_numbers = #tpu.dot_dimension_numbers<[1], [0], [0], [1], [0, 0, 1, 1], [], []>} : vector<188x10xf32>, vector<10x20xf32>, vector<188x20xf32> -> vector<188x20xf32>
    %55 = arith.addf %50, %54 : vector<188x20xf32>
    %56 = vector.extract_strided_slice %14 {offsets = [27, 0], sizes = [188, 10], strides = [1, 1]} : vector<288x10xf32> to vector<188x10xf32>
    %c8 = arith.constant 8 : index
    %c0_32 = arith.constant 0 : index
    %c0_33 = arith.constant 0 : index
    %57 = vector.load %arg3[%c8, %c0_32, %c0_33] : memref<25x10x20xf32, #tpu.memory_space<vmem>>, vector<1x10x20xf32>
    %58 = vector.shape_cast %57 : vector<1x10x20xf32> to vector<10x20xf32>
    %cst_34 = arith.constant dense<0.000000e+00> : vector<188x20xf32>
    %59 = tpu.matmul %56, %58, %cst_34 {dimension_numbers = #tpu.dot_dimension_numbers<[1], [0], [0], [1], [0, 0, 1, 1], [], []>} : vector<188x10xf32>, vector<10x20xf32>, vector<188x20xf32> -> vector<188x20xf32>
    %60 = arith.addf %55, %59 : vector<188x20xf32>
    %61 = vector.extract_strided_slice %14 {offsets = [28, 0], sizes = [188, 10], strides = [1, 1]} : vector<288x10xf32> to vector<188x10xf32>
    %c9 = arith.constant 9 : index
    %c0_35 = arith.constant 0 : index
    %c0_36 = arith.constant 0 : index
    %62 = vector.load %arg3[%c9, %c0_35, %c0_36] : memref<25x10x20xf32, #tpu.memory_space<vmem>>, vector<1x10x20xf32>
    %63 = vector.shape_cast %62 : vector<1x10x20xf32> to vector<10x20xf32>
    %cst_37 = arith.constant dense<0.000000e+00> : vector<188x20xf32>
    %64 = tpu.matmul %61, %63, %cst_37 {dimension_numbers = #tpu.dot_dimension_numbers<[1], [0], [0], [1], [0, 0, 1, 1], [], []>} : vector<188x10xf32>, vector<10x20xf32>, vector<188x20xf32> -> vector<188x20xf32>
    %65 = arith.addf %60, %64 : vector<188x20xf32>
    %66 = vector.extract_strided_slice %14 {offsets = [48, 0], sizes = [188, 10], strides = [1, 1]} : vector<288x10xf32> to vector<188x10xf32>
    %c10 = arith.constant 10 : index
    %c0_38 = arith.constant 0 : index
    %c0_39 = arith.constant 0 : index
    %67 = vector.load %arg3[%c10, %c0_38, %c0_39] : memref<25x10x20xf32, #tpu.memory_space<vmem>>, vector<1x10x20xf32>
    %68 = vector.shape_cast %67 : vector<1x10x20xf32> to vector<10x20xf32>
    %cst_40 = arith.constant dense<0.000000e+00> : vector<188x20xf32>
    %69 = tpu.matmul %66, %68, %cst_40 {dimension_numbers = #tpu.dot_dimension_numbers<[1], [0], [0], [1], [0, 0, 1, 1], [], []>} : vector<188x10xf32>, vector<10x20xf32>, vector<188x20xf32> -> vector<188x20xf32>
    %70 = arith.addf %65, %69 : vector<188x20xf32>
    %71 = vector.extract_strided_slice %14 {offsets = [49, 0], sizes = [188, 10], strides = [1, 1]} : vector<288x10xf32> to vector<188x10xf32>
    %c11 = arith.constant 11 : index
    %c0_41 = arith.constant 0 : index
    %c0_42 = arith.constant 0 : index
    %72 = vector.load %arg3[%c11, %c0_41, %c0_42] : memref<25x10x20xf32, #tpu.memory_space<vmem>>, vector<1x10x20xf32>
    %73 = vector.shape_cast %72 : vector<1x10x20xf32> to vector<10x20xf32>
    %cst_43 = arith.constant dense<0.000000e+00> : vector<188x20xf32>
    %74 = tpu.matmul %71, %73, %cst_43 {dimension_numbers = #tpu.dot_dimension_numbers<[1], [0], [0], [1], [0, 0, 1, 1], [], []>} : vector<188x10xf32>, vector<10x20xf32>, vector<188x20xf32> -> vector<188x20xf32>
    %75 = arith.addf %70, %74 : vector<188x20xf32>
    %76 = vector.extract_strided_slice %14 {offsets = [50, 0], sizes = [188, 10], strides = [1, 1]} : vector<288x10xf32> to vector<188x10xf32>
    %c12 = arith.constant 12 : index
    %c0_44 = arith.constant 0 : index
    %c0_45 = arith.constant 0 : index
    %77 = vector.load %arg3[%c12, %c0_44, %c0_45] : memref<25x10x20xf32, #tpu.memory_space<vmem>>, vector<1x10x20xf32>
    %78 = vector.shape_cast %77 : vector<1x10x20xf32> to vector<10x20xf32>
    %cst_46 = arith.constant dense<0.000000e+00> : vector<188x20xf32>
    %79 = tpu.matmul %76, %78, %cst_46 {dimension_numbers = #tpu.dot_dimension_numbers<[1], [0], [0], [1], [0, 0, 1, 1], [], []>} : vector<188x10xf32>, vector<10x20xf32>, vector<188x20xf32> -> vector<188x20xf32>
    %80 = arith.addf %75, %79 : vector<188x20xf32>
    %81 = vector.extract_strided_slice %14 {offsets = [51, 0], sizes = [188, 10], strides = [1, 1]} : vector<288x10xf32> to vector<188x10xf32>
    %c13 = arith.constant 13 : index
    %c0_47 = arith.constant 0 : index
    %c0_48 = arith.constant 0 : index
    %82 = vector.load %arg3[%c13, %c0_47, %c0_48] : memref<25x10x20xf32, #tpu.memory_space<vmem>>, vector<1x10x20xf32>
    %83 = vector.shape_cast %82 : vector<1x10x20xf32> to vector<10x20xf32>
    %cst_49 = arith.constant dense<0.000000e+00> : vector<188x20xf32>
    %84 = tpu.matmul %81, %83, %cst_49 {dimension_numbers = #tpu.dot_dimension_numbers<[1], [0], [0], [1], [0, 0, 1, 1], [], []>} : vector<188x10xf32>, vector<10x20xf32>, vector<188x20xf32> -> vector<188x20xf32>
    %85 = arith.addf %80, %84 : vector<188x20xf32>
    %86 = vector.extract_strided_slice %14 {offsets = [52, 0], sizes = [188, 10], strides = [1, 1]} : vector<288x10xf32> to vector<188x10xf32>
    %c14 = arith.constant 14 : index
    %c0_50 = arith.constant 0 : index
    %c0_51 = arith.constant 0 : index
    %87 = vector.load %arg3[%c14, %c0_50, %c0_51] : memref<25x10x20xf32, #tpu.memory_space<vmem>>, vector<1x10x20xf32>
    %88 = vector.shape_cast %87 : vector<1x10x20xf32> to vector<10x20xf32>
    %cst_52 = arith.constant dense<0.000000e+00> : vector<188x20xf32>
    %89 = tpu.matmul %86, %88, %cst_52 {dimension_numbers = #tpu.dot_dimension_numbers<[1], [0], [0], [1], [0, 0, 1, 1], [], []>} : vector<188x10xf32>, vector<10x20xf32>, vector<188x20xf32> -> vector<188x20xf32>
    %90 = arith.addf %85, %89 : vector<188x20xf32>
    %91 = vector.extract_strided_slice %14 {offsets = [72, 0], sizes = [188, 10], strides = [1, 1]} : vector<288x10xf32> to vector<188x10xf32>
    %c15 = arith.constant 15 : index
    %c0_53 = arith.constant 0 : index
    %c0_54 = arith.constant 0 : index
    %92 = vector.load %arg3[%c15, %c0_53, %c0_54] : memref<25x10x20xf32, #tpu.memory_space<vmem>>, vector<1x10x20xf32>
    %93 = vector.shape_cast %92 : vector<1x10x20xf32> to vector<10x20xf32>
    %cst_55 = arith.constant dense<0.000000e+00> : vector<188x20xf32>
    %94 = tpu.matmul %91, %93, %cst_55 {dimension_numbers = #tpu.dot_dimension_numbers<[1], [0], [0], [1], [0, 0, 1, 1], [], []>} : vector<188x10xf32>, vector<10x20xf32>, vector<188x20xf32> -> vector<188x20xf32>
    %95 = arith.addf %90, %94 : vector<188x20xf32>
    %96 = vector.extract_strided_slice %14 {offsets = [73, 0], sizes = [188, 10], strides = [1, 1]} : vector<288x10xf32> to vector<188x10xf32>
    %c16 = arith.constant 16 : index
    %c0_56 = arith.constant 0 : index
    %c0_57 = arith.constant 0 : index
    %97 = vector.load %arg3[%c16, %c0_56, %c0_57] : memref<25x10x20xf32, #tpu.memory_space<vmem>>, vector<1x10x20xf32>
    %98 = vector.shape_cast %97 : vector<1x10x20xf32> to vector<10x20xf32>
    %cst_58 = arith.constant dense<0.000000e+00> : vector<188x20xf32>
    %99 = tpu.matmul %96, %98, %cst_58 {dimension_numbers = #tpu.dot_dimension_numbers<[1], [0], [0], [1], [0, 0, 1, 1], [], []>} : vector<188x10xf32>, vector<10x20xf32>, vector<188x20xf32> -> vector<188x20xf32>
    %100 = arith.addf %95, %99 : vector<188x20xf32>
    %101 = vector.extract_strided_slice %14 {offsets = [74, 0], sizes = [188, 10], strides = [1, 1]} : vector<288x10xf32> to vector<188x10xf32>
    %c17 = arith.constant 17 : index
    %c0_59 = arith.constant 0 : index
    %c0_60 = arith.constant 0 : index
    %102 = vector.load %arg3[%c17, %c0_59, %c0_60] : memref<25x10x20xf32, #tpu.memory_space<vmem>>, vector<1x10x20xf32>
    %103 = vector.shape_cast %102 : vector<1x10x20xf32> to vector<10x20xf32>
    %cst_61 = arith.constant dense<0.000000e+00> : vector<188x20xf32>
    %104 = tpu.matmul %101, %103, %cst_61 {dimension_numbers = #tpu.dot_dimension_numbers<[1], [0], [0], [1], [0, 0, 1, 1], [], []>} : vector<188x10xf32>, vector<10x20xf32>, vector<188x20xf32> -> vector<188x20xf32>
    %105 = arith.addf %100, %104 : vector<188x20xf32>
    %106 = vector.extract_strided_slice %14 {offsets = [75, 0], sizes = [188, 10], strides = [1, 1]} : vector<288x10xf32> to vector<188x10xf32>
    %c18 = arith.constant 18 : index
    %c0_62 = arith.constant 0 : index
    %c0_63 = arith.constant 0 : index
    %107 = vector.load %arg3[%c18, %c0_62, %c0_63] : memref<25x10x20xf32, #tpu.memory_space<vmem>>, vector<1x10x20xf32>
    %108 = vector.shape_cast %107 : vector<1x10x20xf32> to vector<10x20xf32>
    %cst_64 = arith.constant dense<0.000000e+00> : vector<188x20xf32>
    %109 = tpu.matmul %106, %108, %cst_64 {dimension_numbers = #tpu.dot_dimension_numbers<[1], [0], [0], [1], [0, 0, 1, 1], [], []>} : vector<188x10xf32>, vector<10x20xf32>, vector<188x20xf32> -> vector<188x20xf32>
    %110 = arith.addf %105, %109 : vector<188x20xf32>
    %111 = vector.extract_strided_slice %14 {offsets = [76, 0], sizes = [188, 10], strides = [1, 1]} : vector<288x10xf32> to vector<188x10xf32>
    %c19 = arith.constant 19 : index
    %c0_65 = arith.constant 0 : index
    %c0_66 = arith.constant 0 : index
    %112 = vector.load %arg3[%c19, %c0_65, %c0_66] : memref<25x10x20xf32, #tpu.memory_space<vmem>>, vector<1x10x20xf32>
    %113 = vector.shape_cast %112 : vector<1x10x20xf32> to vector<10x20xf32>
    %cst_67 = arith.constant dense<0.000000e+00> : vector<188x20xf32>
    %114 = tpu.matmul %111, %113, %cst_67 {dimension_numbers = #tpu.dot_dimension_numbers<[1], [0], [0], [1], [0, 0, 1, 1], [], []>} : vector<188x10xf32>, vector<10x20xf32>, vector<188x20xf32> -> vector<188x20xf32>
    %115 = arith.addf %110, %114 : vector<188x20xf32>
    %116 = vector.extract_strided_slice %14 {offsets = [96, 0], sizes = [188, 10], strides = [1, 1]} : vector<288x10xf32> to vector<188x10xf32>
    %c20 = arith.constant 20 : index
    %c0_68 = arith.constant 0 : index
    %c0_69 = arith.constant 0 : index
    %117 = vector.load %arg3[%c20, %c0_68, %c0_69] : memref<25x10x20xf32, #tpu.memory_space<vmem>>, vector<1x10x20xf32>
    %118 = vector.shape_cast %117 : vector<1x10x20xf32> to vector<10x20xf32>
    %cst_70 = arith.constant dense<0.000000e+00> : vector<188x20xf32>
    %119 = tpu.matmul %116, %118, %cst_70 {dimension_numbers = #tpu.dot_dimension_numbers<[1], [0], [0], [1], [0, 0, 1, 1], [], []>} : vector<188x10xf32>, vector<10x20xf32>, vector<188x20xf32> -> vector<188x20xf32>
    %120 = arith.addf %115, %119 : vector<188x20xf32>
    %121 = vector.extract_strided_slice %14 {offsets = [97, 0], sizes = [188, 10], strides = [1, 1]} : vector<288x10xf32> to vector<188x10xf32>
    %c21 = arith.constant 21 : index
    %c0_71 = arith.constant 0 : index
    %c0_72 = arith.constant 0 : index
    %122 = vector.load %arg3[%c21, %c0_71, %c0_72] : memref<25x10x20xf32, #tpu.memory_space<vmem>>, vector<1x10x20xf32>
    %123 = vector.shape_cast %122 : vector<1x10x20xf32> to vector<10x20xf32>
    %cst_73 = arith.constant dense<0.000000e+00> : vector<188x20xf32>
    %124 = tpu.matmul %121, %123, %cst_73 {dimension_numbers = #tpu.dot_dimension_numbers<[1], [0], [0], [1], [0, 0, 1, 1], [], []>} : vector<188x10xf32>, vector<10x20xf32>, vector<188x20xf32> -> vector<188x20xf32>
    %125 = arith.addf %120, %124 : vector<188x20xf32>
    %126 = vector.extract_strided_slice %14 {offsets = [98, 0], sizes = [188, 10], strides = [1, 1]} : vector<288x10xf32> to vector<188x10xf32>
    %c22 = arith.constant 22 : index
    %c0_74 = arith.constant 0 : index
    %c0_75 = arith.constant 0 : index
    %127 = vector.load %arg3[%c22, %c0_74, %c0_75] : memref<25x10x20xf32, #tpu.memory_space<vmem>>, vector<1x10x20xf32>
    %128 = vector.shape_cast %127 : vector<1x10x20xf32> to vector<10x20xf32>
    %cst_76 = arith.constant dense<0.000000e+00> : vector<188x20xf32>
    %129 = tpu.matmul %126, %128, %cst_76 {dimension_numbers = #tpu.dot_dimension_numbers<[1], [0], [0], [1], [0, 0, 1, 1], [], []>} : vector<188x10xf32>, vector<10x20xf32>, vector<188x20xf32> -> vector<188x20xf32>
    %130 = arith.addf %125, %129 : vector<188x20xf32>
    %131 = vector.extract_strided_slice %14 {offsets = [99, 0], sizes = [188, 10], strides = [1, 1]} : vector<288x10xf32> to vector<188x10xf32>
    %c23 = arith.constant 23 : index
    %c0_77 = arith.constant 0 : index
    %c0_78 = arith.constant 0 : index
    %132 = vector.load %arg3[%c23, %c0_77, %c0_78] : memref<25x10x20xf32, #tpu.memory_space<vmem>>, vector<1x10x20xf32>
    %133 = vector.shape_cast %132 : vector<1x10x20xf32> to vector<10x20xf32>
    %cst_79 = arith.constant dense<0.000000e+00> : vector<188x20xf32>
    %134 = tpu.matmul %131, %133, %cst_79 {dimension_numbers = #tpu.dot_dimension_numbers<[1], [0], [0], [1], [0, 0, 1, 1], [], []>} : vector<188x10xf32>, vector<10x20xf32>, vector<188x20xf32> -> vector<188x20xf32>
    %135 = arith.addf %130, %134 : vector<188x20xf32>
    %136 = vector.extract_strided_slice %14 {offsets = [100, 0], sizes = [188, 10], strides = [1, 1]} : vector<288x10xf32> to vector<188x10xf32>
    %c24 = arith.constant 24 : index
    %c0_80 = arith.constant 0 : index
    %c0_81 = arith.constant 0 : index
    %137 = vector.load %arg3[%c24, %c0_80, %c0_81] : memref<25x10x20xf32, #tpu.memory_space<vmem>>, vector<1x10x20xf32>
    %138 = vector.shape_cast %137 : vector<1x10x20xf32> to vector<10x20xf32>
    %cst_82 = arith.constant dense<0.000000e+00> : vector<188x20xf32>
    %139 = tpu.matmul %136, %138, %cst_82 {dimension_numbers = #tpu.dot_dimension_numbers<[1], [0], [0], [1], [0, 0, 1, 1], [], []>} : vector<188x10xf32>, vector<10x20xf32>, vector<188x20xf32> -> vector<188x20xf32>
    %140 = arith.addf %135, %139 : vector<188x20xf32>
    %c0_83 = arith.constant 0 : index
    %c0_84 = arith.constant 0 : index
    %141 = vector.load %arg5[%c0_83, %c0_84] : memref<128x188xf32, #tpu.memory_space<vmem>>, vector<128x188xf32>
    %cst_85 = arith.constant dense<0.000000e+00> : vector<128x20xf32>
    %142 = tpu.matmul %141, %140, %cst_85 {dimension_numbers = #tpu.dot_dimension_numbers<[1], [0], [0], [1], [0, 0, 1, 1], [], []>} : vector<128x188xf32>, vector<188x20xf32>, vector<128x20xf32> -> vector<128x20xf32>
    %c0_86 = arith.constant 0 : index
    %c0_87 = arith.constant 0 : index
    %143 = vector.load %arg4[%c0_86, %c0_87] : memref<1x20xf32, #tpu.memory_space<vmem>>, vector<1x20xf32>
    %c0_88 = arith.constant 0 : index
    %c0_89 = arith.constant 0 : index
    %144 = vector.load %arg7[%c0_88, %c0_89] : memref<1x50xf32, #tpu.memory_space<vmem>>, vector<1x50xf32>
    %145 = vector.extract_strided_slice %142 {offsets = [0, 0], sizes = [16, 20], strides = [1, 1]} : vector<128x20xf32> to vector<16x20xf32>
    %146 = vector.extract_strided_slice %142 {offsets = [32, 0], sizes = [16, 20], strides = [1, 1]} : vector<128x20xf32> to vector<16x20xf32>
    %147 = vector.extract_strided_slice %142 {offsets = [64, 0], sizes = [16, 20], strides = [1, 1]} : vector<128x20xf32> to vector<16x20xf32>
    %148 = vector.extract_strided_slice %142 {offsets = [96, 0], sizes = [16, 20], strides = [1, 1]} : vector<128x20xf32> to vector<16x20xf32>
    %149 = arith.maximumf %145, %146 : vector<16x20xf32>
    %150 = arith.maximumf %147, %148 : vector<16x20xf32>
    %151 = arith.maximumf %149, %150 : vector<16x20xf32>
    %152 = vector.broadcast %143 : vector<1x20xf32> to vector<16x20xf32>
    %153 = arith.addf %151, %152 : vector<16x20xf32>
    %cst_90 = arith.constant 0.000000e+00 : f32
    %154 = vector.broadcast %cst_90 : f32 to vector<16x20xf32>
    %155 = arith.maximumf %153, %154 : vector<16x20xf32>
    %156 = vector.extract_strided_slice %155 {offsets = [0, 0], sizes = [1, 20], strides = [1, 1]} : vector<16x20xf32> to vector<1x20xf32>
    %c0_91 = arith.constant 0 : index
    %c0_92 = arith.constant 0 : index
    %c0_93 = arith.constant 0 : index
    %157 = vector.load %arg6[%c0_91, %c0_92, %c0_93] : memref<16x20x50xf32, #tpu.memory_space<vmem>>, vector<1x20x50xf32>
    %158 = vector.shape_cast %157 : vector<1x20x50xf32> to vector<20x50xf32>
    %cst_94 = arith.constant dense<0.000000e+00> : vector<1x50xf32>
    %159 = tpu.matmul %156, %158, %cst_94 {dimension_numbers = #tpu.dot_dimension_numbers<[1], [0], [0], [1], [0, 0, 1, 1], [], []>} : vector<1x20xf32>, vector<20x50xf32>, vector<1x50xf32> -> vector<1x50xf32>
    %160 = arith.addf %144, %159 : vector<1x50xf32>
    %161 = vector.extract_strided_slice %155 {offsets = [1, 0], sizes = [1, 20], strides = [1, 1]} : vector<16x20xf32> to vector<1x20xf32>
    %c1_95 = arith.constant 1 : index
    %c0_96 = arith.constant 0 : index
    %c0_97 = arith.constant 0 : index
    %162 = vector.load %arg6[%c1_95, %c0_96, %c0_97] : memref<16x20x50xf32, #tpu.memory_space<vmem>>, vector<1x20x50xf32>
    %163 = vector.shape_cast %162 : vector<1x20x50xf32> to vector<20x50xf32>
    %cst_98 = arith.constant dense<0.000000e+00> : vector<1x50xf32>
    %164 = tpu.matmul %161, %163, %cst_98 {dimension_numbers = #tpu.dot_dimension_numbers<[1], [0], [0], [1], [0, 0, 1, 1], [], []>} : vector<1x20xf32>, vector<20x50xf32>, vector<1x50xf32> -> vector<1x50xf32>
    %165 = arith.addf %160, %164 : vector<1x50xf32>
    %166 = vector.extract_strided_slice %155 {offsets = [2, 0], sizes = [1, 20], strides = [1, 1]} : vector<16x20xf32> to vector<1x20xf32>
    %c2_99 = arith.constant 2 : index
    %c0_100 = arith.constant 0 : index
    %c0_101 = arith.constant 0 : index
    %167 = vector.load %arg6[%c2_99, %c0_100, %c0_101] : memref<16x20x50xf32, #tpu.memory_space<vmem>>, vector<1x20x50xf32>
    %168 = vector.shape_cast %167 : vector<1x20x50xf32> to vector<20x50xf32>
    %cst_102 = arith.constant dense<0.000000e+00> : vector<1x50xf32>
    %169 = tpu.matmul %166, %168, %cst_102 {dimension_numbers = #tpu.dot_dimension_numbers<[1], [0], [0], [1], [0, 0, 1, 1], [], []>} : vector<1x20xf32>, vector<20x50xf32>, vector<1x50xf32> -> vector<1x50xf32>
    %170 = arith.addf %165, %169 : vector<1x50xf32>
    %171 = vector.extract_strided_slice %155 {offsets = [3, 0], sizes = [1, 20], strides = [1, 1]} : vector<16x20xf32> to vector<1x20xf32>
    %c3_103 = arith.constant 3 : index
    %c0_104 = arith.constant 0 : index
    %c0_105 = arith.constant 0 : index
    %172 = vector.load %arg6[%c3_103, %c0_104, %c0_105] : memref<16x20x50xf32, #tpu.memory_space<vmem>>, vector<1x20x50xf32>
    %173 = vector.shape_cast %172 : vector<1x20x50xf32> to vector<20x50xf32>
    %cst_106 = arith.constant dense<0.000000e+00> : vector<1x50xf32>
    %174 = tpu.matmul %171, %173, %cst_106 {dimension_numbers = #tpu.dot_dimension_numbers<[1], [0], [0], [1], [0, 0, 1, 1], [], []>} : vector<1x20xf32>, vector<20x50xf32>, vector<1x50xf32> -> vector<1x50xf32>
    %175 = arith.addf %170, %174 : vector<1x50xf32>
    %176 = vector.extract_strided_slice %155 {offsets = [4, 0], sizes = [1, 20], strides = [1, 1]} : vector<16x20xf32> to vector<1x20xf32>
    %c4_107 = arith.constant 4 : index
    %c0_108 = arith.constant 0 : index
    %c0_109 = arith.constant 0 : index
    %177 = vector.load %arg6[%c4_107, %c0_108, %c0_109] : memref<16x20x50xf32, #tpu.memory_space<vmem>>, vector<1x20x50xf32>
    %178 = vector.shape_cast %177 : vector<1x20x50xf32> to vector<20x50xf32>
    %cst_110 = arith.constant dense<0.000000e+00> : vector<1x50xf32>
    %179 = tpu.matmul %176, %178, %cst_110 {dimension_numbers = #tpu.dot_dimension_numbers<[1], [0], [0], [1], [0, 0, 1, 1], [], []>} : vector<1x20xf32>, vector<20x50xf32>, vector<1x50xf32> -> vector<1x50xf32>
    %180 = arith.addf %175, %179 : vector<1x50xf32>
    %181 = vector.extract_strided_slice %155 {offsets = [5, 0], sizes = [1, 20], strides = [1, 1]} : vector<16x20xf32> to vector<1x20xf32>
    %c5_111 = arith.constant 5 : index
    %c0_112 = arith.constant 0 : index
    %c0_113 = arith.constant 0 : index
    %182 = vector.load %arg6[%c5_111, %c0_112, %c0_113] : memref<16x20x50xf32, #tpu.memory_space<vmem>>, vector<1x20x50xf32>
    %183 = vector.shape_cast %182 : vector<1x20x50xf32> to vector<20x50xf32>
    %cst_114 = arith.constant dense<0.000000e+00> : vector<1x50xf32>
    %184 = tpu.matmul %181, %183, %cst_114 {dimension_numbers = #tpu.dot_dimension_numbers<[1], [0], [0], [1], [0, 0, 1, 1], [], []>} : vector<1x20xf32>, vector<20x50xf32>, vector<1x50xf32> -> vector<1x50xf32>
    %185 = arith.addf %180, %184 : vector<1x50xf32>
    %186 = vector.extract_strided_slice %155 {offsets = [6, 0], sizes = [1, 20], strides = [1, 1]} : vector<16x20xf32> to vector<1x20xf32>
    %c6_115 = arith.constant 6 : index
    %c0_116 = arith.constant 0 : index
    %c0_117 = arith.constant 0 : index
    %187 = vector.load %arg6[%c6_115, %c0_116, %c0_117] : memref<16x20x50xf32, #tpu.memory_space<vmem>>, vector<1x20x50xf32>
    %188 = vector.shape_cast %187 : vector<1x20x50xf32> to vector<20x50xf32>
    %cst_118 = arith.constant dense<0.000000e+00> : vector<1x50xf32>
    %189 = tpu.matmul %186, %188, %cst_118 {dimension_numbers = #tpu.dot_dimension_numbers<[1], [0], [0], [1], [0, 0, 1, 1], [], []>} : vector<1x20xf32>, vector<20x50xf32>, vector<1x50xf32> -> vector<1x50xf32>
    %190 = arith.addf %185, %189 : vector<1x50xf32>
    %191 = vector.extract_strided_slice %155 {offsets = [7, 0], sizes = [1, 20], strides = [1, 1]} : vector<16x20xf32> to vector<1x20xf32>
    %c7_119 = arith.constant 7 : index
    %c0_120 = arith.constant 0 : index
    %c0_121 = arith.constant 0 : index
    %192 = vector.load %arg6[%c7_119, %c0_120, %c0_121] : memref<16x20x50xf32, #tpu.memory_space<vmem>>, vector<1x20x50xf32>
    %193 = vector.shape_cast %192 : vector<1x20x50xf32> to vector<20x50xf32>
    %cst_122 = arith.constant dense<0.000000e+00> : vector<1x50xf32>
    %194 = tpu.matmul %191, %193, %cst_122 {dimension_numbers = #tpu.dot_dimension_numbers<[1], [0], [0], [1], [0, 0, 1, 1], [], []>} : vector<1x20xf32>, vector<20x50xf32>, vector<1x50xf32> -> vector<1x50xf32>
    %195 = arith.addf %190, %194 : vector<1x50xf32>
    %196 = vector.extract_strided_slice %155 {offsets = [8, 0], sizes = [1, 20], strides = [1, 1]} : vector<16x20xf32> to vector<1x20xf32>
    %c8_123 = arith.constant 8 : index
    %c0_124 = arith.constant 0 : index
    %c0_125 = arith.constant 0 : index
    %197 = vector.load %arg6[%c8_123, %c0_124, %c0_125] : memref<16x20x50xf32, #tpu.memory_space<vmem>>, vector<1x20x50xf32>
    %198 = vector.shape_cast %197 : vector<1x20x50xf32> to vector<20x50xf32>
    %cst_126 = arith.constant dense<0.000000e+00> : vector<1x50xf32>
    %199 = tpu.matmul %196, %198, %cst_126 {dimension_numbers = #tpu.dot_dimension_numbers<[1], [0], [0], [1], [0, 0, 1, 1], [], []>} : vector<1x20xf32>, vector<20x50xf32>, vector<1x50xf32> -> vector<1x50xf32>
    %200 = arith.addf %195, %199 : vector<1x50xf32>
    %201 = vector.extract_strided_slice %155 {offsets = [9, 0], sizes = [1, 20], strides = [1, 1]} : vector<16x20xf32> to vector<1x20xf32>
    %c9_127 = arith.constant 9 : index
    %c0_128 = arith.constant 0 : index
    %c0_129 = arith.constant 0 : index
    %202 = vector.load %arg6[%c9_127, %c0_128, %c0_129] : memref<16x20x50xf32, #tpu.memory_space<vmem>>, vector<1x20x50xf32>
    %203 = vector.shape_cast %202 : vector<1x20x50xf32> to vector<20x50xf32>
    %cst_130 = arith.constant dense<0.000000e+00> : vector<1x50xf32>
    %204 = tpu.matmul %201, %203, %cst_130 {dimension_numbers = #tpu.dot_dimension_numbers<[1], [0], [0], [1], [0, 0, 1, 1], [], []>} : vector<1x20xf32>, vector<20x50xf32>, vector<1x50xf32> -> vector<1x50xf32>
    %205 = arith.addf %200, %204 : vector<1x50xf32>
    %206 = vector.extract_strided_slice %155 {offsets = [10, 0], sizes = [1, 20], strides = [1, 1]} : vector<16x20xf32> to vector<1x20xf32>
    %c10_131 = arith.constant 10 : index
    %c0_132 = arith.constant 0 : index
    %c0_133 = arith.constant 0 : index
    %207 = vector.load %arg6[%c10_131, %c0_132, %c0_133] : memref<16x20x50xf32, #tpu.memory_space<vmem>>, vector<1x20x50xf32>
    %208 = vector.shape_cast %207 : vector<1x20x50xf32> to vector<20x50xf32>
    %cst_134 = arith.constant dense<0.000000e+00> : vector<1x50xf32>
    %209 = tpu.matmul %206, %208, %cst_134 {dimension_numbers = #tpu.dot_dimension_numbers<[1], [0], [0], [1], [0, 0, 1, 1], [], []>} : vector<1x20xf32>, vector<20x50xf32>, vector<1x50xf32> -> vector<1x50xf32>
    %210 = arith.addf %205, %209 : vector<1x50xf32>
    %211 = vector.extract_strided_slice %155 {offsets = [11, 0], sizes = [1, 20], strides = [1, 1]} : vector<16x20xf32> to vector<1x20xf32>
    %c11_135 = arith.constant 11 : index
    %c0_136 = arith.constant 0 : index
    %c0_137 = arith.constant 0 : index
    %212 = vector.load %arg6[%c11_135, %c0_136, %c0_137] : memref<16x20x50xf32, #tpu.memory_space<vmem>>, vector<1x20x50xf32>
    %213 = vector.shape_cast %212 : vector<1x20x50xf32> to vector<20x50xf32>
    %cst_138 = arith.constant dense<0.000000e+00> : vector<1x50xf32>
    %214 = tpu.matmul %211, %213, %cst_138 {dimension_numbers = #tpu.dot_dimension_numbers<[1], [0], [0], [1], [0, 0, 1, 1], [], []>} : vector<1x20xf32>, vector<20x50xf32>, vector<1x50xf32> -> vector<1x50xf32>
    %215 = arith.addf %210, %214 : vector<1x50xf32>
    %216 = vector.extract_strided_slice %155 {offsets = [12, 0], sizes = [1, 20], strides = [1, 1]} : vector<16x20xf32> to vector<1x20xf32>
    %c12_139 = arith.constant 12 : index
    %c0_140 = arith.constant 0 : index
    %c0_141 = arith.constant 0 : index
    %217 = vector.load %arg6[%c12_139, %c0_140, %c0_141] : memref<16x20x50xf32, #tpu.memory_space<vmem>>, vector<1x20x50xf32>
    %218 = vector.shape_cast %217 : vector<1x20x50xf32> to vector<20x50xf32>
    %cst_142 = arith.constant dense<0.000000e+00> : vector<1x50xf32>
    %219 = tpu.matmul %216, %218, %cst_142 {dimension_numbers = #tpu.dot_dimension_numbers<[1], [0], [0], [1], [0, 0, 1, 1], [], []>} : vector<1x20xf32>, vector<20x50xf32>, vector<1x50xf32> -> vector<1x50xf32>
    %220 = arith.addf %215, %219 : vector<1x50xf32>
    %221 = vector.extract_strided_slice %155 {offsets = [13, 0], sizes = [1, 20], strides = [1, 1]} : vector<16x20xf32> to vector<1x20xf32>
    %c13_143 = arith.constant 13 : index
    %c0_144 = arith.constant 0 : index
    %c0_145 = arith.constant 0 : index
    %222 = vector.load %arg6[%c13_143, %c0_144, %c0_145] : memref<16x20x50xf32, #tpu.memory_space<vmem>>, vector<1x20x50xf32>
    %223 = vector.shape_cast %222 : vector<1x20x50xf32> to vector<20x50xf32>
    %cst_146 = arith.constant dense<0.000000e+00> : vector<1x50xf32>
    %224 = tpu.matmul %221, %223, %cst_146 {dimension_numbers = #tpu.dot_dimension_numbers<[1], [0], [0], [1], [0, 0, 1, 1], [], []>} : vector<1x20xf32>, vector<20x50xf32>, vector<1x50xf32> -> vector<1x50xf32>
    %225 = arith.addf %220, %224 : vector<1x50xf32>
    %226 = vector.extract_strided_slice %155 {offsets = [14, 0], sizes = [1, 20], strides = [1, 1]} : vector<16x20xf32> to vector<1x20xf32>
    %c14_147 = arith.constant 14 : index
    %c0_148 = arith.constant 0 : index
    %c0_149 = arith.constant 0 : index
    %227 = vector.load %arg6[%c14_147, %c0_148, %c0_149] : memref<16x20x50xf32, #tpu.memory_space<vmem>>, vector<1x20x50xf32>
    %228 = vector.shape_cast %227 : vector<1x20x50xf32> to vector<20x50xf32>
    %cst_150 = arith.constant dense<0.000000e+00> : vector<1x50xf32>
    %229 = tpu.matmul %226, %228, %cst_150 {dimension_numbers = #tpu.dot_dimension_numbers<[1], [0], [0], [1], [0, 0, 1, 1], [], []>} : vector<1x20xf32>, vector<20x50xf32>, vector<1x50xf32> -> vector<1x50xf32>
    %230 = arith.addf %225, %229 : vector<1x50xf32>
    %231 = vector.extract_strided_slice %155 {offsets = [15, 0], sizes = [1, 20], strides = [1, 1]} : vector<16x20xf32> to vector<1x20xf32>
    %c15_151 = arith.constant 15 : index
    %c0_152 = arith.constant 0 : index
    %c0_153 = arith.constant 0 : index
    %232 = vector.load %arg6[%c15_151, %c0_152, %c0_153] : memref<16x20x50xf32, #tpu.memory_space<vmem>>, vector<1x20x50xf32>
    %233 = vector.shape_cast %232 : vector<1x20x50xf32> to vector<20x50xf32>
    %cst_154 = arith.constant dense<0.000000e+00> : vector<1x50xf32>
    %234 = tpu.matmul %231, %233, %cst_154 {dimension_numbers = #tpu.dot_dimension_numbers<[1], [0], [0], [1], [0, 0, 1, 1], [], []>} : vector<1x20xf32>, vector<20x50xf32>, vector<1x50xf32> -> vector<1x50xf32>
    %235 = arith.addf %230, %234 : vector<1x50xf32>
    %cst_155 = arith.constant 0.000000e+00 : f32
    %236 = vector.broadcast %cst_155 : f32 to vector<1x50xf32>
    %237 = arith.maximumf %235, %236 : vector<1x50xf32>
    %c0_156 = arith.constant 0 : index
    %c0_157 = arith.constant 0 : index
    %238 = vector.load %arg8[%c0_156, %c0_157] : memref<50x10xf32, #tpu.memory_space<vmem>>, vector<50x10xf32>
    %cst_158 = arith.constant dense<0.000000e+00> : vector<1x10xf32>
    %239 = tpu.matmul %237, %238, %cst_158 {dimension_numbers = #tpu.dot_dimension_numbers<[1], [0], [0], [1], [0, 0, 1, 1], [], []>} : vector<1x50xf32>, vector<50x10xf32>, vector<1x10xf32> -> vector<1x10xf32>
    %c0_159 = arith.constant 0 : index
    %c0_160 = arith.constant 0 : index
    %240 = vector.load %arg9[%c0_159, %c0_160] : memref<1x10xf32, #tpu.memory_space<vmem>>, vector<1x10xf32>
    %241 = arith.addf %239, %240 : vector<1x10xf32>
    %cst_161 = arith.constant dense<0xFF800000> : vector<1xf32>
    %242 = vector.multi_reduction <maximumf>, %241, %cst_161 [1] : vector<1x10xf32> to vector<1xf32>
    %243 = vector.shape_cast %242 : vector<1xf32> to vector<1x1xf32>
    %244 = vector.broadcast %243 : vector<1x1xf32> to vector<1x10xf32>
    %245 = arith.subf %241, %244 : vector<1x10xf32>
    %246 = math.exp %245 : vector<1x10xf32>
    %cst_162 = arith.constant dense<0.000000e+00> : vector<1xf32>
    %247 = vector.multi_reduction <add>, %246, %cst_162 [1] : vector<1x10xf32> to vector<1xf32>
    %248 = vector.shape_cast %247 : vector<1xf32> to vector<1x1xf32>
    %249 = math.log %248 : vector<1x1xf32>
    %250 = vector.broadcast %243 : vector<1x1xf32> to vector<1x10xf32>
    %251 = arith.subf %241, %250 : vector<1x10xf32>
    %252 = vector.broadcast %249 : vector<1x1xf32> to vector<1x10xf32>
    %253 = arith.subf %251, %252 : vector<1x10xf32>
    %c0_163 = arith.constant 0 : index
    %c0_164 = arith.constant 0 : index
    %254 = vector.load %arg10[%c0_163, %c0_164] : memref<2x10xf32, #tpu.memory_space<vmem>>, vector<1x10xf32>
    tpu.vector_store %arg10[%c0_163, %c0_164], %253 {strides = array<i32>} : memref<2x10xf32, #tpu.memory_space<vmem>>, vector<1x10xf32>,
    %255 = vector.extract_strided_slice %142 {offsets = [16, 0], sizes = [16, 20], strides = [1, 1]} : vector<128x20xf32> to vector<16x20xf32>
    %256 = vector.extract_strided_slice %142 {offsets = [48, 0], sizes = [16, 20], strides = [1, 1]} : vector<128x20xf32> to vector<16x20xf32>
    %257 = vector.extract_strided_slice %142 {offsets = [80, 0], sizes = [16, 20], strides = [1, 1]} : vector<128x20xf32> to vector<16x20xf32>
    %258 = vector.extract_strided_slice %142 {offsets = [112, 0], sizes = [16, 20], strides = [1, 1]} : vector<128x20xf32> to vector<16x20xf32>
    %259 = arith.maximumf %255, %256 : vector<16x20xf32>
    %260 = arith.maximumf %257, %258 : vector<16x20xf32>
    %261 = arith.maximumf %259, %260 : vector<16x20xf32>
    %262 = vector.broadcast %143 : vector<1x20xf32> to vector<16x20xf32>
    %263 = arith.addf %261, %262 : vector<16x20xf32>
    %cst_165 = arith.constant 0.000000e+00 : f32
    %264 = vector.broadcast %cst_165 : f32 to vector<16x20xf32>
    %265 = arith.maximumf %263, %264 : vector<16x20xf32>
    %266 = vector.extract_strided_slice %265 {offsets = [0, 0], sizes = [1, 20], strides = [1, 1]} : vector<16x20xf32> to vector<1x20xf32>
    %c0_166 = arith.constant 0 : index
    %c0_167 = arith.constant 0 : index
    %c0_168 = arith.constant 0 : index
    %267 = vector.load %arg6[%c0_166, %c0_167, %c0_168] : memref<16x20x50xf32, #tpu.memory_space<vmem>>, vector<1x20x50xf32>
    %268 = vector.shape_cast %267 : vector<1x20x50xf32> to vector<20x50xf32>
    %cst_169 = arith.constant dense<0.000000e+00> : vector<1x50xf32>
    %269 = tpu.matmul %266, %268, %cst_169 {dimension_numbers = #tpu.dot_dimension_numbers<[1], [0], [0], [1], [0, 0, 1, 1], [], []>} : vector<1x20xf32>, vector<20x50xf32>, vector<1x50xf32> -> vector<1x50xf32>
    %270 = arith.addf %144, %269 : vector<1x50xf32>
    %271 = vector.extract_strided_slice %265 {offsets = [1, 0], sizes = [1, 20], strides = [1, 1]} : vector<16x20xf32> to vector<1x20xf32>
    %c1_170 = arith.constant 1 : index
    %c0_171 = arith.constant 0 : index
    %c0_172 = arith.constant 0 : index
    %272 = vector.load %arg6[%c1_170, %c0_171, %c0_172] : memref<16x20x50xf32, #tpu.memory_space<vmem>>, vector<1x20x50xf32>
    %273 = vector.shape_cast %272 : vector<1x20x50xf32> to vector<20x50xf32>
    %cst_173 = arith.constant dense<0.000000e+00> : vector<1x50xf32>
    %274 = tpu.matmul %271, %273, %cst_173 {dimension_numbers = #tpu.dot_dimension_numbers<[1], [0], [0], [1], [0, 0, 1, 1], [], []>} : vector<1x20xf32>, vector<20x50xf32>, vector<1x50xf32> -> vector<1x50xf32>
    %275 = arith.addf %270, %274 : vector<1x50xf32>
    %276 = vector.extract_strided_slice %265 {offsets = [2, 0], sizes = [1, 20], strides = [1, 1]} : vector<16x20xf32> to vector<1x20xf32>
    %c2_174 = arith.constant 2 : index
    %c0_175 = arith.constant 0 : index
    %c0_176 = arith.constant 0 : index
    %277 = vector.load %arg6[%c2_174, %c0_175, %c0_176] : memref<16x20x50xf32, #tpu.memory_space<vmem>>, vector<1x20x50xf32>
    %278 = vector.shape_cast %277 : vector<1x20x50xf32> to vector<20x50xf32>
    %cst_177 = arith.constant dense<0.000000e+00> : vector<1x50xf32>
    %279 = tpu.matmul %276, %278, %cst_177 {dimension_numbers = #tpu.dot_dimension_numbers<[1], [0], [0], [1], [0, 0, 1, 1], [], []>} : vector<1x20xf32>, vector<20x50xf32>, vector<1x50xf32> -> vector<1x50xf32>
    %280 = arith.addf %275, %279 : vector<1x50xf32>
    %281 = vector.extract_strided_slice %265 {offsets = [3, 0], sizes = [1, 20], strides = [1, 1]} : vector<16x20xf32> to vector<1x20xf32>
    %c3_178 = arith.constant 3 : index
    %c0_179 = arith.constant 0 : index
    %c0_180 = arith.constant 0 : index
    %282 = vector.load %arg6[%c3_178, %c0_179, %c0_180] : memref<16x20x50xf32, #tpu.memory_space<vmem>>, vector<1x20x50xf32>
    %283 = vector.shape_cast %282 : vector<1x20x50xf32> to vector<20x50xf32>
    %cst_181 = arith.constant dense<0.000000e+00> : vector<1x50xf32>
    %284 = tpu.matmul %281, %283, %cst_181 {dimension_numbers = #tpu.dot_dimension_numbers<[1], [0], [0], [1], [0, 0, 1, 1], [], []>} : vector<1x20xf32>, vector<20x50xf32>, vector<1x50xf32> -> vector<1x50xf32>
    %285 = arith.addf %280, %284 : vector<1x50xf32>
    %286 = vector.extract_strided_slice %265 {offsets = [4, 0], sizes = [1, 20], strides = [1, 1]} : vector<16x20xf32> to vector<1x20xf32>
    %c4_182 = arith.constant 4 : index
    %c0_183 = arith.constant 0 : index
    %c0_184 = arith.constant 0 : index
    %287 = vector.load %arg6[%c4_182, %c0_183, %c0_184] : memref<16x20x50xf32, #tpu.memory_space<vmem>>, vector<1x20x50xf32>
    %288 = vector.shape_cast %287 : vector<1x20x50xf32> to vector<20x50xf32>
    %cst_185 = arith.constant dense<0.000000e+00> : vector<1x50xf32>
    %289 = tpu.matmul %286, %288, %cst_185 {dimension_numbers = #tpu.dot_dimension_numbers<[1], [0], [0], [1], [0, 0, 1, 1], [], []>} : vector<1x20xf32>, vector<20x50xf32>, vector<1x50xf32> -> vector<1x50xf32>
    %290 = arith.addf %285, %289 : vector<1x50xf32>
    %291 = vector.extract_strided_slice %265 {offsets = [5, 0], sizes = [1, 20], strides = [1, 1]} : vector<16x20xf32> to vector<1x20xf32>
    %c5_186 = arith.constant 5 : index
    %c0_187 = arith.constant 0 : index
    %c0_188 = arith.constant 0 : index
    %292 = vector.load %arg6[%c5_186, %c0_187, %c0_188] : memref<16x20x50xf32, #tpu.memory_space<vmem>>, vector<1x20x50xf32>
    %293 = vector.shape_cast %292 : vector<1x20x50xf32> to vector<20x50xf32>
    %cst_189 = arith.constant dense<0.000000e+00> : vector<1x50xf32>
    %294 = tpu.matmul %291, %293, %cst_189 {dimension_numbers = #tpu.dot_dimension_numbers<[1], [0], [0], [1], [0, 0, 1, 1], [], []>} : vector<1x20xf32>, vector<20x50xf32>, vector<1x50xf32> -> vector<1x50xf32>
    %295 = arith.addf %290, %294 : vector<1x50xf32>
    %296 = vector.extract_strided_slice %265 {offsets = [6, 0], sizes = [1, 20], strides = [1, 1]} : vector<16x20xf32> to vector<1x20xf32>
    %c6_190 = arith.constant 6 : index
    %c0_191 = arith.constant 0 : index
    %c0_192 = arith.constant 0 : index
    %297 = vector.load %arg6[%c6_190, %c0_191, %c0_192] : memref<16x20x50xf32, #tpu.memory_space<vmem>>, vector<1x20x50xf32>
    %298 = vector.shape_cast %297 : vector<1x20x50xf32> to vector<20x50xf32>
    %cst_193 = arith.constant dense<0.000000e+00> : vector<1x50xf32>
    %299 = tpu.matmul %296, %298, %cst_193 {dimension_numbers = #tpu.dot_dimension_numbers<[1], [0], [0], [1], [0, 0, 1, 1], [], []>} : vector<1x20xf32>, vector<20x50xf32>, vector<1x50xf32> -> vector<1x50xf32>
    %300 = arith.addf %295, %299 : vector<1x50xf32>
    %301 = vector.extract_strided_slice %265 {offsets = [7, 0], sizes = [1, 20], strides = [1, 1]} : vector<16x20xf32> to vector<1x20xf32>
    %c7_194 = arith.constant 7 : index
    %c0_195 = arith.constant 0 : index
    %c0_196 = arith.constant 0 : index
    %302 = vector.load %arg6[%c7_194, %c0_195, %c0_196] : memref<16x20x50xf32, #tpu.memory_space<vmem>>, vector<1x20x50xf32>
    %303 = vector.shape_cast %302 : vector<1x20x50xf32> to vector<20x50xf32>
    %cst_197 = arith.constant dense<0.000000e+00> : vector<1x50xf32>
    %304 = tpu.matmul %301, %303, %cst_197 {dimension_numbers = #tpu.dot_dimension_numbers<[1], [0], [0], [1], [0, 0, 1, 1], [], []>} : vector<1x20xf32>, vector<20x50xf32>, vector<1x50xf32> -> vector<1x50xf32>
    %305 = arith.addf %300, %304 : vector<1x50xf32>
    %306 = vector.extract_strided_slice %265 {offsets = [8, 0], sizes = [1, 20], strides = [1, 1]} : vector<16x20xf32> to vector<1x20xf32>
    %c8_198 = arith.constant 8 : index
    %c0_199 = arith.constant 0 : index
    %c0_200 = arith.constant 0 : index
    %307 = vector.load %arg6[%c8_198, %c0_199, %c0_200] : memref<16x20x50xf32, #tpu.memory_space<vmem>>, vector<1x20x50xf32>
    %308 = vector.shape_cast %307 : vector<1x20x50xf32> to vector<20x50xf32>
    %cst_201 = arith.constant dense<0.000000e+00> : vector<1x50xf32>
    %309 = tpu.matmul %306, %308, %cst_201 {dimension_numbers = #tpu.dot_dimension_numbers<[1], [0], [0], [1], [0, 0, 1, 1], [], []>} : vector<1x20xf32>, vector<20x50xf32>, vector<1x50xf32> -> vector<1x50xf32>
    %310 = arith.addf %305, %309 : vector<1x50xf32>
    %311 = vector.extract_strided_slice %265 {offsets = [9, 0], sizes = [1, 20], strides = [1, 1]} : vector<16x20xf32> to vector<1x20xf32>
    %c9_202 = arith.constant 9 : index
    %c0_203 = arith.constant 0 : index
    %c0_204 = arith.constant 0 : index
    %312 = vector.load %arg6[%c9_202, %c0_203, %c0_204] : memref<16x20x50xf32, #tpu.memory_space<vmem>>, vector<1x20x50xf32>
    %313 = vector.shape_cast %312 : vector<1x20x50xf32> to vector<20x50xf32>
    %cst_205 = arith.constant dense<0.000000e+00> : vector<1x50xf32>
    %314 = tpu.matmul %311, %313, %cst_205 {dimension_numbers = #tpu.dot_dimension_numbers<[1], [0], [0], [1], [0, 0, 1, 1], [], []>} : vector<1x20xf32>, vector<20x50xf32>, vector<1x50xf32> -> vector<1x50xf32>
    %315 = arith.addf %310, %314 : vector<1x50xf32>
    %316 = vector.extract_strided_slice %265 {offsets = [10, 0], sizes = [1, 20], strides = [1, 1]} : vector<16x20xf32> to vector<1x20xf32>
    %c10_206 = arith.constant 10 : index
    %c0_207 = arith.constant 0 : index
    %c0_208 = arith.constant 0 : index
    %317 = vector.load %arg6[%c10_206, %c0_207, %c0_208] : memref<16x20x50xf32, #tpu.memory_space<vmem>>, vector<1x20x50xf32>
    %318 = vector.shape_cast %317 : vector<1x20x50xf32> to vector<20x50xf32>
    %cst_209 = arith.constant dense<0.000000e+00> : vector<1x50xf32>
    %319 = tpu.matmul %316, %318, %cst_209 {dimension_numbers = #tpu.dot_dimension_numbers<[1], [0], [0], [1], [0, 0, 1, 1], [], []>} : vector<1x20xf32>, vector<20x50xf32>, vector<1x50xf32> -> vector<1x50xf32>
    %320 = arith.addf %315, %319 : vector<1x50xf32>
    %321 = vector.extract_strided_slice %265 {offsets = [11, 0], sizes = [1, 20], strides = [1, 1]} : vector<16x20xf32> to vector<1x20xf32>
    %c11_210 = arith.constant 11 : index
    %c0_211 = arith.constant 0 : index
    %c0_212 = arith.constant 0 : index
    %322 = vector.load %arg6[%c11_210, %c0_211, %c0_212] : memref<16x20x50xf32, #tpu.memory_space<vmem>>, vector<1x20x50xf32>
    %323 = vector.shape_cast %322 : vector<1x20x50xf32> to vector<20x50xf32>
    %cst_213 = arith.constant dense<0.000000e+00> : vector<1x50xf32>
    %324 = tpu.matmul %321, %323, %cst_213 {dimension_numbers = #tpu.dot_dimension_numbers<[1], [0], [0], [1], [0, 0, 1, 1], [], []>} : vector<1x20xf32>, vector<20x50xf32>, vector<1x50xf32> -> vector<1x50xf32>
    %325 = arith.addf %320, %324 : vector<1x50xf32>
    %326 = vector.extract_strided_slice %265 {offsets = [12, 0], sizes = [1, 20], strides = [1, 1]} : vector<16x20xf32> to vector<1x20xf32>
    %c12_214 = arith.constant 12 : index
    %c0_215 = arith.constant 0 : index
    %c0_216 = arith.constant 0 : index
    %327 = vector.load %arg6[%c12_214, %c0_215, %c0_216] : memref<16x20x50xf32, #tpu.memory_space<vmem>>, vector<1x20x50xf32>
    %328 = vector.shape_cast %327 : vector<1x20x50xf32> to vector<20x50xf32>
    %cst_217 = arith.constant dense<0.000000e+00> : vector<1x50xf32>
    %329 = tpu.matmul %326, %328, %cst_217 {dimension_numbers = #tpu.dot_dimension_numbers<[1], [0], [0], [1], [0, 0, 1, 1], [], []>} : vector<1x20xf32>, vector<20x50xf32>, vector<1x50xf32> -> vector<1x50xf32>
    %330 = arith.addf %325, %329 : vector<1x50xf32>
    %331 = vector.extract_strided_slice %265 {offsets = [13, 0], sizes = [1, 20], strides = [1, 1]} : vector<16x20xf32> to vector<1x20xf32>
    %c13_218 = arith.constant 13 : index
    %c0_219 = arith.constant 0 : index
    %c0_220 = arith.constant 0 : index
    %332 = vector.load %arg6[%c13_218, %c0_219, %c0_220] : memref<16x20x50xf32, #tpu.memory_space<vmem>>, vector<1x20x50xf32>
    %333 = vector.shape_cast %332 : vector<1x20x50xf32> to vector<20x50xf32>
    %cst_221 = arith.constant dense<0.000000e+00> : vector<1x50xf32>
    %334 = tpu.matmul %331, %333, %cst_221 {dimension_numbers = #tpu.dot_dimension_numbers<[1], [0], [0], [1], [0, 0, 1, 1], [], []>} : vector<1x20xf32>, vector<20x50xf32>, vector<1x50xf32> -> vector<1x50xf32>
    %335 = arith.addf %330, %334 : vector<1x50xf32>
    %336 = vector.extract_strided_slice %265 {offsets = [14, 0], sizes = [1, 20], strides = [1, 1]} : vector<16x20xf32> to vector<1x20xf32>
    %c14_222 = arith.constant 14 : index
    %c0_223 = arith.constant 0 : index
    %c0_224 = arith.constant 0 : index
    %337 = vector.load %arg6[%c14_222, %c0_223, %c0_224] : memref<16x20x50xf32, #tpu.memory_space<vmem>>, vector<1x20x50xf32>
    %338 = vector.shape_cast %337 : vector<1x20x50xf32> to vector<20x50xf32>
    %cst_225 = arith.constant dense<0.000000e+00> : vector<1x50xf32>
    %339 = tpu.matmul %336, %338, %cst_225 {dimension_numbers = #tpu.dot_dimension_numbers<[1], [0], [0], [1], [0, 0, 1, 1], [], []>} : vector<1x20xf32>, vector<20x50xf32>, vector<1x50xf32> -> vector<1x50xf32>
    %340 = arith.addf %335, %339 : vector<1x50xf32>
    %341 = vector.extract_strided_slice %265 {offsets = [15, 0], sizes = [1, 20], strides = [1, 1]} : vector<16x20xf32> to vector<1x20xf32>
    %c15_226 = arith.constant 15 : index
    %c0_227 = arith.constant 0 : index
    %c0_228 = arith.constant 0 : index
    %342 = vector.load %arg6[%c15_226, %c0_227, %c0_228] : memref<16x20x50xf32, #tpu.memory_space<vmem>>, vector<1x20x50xf32>
    %343 = vector.shape_cast %342 : vector<1x20x50xf32> to vector<20x50xf32>
    %cst_229 = arith.constant dense<0.000000e+00> : vector<1x50xf32>
    %344 = tpu.matmul %341, %343, %cst_229 {dimension_numbers = #tpu.dot_dimension_numbers<[1], [0], [0], [1], [0, 0, 1, 1], [], []>} : vector<1x20xf32>, vector<20x50xf32>, vector<1x50xf32> -> vector<1x50xf32>
    %345 = arith.addf %340, %344 : vector<1x50xf32>
    %cst_230 = arith.constant 0.000000e+00 : f32
    %346 = vector.broadcast %cst_230 : f32 to vector<1x50xf32>
    %347 = arith.maximumf %345, %346 : vector<1x50xf32>
    %c0_231 = arith.constant 0 : index
    %c0_232 = arith.constant 0 : index
    %348 = vector.load %arg8[%c0_231, %c0_232] : memref<50x10xf32, #tpu.memory_space<vmem>>, vector<50x10xf32>
    %cst_233 = arith.constant dense<0.000000e+00> : vector<1x10xf32>
    %349 = tpu.matmul %347, %348, %cst_233 {dimension_numbers = #tpu.dot_dimension_numbers<[1], [0], [0], [1], [0, 0, 1, 1], [], []>} : vector<1x50xf32>, vector<50x10xf32>, vector<1x10xf32> -> vector<1x10xf32>
    %c0_234 = arith.constant 0 : index
    %c0_235 = arith.constant 0 : index
    %350 = vector.load %arg9[%c0_234, %c0_235] : memref<1x10xf32, #tpu.memory_space<vmem>>, vector<1x10xf32>
    %351 = arith.addf %349, %350 : vector<1x10xf32>
    %cst_236 = arith.constant dense<0xFF800000> : vector<1xf32>
    %352 = vector.multi_reduction <maximumf>, %351, %cst_236 [1] : vector<1x10xf32> to vector<1xf32>
    %353 = vector.shape_cast %352 : vector<1xf32> to vector<1x1xf32>
    %354 = vector.broadcast %353 : vector<1x1xf32> to vector<1x10xf32>
    %355 = arith.subf %351, %354 : vector<1x10xf32>
    %356 = math.exp %355 : vector<1x10xf32>
    %cst_237 = arith.constant dense<0.000000e+00> : vector<1xf32>
    %357 = vector.multi_reduction <add>, %356, %cst_237 [1] : vector<1x10xf32> to vector<1xf32>
    %358 = vector.shape_cast %357 : vector<1xf32> to vector<1x1xf32>
    %359 = math.log %358 : vector<1x1xf32>
    %360 = vector.broadcast %353 : vector<1x1xf32> to vector<1x10xf32>
    %361 = arith.subf %351, %360 : vector<1x10xf32>
    %362 = vector.broadcast %359 : vector<1x1xf32> to vector<1x10xf32>
    %363 = arith.subf %361, %362 : vector<1x10xf32>
    %c1_238 = arith.constant 1 : index
    %c0_239 = arith.constant 0 : index
    %364 = vector.load %arg10[%c1_238, %c0_239] : memref<2x10xf32, #tpu.memory_space<vmem>>, vector<1x10xf32>
    tpu.vector_store %arg10[%c1_238, %c0_239], %363 {strides = array<i32>} : memref<2x10xf32, #tpu.memory_space<vmem>>, vector<1x10xf32>,
    return
  }
}

</mosaic_0001>

<bundles_post_ra>
// kernel: net_forward.1
= control target key start
LH: loop header
LB: loop body
LE: loop exit
PB: predicated region body
PF: predicated region fallthrough
CT: control target
= control target key end

     0   :  { %vm773_vm0 = vcmask 1043456   ;;  %vm774_vm1 = vcmask 1044480   ;;  %v15050_v2 = vmov 65535   ;;  %vm556_vm2 = vcmask 203776   ;;  %s18848_s0 = inlined_call_operand.vmem [shape: bf16[1152,25], index: 0, kind: input, shape index: {}]   ;;  %s18849_s1 = inlined_call_operand.vmem [shape: bf16[25,10], index: 1, kind: input, shape index: {}]   ;;  %s18850_s2 = inlined_call_operand.vmem [shape: f32[1,10], index: 2, kind: input, shape index: {}]   ;;  %s18851_s3 = inlined_call_operand.vmem [shape: f32[25,10,20], index: 3, kind: input, shape index: {}]   ;;  %s18852_s4 = inlined_call_operand.vmem [shape: f32[1,20], index: 4, kind: input, shape index: {}]   ;;  %s18853_s5 = inlined_call_operand.vmem [shape: f32[128,188], index: 5, kind: input, shape index: {}]   ;;  %s18854_s6 = inlined_call_operand.vmem [shape: f32[16,20,50], index: 6, kind: input, shape index: {}]   ;;  %s18855_s7 = inlined_call_operand.vmem [shape: f32[1,50], index: 7, kind: input, shape index: {}]   ;;  %s18856_s8 = inlined_call_operand.vmem [shape: f32[50,10], index: 8, kind: input, shape index: {}]   ;;  %s18857_s9 = inlined_call_operand.vmem [shape: f32[1,10], index: 9, kind: input, shape index: {}]   ;;  %s18858_s10 = inlined_call_operand.hbm [shape: f32[2,10], index: 10, kind: output, shape index: {}]  }
   0x1   :  { %v14943_v0 = vld [vmem:[%s18849_s1] sm:$0xff]   ;;  %v14944_v1 = vld [vmem:[%s18849_s1 + $0x8] sm:$0x1f]   ;;  %v775_v3 = vsel %vm773_vm0, 4294967295, %v15050_v2  ;;  %v14947_v8 = vld [vmem:[%s18848_s0 + $0x10] sm:$0xff]  }
   0x2   :  { %12527 = vmatprep.subr.bf16.mxu0 %v14943_v0  ;;  %v14945_v4 = vld [vmem:[%s18848_s0] sm:$0xff]   ;;  %v776_v5 = vsel %vm774_vm1, %v775_v3, 0  ;;  %v14946_v7 = vld [vmem:[%s18848_s0 + $0x8] sm:$0xff]   ;;  %v14948_v9 = vld [vmem:[%s18848_s0 + $0x18] sm:$0xff]  }
   0x3   :  { %12528 = vmatpush3.bf16.msra.mxu0 %v14943_v0  ;;  %v778_v6 = vand.u32 %v14944_v1, %v776_v5  ;;  %12531 = vmatprep.mubr.msk.bf16.mxu0 %vm556_vm2, %v14945_v4  ;;  %v14949_v10 = vld [vmem:[%s18848_s0 + $0x20] sm:$0xff]   ;;  %v14950_v11 = vld [vmem:[%s18848_s0 + $0x28] sm:$0xff]   ;;  %v14951_v12 = vld [vmem:[%s18848_s0 + $0x30] sm:$0xff]  }
   0x4   :  { %v14952_v13 = vld [vmem:[%s18848_s0 + $0x38] sm:$0xff]   ;;  %v14953_v14 = vld [vmem:[%s18848_s0 + $0x40] sm:$0xff]   ;;  %v14954_v15 = vld [vmem:[%s18848_s0 + $0x48] sm:$0xff]  }
   0x5   :  { %12529 = vmatprep.subr.bf16.mxu0 %v778_v6  ;;  %v14955_v16 = vld [vmem:[%s18848_s0 + $0x50] sm:$0xff]   ;;  %v14956_v17 = vld [vmem:[%s18848_s0 + $0x58] sm:$0xff]   ;;  %v14957_v18 = vld [vmem:[%s18848_s0 + $0x60] sm:$0xff]  }
   0x6   :  { %v14958_v19 = vld [vmem:[%s18848_s0 + $0x68] sm:$0xff]   ;;  %v14959_v20 = vld [vmem:[%s18848_s0 + $0x70] sm:$0xff]   ;;  %v14960_v21 = vld [vmem:[%s18848_s0 + $0x78] sm:$0xff]  }
   0x7   :  { %12530 = vmatpush3.bf16.msra.mxu0 %v778_v6  ;;  %v14961_v22 = vld [vmem:[%s18848_s0 + $0x80] sm:$0xff]  }
   0xa   :  { %12532 = vmatmul.mubr.msk.bf16.vlgmr.msra.gmra.mrb[0].mxu0 %vm556_vm2, %v14946_v7 }
   0xb   :  { %12535 = vmatprep.mubr.msk.bf16.mxu0 %vm556_vm2, %v14947_v8 }
  0x12   :  { %12536 = vmatmul.mubr.msk.bf16.gmra.mrb[4].mxu0 %vm556_vm2, %v14948_v9 }
  0x13   :  { %12539 = vmatprep.mubr.msk.bf16.mxu0 %vm556_vm2, %v14949_v10 }
  0x1a   :  { %12540 = vmatmul.mubr.msk.bf16.gmra.mrb[8].mxu0 %vm556_vm2, %v14950_v11 }
  0x1b   :  { %12543 = vmatprep.mubr.msk.bf16.mxu0 %vm556_vm2, %v14951_v12 }
  0x22   :  { %12544 = vmatmul.mubr.msk.bf16.gmra.mrb[12].mxu0 %vm556_vm2, %v14952_v13 }
  0x23   :  { %12547 = vmatprep.mubr.msk.bf16.mxu0 %vm556_vm2, %v14953_v14 }
  0x2a   :  { %12548 = vmatmul.mubr.msk.bf16.gmra.mrb[16].mxu0 %vm556_vm2, %v14954_v15 }
  0x2b   :  { %12551 = vmatprep.mubr.msk.bf16.mxu0 %vm556_vm2, %v14955_v16 }
  0x32   :  { %12552 = vmatmul.mubr.msk.bf16.gmra.mrb[20].mxu0 %vm556_vm2, %v14956_v17 }
  0x33   :  { %12555 = vmatprep.mubr.msk.bf16.mxu0 %vm556_vm2, %v14957_v18 }
  0x3a   :  { %12556 = vmatmul.mubr.msk.bf16.gmra.mrb[24].mxu0 %vm556_vm2, %v14958_v19 }
  0x3b   :  { %12559 = vmatprep.mubr.msk.bf16.mxu0 %vm556_vm2, %v14959_v20 }
  0x3c   :  { %15 = vsyncpa [#allocation3], 0  ;;  %v14962_v23 = vld [vmem:[%s18848_s0 + $0x88] sm:$0xff]   ;;  %v14963_v24 = vld [vmem:[%s18848_s0 + $0x90] sm:$0xff]   ;;  %vm1702_vm3 = vcmask 1041408   ;;  %vm15051_vm4 = vmmov 1  }
  0x3d   :  { %v14964_v25 = vld [vmem:[%s18848_s0 + $0x98] sm:$0xff]   ;;  %v14965_v26 = vld [vmem:[%s18848_s0 + $0xa0] sm:$0xff]   ;;  %v14966_v27 = vld [vmem:[%s18848_s0 + $0xa8] sm:$0xff]   ;;  %vm1605_vm6 = vcmask 1046528   ;;  %vm1653_vm7 = vcmask 80896   ;;  %vm2130_vm8 = vcmask 1045504  }
  0x3e   :  { %v14967_v28 = vld [vmem:[%s18848_s0 + $0xb0] sm:$0xff]   ;;  %v14968_v29 = vld [vmem:[%s18848_s0 + $0xb8] sm:$0xff]   ;;  %v14969_v30 = vld [vmem:[%s18848_s0 + $0xc0] sm:$0xff]   ;;  %vm7650_vm9 = vcmask 490496   ;;  %vm15054_vm11 = vmmov 0   ;;  %vm7868_vm12 = vcmask 162816  }
  0x3f   :  { %v14970_v31 = vld [vmem:[%s18848_s0 + $0xc8] sm:$0xff]   ;;  %v14971_v32 = vld [vmem:[%s18848_s0 + $0xd0] sm:$0xff]   ;;  %v14972_v33 = vld [vmem:[%s18848_s0 + $0xd8] sm:$0xff]   ;;  %vm9170_vm13 = vcmask 408576   ;;  %vm9247_vm14 = vcmask 73728  }
  0x40   :  { %v14973_v34 = vld [vmem:[%s18848_s0 + $0xe0] sm:$0xff]   ;;  %v14974_v35 = vld [vmem:[%s18848_s0 + $0xe8] sm:$0xff]   ;;  %v14975_v36 = vld [vmem:[%s18848_s0 + $0xf0] sm:$0xff]  }
  0x41   :  { %v14976_v37 = vld [vmem:[%s18848_s0 + $0xf8] sm:$0xff]   ;;  %v14977_v38 = vld [vmem:[%s18848_s0 + $0x100] sm:$0xff]   ;;  %v14978_v39 = vld [vmem:[%s18848_s0 + $0x108] sm:$0xff]  }
  0x42   :  { %12560 = vmatmul.mubr.msk.bf16.gmra.mrb[28].mxu0 %vm556_vm2, %v14960_v21  ;;  %v14979_v40 = vld [vmem:[%s18848_s0 + $0x110] sm:$0xff]   ;;  %v14980_v41 = vld [vmem:[%s18848_s0 + $0x118] sm:$0xff]   ;;  %v14981_v42 = vld [vmem:[%s18848_s0 + $0x120] sm:$0xff]  }
  0x43   :  { %12563 = vmatprep.mubr.msk.bf16.mxu0 %vm556_vm2, %v14961_v22  ;;  %v14982_v43 = vld [vmem:[%s18848_s0 + $0x128] sm:$0xff]   ;;  %v14983_v44 = vld [vmem:[%s18848_s0 + $0x130] sm:$0xff]   ;;  %v14984_v45 = vld [vmem:[%s18848_s0 + $0x138] sm:$0xff]  }
  0x44   :  { %v14985_v46 = vld [vmem:[%s18848_s0 + $0x140] sm:$0xff]   ;;  %v14986_v47 = vld [vmem:[%s18848_s0 + $0x148] sm:$0xff]   ;;  %v14987_v48 = vld [vmem:[%s18848_s0 + $0x150] sm:$0xff]  }
  0x45   :  { %v14988_v49 = vld [vmem:[%s18848_s0 + $0x158] sm:$0xff]   ;;  %v14989_v50 = vld [vmem:[%s18848_s0 + $0x160] sm:$0xff]   ;;  %v14990_v51 = vld [vmem:[%s18848_s0 + $0x168] sm:$0xff]  }
  0x46   :  { %v14991_v52 = vld [vmem:[%s18848_s0 + $0x170] sm:$0xff]   ;;  %v14992_v53 = vld [vmem:[%s18848_s0 + $0x178] sm:$0xff]   ;;  %v14993_v54 = vld [vmem:[%s18848_s0 + $0x180] sm:$0xff]  }
  0x47   :  { %v14994_v55 = vld [vmem:[%s18848_s0 + $0x188] sm:$0xff]   ;;  %v14995_v56 = vld [vmem:[%s18848_s0 + $0x190] sm:$0xff]   ;;  %v14996_v57 = vld [vmem:[%s18848_s0 + $0x198] sm:$0xff]  }
  0x48   :  { %v14997_v58 = vld [vmem:[%s18848_s0 + $0x1a0] sm:$0xff]   ;;  %v14998_v59 = vld [vmem:[%s18848_s0 + $0x1a8] sm:$0xff]   ;;  %v14999_v60 = vld [vmem:[%s18848_s0 + $0x1b0] sm:$0xff]  }
  0x49   :  { %v15000_v63 = vld [vmem:[%s18848_s0 + $0x1b8] sm:$0xff]   ;;  %v15001_v1 = vld [vmem:[%s18848_s0 + $0x1c0] sm:$0xff]   ;;  %v15002_v5 = vld [vmem:[%s18848_s0 + $0x1c8] sm:$0xff]  }
  0x4a   :  { %12564 = vmatmul.mubr.msk.bf16.gmra.mrb[32].mxu0 %vm556_vm2, %v14962_v23  ;;  %v15003_v7 = vld [vmem:[%s18848_s0 + $0x1d0] sm:$0xff]   ;;  %v15004_v11 = vld [vmem:[%s18848_s0 + $0x1d8] sm:$0xff]   ;;  %v15005_v13 = vld [vmem:[%s18848_s0 + $0x1e0] sm:$0xff]  }
  0x4b   :  { %12567 = vmatprep.mubr.msk.bf16.mxu0 %vm556_vm2, %v14963_v24  ;;  %v15006_v17 = vld [vmem:[%s18848_s0 + $0x1e8] sm:$0xff]   ;;  %v15007_v19 = vld [vmem:[%s18848_s0 + $0x1f0] sm:$0xff]   ;;  %v15008_v23 = vld [vmem:[%s18848_s0 + $0x1f8] sm:$0xff]  }
  0x4c   :  { %vm15549_vm5 = vmpackc.low %vm1702_vm3, %vm15051_vm4 }
  0x4d   :  { %vm14182_vm10 = vmpackc.low %vm773_vm0, %vm15051_vm4 }
  0x52   :  { %12568 = vmatmul.mubr.msk.bf16.gmra.mrb[36].mxu0 %vm556_vm2, %v14964_v25  ;;  %v15009_v25 = vld [vmem:[%s18848_s0 + $0x200] sm:$0xff]  }
  0x53   :  { %12571 = vmatprep.mubr.msk.bf16.mxu0 %vm556_vm2, %v14965_v26 }
  0x5a   :  { %12572 = vmatmul.mubr.msk.bf16.gmra.mrb[40].mxu0 %vm556_vm2, %v14966_v27 }
  0x5b   :  { %12575 = vmatprep.mubr.msk.bf16.mxu0 %vm556_vm2, %v14967_v28 }
  0x62   :  { %12576 = vmatmul.mubr.msk.bf16.gmra.mrb[44].mxu0 %vm556_vm2, %v14968_v29  ;;  %v15010_v29 = vld [vmem:[%s18848_s0 + $0x208] sm:$0xff]  }
  0x63   :  { %12579 = vmatprep.mubr.msk.bf16.mxu0 %vm556_vm2, %v14969_v30 }
  0x6a   :  { %12580 = vmatmul.mubr.msk.bf16.gmra.mrb[48].mxu0 %vm556_vm2, %v14970_v31  ;;  %v15011_v31 = vld [vmem:[%s18848_s0 + $0x210] sm:$0xff]  }
  0x6b   :  { %12583 = vmatprep.mubr.msk.bf16.mxu0 %vm556_vm2, %v14971_v32 }
  0x72   :  { %12584 = vmatmul.mubr.msk.bf16.gmra.mrb[52].mxu0 %vm556_vm2, %v14972_v33 }
  0x73   :  { %12587 = vmatprep.mubr.msk.bf16.mxu0 %vm556_vm2, %v14973_v34 }
  0x7a   :  { %12588 = vmatmul.mubr.msk.bf16.gmra.mrb[56].mxu0 %vm556_vm2, %v14974_v35  ;;  %v15012_v35 = vld [vmem:[%s18848_s0 + $0x218] sm:$0xff]  }
  0x7b   :  { %12591 = vmatprep.mubr.msk.bf16.mxu0 %vm556_vm2, %v14975_v36 }
  0x82   :  { %12592 = vmatmul.mubr.msk.bf16.gmra.mrb[60].mxu0 %vm556_vm2, %v14976_v37  ;;  %v15013_v37 = vld [vmem:[%s18848_s0 + $0x220] sm:$0xff]  }
  0x83   :  { %12595 = vmatprep.mubr.msk.bf16.mxu0 %vm556_vm2, %v14977_v38 }
  0x8a   :  { %12596 = vmatmul.mubr.msk.bf16.gmra.mrb[64].mxu0 %vm556_vm2, %v14978_v39 }
  0x8b   :  { %12599 = vmatprep.mubr.msk.bf16.mxu0 %vm556_vm2, %v14979_v40 }
  0x92   :  { %12600 = vmatmul.mubr.msk.bf16.gmra.mrb[68].mxu0 %vm556_vm2, %v14980_v41  ;;  %v15014_v41 = vld [vmem:[%s18848_s0 + $0x228] sm:$0xff]  }
  0x93   :  { %12603 = vmatprep.mubr.msk.bf16.mxu0 %vm556_vm2, %v14981_v42 }
  0x9a   :  { %12604 = vmatmul.mubr.msk.bf16.gmra.mrb[72].mxu0 %vm556_vm2, %v14982_v43  ;;  %v15015_v43 = vld [vmem:[%s18848_s0 + $0x230] sm:$0xff]  }
  0x9b   :  { %12607 = vmatprep.mubr.msk.bf16.mxu0 %vm556_vm2, %v14983_v44 }
  0xa2   :  { %12608 = vmatmul.mubr.msk.bf16.gmra.mrb[76].mxu0 %vm556_vm2, %v14984_v45 }
  0xa3   :  { %12611 = vmatprep.mubr.msk.bf16.mxu0 %vm556_vm2, %v14985_v46 }
  0xaa   :  { %12612 = vmatmul.mubr.msk.bf16.gmra.mrb[80].mxu0 %vm556_vm2, %v14986_v47  ;;  %v15016_v47 = vld [vmem:[%s18848_s0 + $0x238] sm:$0xff]  }
  0xab   :  { %12615 = vmatprep.mubr.msk.bf16.mxu0 %vm556_vm2, %v14987_v48 }
  0xb2   :  { %12616 = vmatmul.mubr.msk.bf16.gmra.mrb[84].mxu0 %vm556_vm2, %v14988_v49 }
  0xb3   :  { %12619 = vmatprep.mubr.msk.bf16.mxu0 %vm556_vm2, %v14989_v50 }
  0xba   :  { %12620 = vmatmul.mubr.msk.bf16.gmra.mrb[88].mxu0 %vm556_vm2, %v14990_v51 }
  0xbb   :  { %12623 = vmatprep.mubr.msk.bf16.mxu0 %vm556_vm2, %v14991_v52 }
  0xc2   :  { %12624 = vmatmul.mubr.msk.bf16.gmra.mrb[92].mxu0 %vm556_vm2, %v14992_v53 }
  0xc3   :  { %12627 = vmatprep.mubr.msk.bf16.mxu0 %vm556_vm2, %v14993_v54 }
  0xca   :  { %12628 = vmatmul.mubr.msk.bf16.gmra.mrb[96].mxu0 %vm556_vm2, %v14994_v55 }
  0xcb   :  { %12631 = vmatprep.mubr.msk.bf16.mxu0 %vm556_vm2, %v14995_v56 }
  0xd2   :  { %12632 = vmatmul.mubr.msk.bf16.gmra.mrb[100].mxu0 %vm556_vm2, %v14996_v57 }
  0xd3   :  { %12635 = vmatprep.mubr.msk.bf16.mxu0 %vm556_vm2, %v14997_v58 }
  0xda   :  { %12636 = vmatmul.mubr.msk.bf16.gmra.mrb[104].mxu0 %vm556_vm2, %v14998_v59 }
  0xdb   :  { %12639 = vmatprep.mubr.msk.bf16.mxu0 %vm556_vm2, %v14999_v60 }
  0xdd   :  { %v15339_v61 = vpop.f32.mrb[0].mxu0 }
  0xde   :  { %v15341_v62 = vpop.f32.mrb[1].mxu0 }
  0xdf   :  { %v15346_v0 = vpop.f32.mrb[2].mxu0 }
  0xe0   :  { %v15351_v2 = vpop.f32.mrb[3].mxu0 }
  0xe2   :  { %12640 = vmatmul.mubr.msk.bf16.gmra.mrb[108].mxu0 %vm556_vm2, %v15000_v63 }
  0xe3   :  { %12643 = vmatprep.mubr.msk.bf16.mxu0 %vm556_vm2, %v15001_v1 }
  0xe5   :  { %v15355_v3 = vpop.f32.mrb[4].mxu0 }
  0xe6   :  { %v15357_v4 = vpop.f32.mrb[5].mxu0 }
  0xe7   :  { %v15362_v6 = vpop.f32.mrb[6].mxu0 }
  0xe8   :  { %v15367_v8 = vpop.f32.mrb[7].mxu0 }
  0xea   :  { %12644 = vmatmul.mubr.msk.bf16.gmra.mrb[112].mxu0 %vm556_vm2, %v15002_v5 }
  0xeb   :  { %12647 = vmatprep.mubr.msk.bf16.mxu0 %vm556_vm2, %v15003_v7 }
  0xed   :  { %v15371_v9 = vpop.f32.mrb[8].mxu0 }
  0xee   :  { %v15373_v10 = vpop.f32.mrb[9].mxu0 }
  0xef   :  { %v15378_v12 = vpop.f32.mrb[10].mxu0 }
  0xf0   :  { %v15383_v14 = vpop.f32.mrb[11].mxu0 }
  0xf2   :  { %12648 = vmatmul.mubr.msk.bf16.gmra.mrb[116].mxu0 %vm556_vm2, %v15004_v11 }
  0xf3   :  { %12651 = vmatprep.mubr.msk.bf16.mxu0 %vm556_vm2, %v15005_v13 }
  0xf5   :  { %v15387_v15 = vpop.f32.mrb[12].mxu0 }
  0xf6   :  { %v15389_v16 = vpop.f32.mrb[13].mxu0 }
  0xf7   :  { %v15394_v18 = vpop.f32.mrb[14].mxu0 }
  0xf8   :  { %v15399_v20 = vpop.f32.mrb[15].mxu0 }
  0xfa   :  { %12652 = vmatmul.mubr.msk.bf16.gmra.mrb[120].mxu0 %vm556_vm2, %v15006_v17 }
  0xfb   :  { %12655 = vmatprep.mubr.msk.bf16.mxu0 %vm556_vm2, %v15007_v19 }
  0xfd   :  { %v15403_v21 = vpop.f32.mrb[16].mxu0 }
  0xfe   :  { %19063 = vst [vmem:[#allocation5_spill] sm:$0xff] %v15403_v21  ;;  %v15405_v22 = vpop.f32.mrb[17].mxu0 }
  0xff   :  { %19064 = vst [vmem:[#allocation6_spill] sm:$0xff] %v15405_v22  ;;  %v15410_v24 = vpop.f32.mrb[18].mxu0 }
 0x100   :  { %19065 = vst [vmem:[#allocation7_spill] sm:$0xff] %v15410_v24  ;;  %v15415_v26 = vpop.f32.mrb[19].mxu0 }
 0x101   :  { %19066 = vst [vmem:[#allocation8_spill] sm:$0xff] %v15415_v26 }
 0x102   :  { %12656 = vmatmul.mubr.msk.bf16.gmra.mrb[124].mxu0 %vm556_vm2, %v15008_v23 }
 0x103   :  { %12659 = vmatprep.mubr.msk.bf16.mxu0 %vm556_vm2, %v15009_v25 }
 0x105   :  { %v15419_v27 = vpop.f32.mrb[20].mxu0 }
 0x106   :  { %19067 = vst [vmem:[#allocation9_spill] sm:$0xff] %v15419_v27  ;;  %v15421_v28 = vpop.f32.mrb[21].mxu0 }
 0x107   :  { %19068 = vst [vmem:[#allocation10_spill] sm:$0xff] %v15421_v28  ;;  %v15426_v30 = vpop.f32.mrb[22].mxu0 }
 0x108   :  { %19069 = vst [vmem:[#allocation11_spill] sm:$0xff] %v15426_v30  ;;  %v15431_v32 = vpop.f32.mrb[23].mxu0 }
 0x109   :  { %19070 = vst [vmem:[#allocation12_spill] sm:$0xff] %v15431_v32 }
 0x10a   :  { %12660 = vmatmul.mubr.msk.bf16.gmra.mrb[128].mxu0 %vm556_vm2, %v15010_v29  ;;  %v10811_v29 = vld [vmem:[%s18851_s3 + $0x18] sm:$0x3] }
 0x10b   :  { %12663 = vmatprep.mubr.msk.bf16.mxu0 %vm556_vm2, %v15011_v31 }
 0x10d   :  { %v15435_v33 = vpop.f32.mrb[24].mxu0 }
 0x10e   :  { %19071 = vst [vmem:[#allocation13_spill] sm:$0xff] %v15435_v33  ;;  %v15437_v34 = vpop.f32.mrb[25].mxu0 }
 0x10f   :  { %19072 = vst [vmem:[#allocation14_spill] sm:$0xff] %v15437_v34  ;;  %v15442_v36 = vpop.f32.mrb[26].mxu0 }
 0x110   :  { %19073 = vst [vmem:[#allocation15_spill] sm:$0xff] %v15442_v36  ;;  %v15447_v38 = vpop.f32.mrb[27].mxu0 }
 0x111   :  { %19074 = vst [vmem:[#allocation16_spill] sm:$0xff] %v15447_v38  ;;  %v10998_v38 = vld [vmem:[%s18851_s3 + $0x78] sm:$0x3] }
 0x112   :  { %12664 = vmatmul.mubr.msk.bf16.gmra.mrb[132].mxu0 %vm556_vm2, %v15012_v35 }
 0x113   :  { %12667 = vmatprep.mubr.msk.bf16.mxu0 %vm556_vm2, %v15013_v37 }
 0x115   :  { %v15451_v39 = vpop.f32.mrb[28].mxu0 }
 0x116   :  { %19075 = vst [vmem:[#allocation17_spill] sm:$0xff] %v15451_v39  ;;  %v15453_v40 = vpop.f32.mrb[29].mxu0 }
 0x117   :  { %19076 = vst [vmem:[#allocation18_spill] sm:$0xff] %v15453_v40  ;;  %v15458_v42 = vpop.f32.mrb[30].mxu0 }
 0x118   :  { %19077 = vst [vmem:[#allocation19_spill] sm:$0xff] %v15458_v42  ;;  %v15463_v44 = vpop.f32.mrb[31].mxu0 }
 0x119   :  { %19078 = vst [vmem:[#allocation20_spill] sm:$0xff] %v15463_v44 }
 0x11a   :  { %12668 = vmatmul.mubr.msk.bf16.gmra.mrb[136].mxu0 %vm556_vm2, %v15014_v41 }
 0x11b   :  { %12671 = vmatprep.mubr.msk.bf16.mxu0 %vm556_vm2, %v15015_v43 }
 0x11d   :  { %v15467_v45 = vpop.f32.mrb[32].mxu0 }
 0x11e   :  { %19079 = vst [vmem:[#allocation21_spill] sm:$0xff] %v15467_v45  ;;  %v15469_v46 = vpop.f32.mrb[33].mxu0 }
 0x11f   :  { %19080 = vst [vmem:[#allocation22_spill] sm:$0xff] %v15469_v46  ;;  %v15474_v48 = vpop.f32.mrb[34].mxu0 }
 0x120   :  { %19081 = vst [vmem:[#allocation23_spill] sm:$0xff] %v15474_v48  ;;  %v15476_v49 = vpop.f32.mrb[35].mxu0 }
 0x121   :  { %19082 = vst [vmem:[#allocation24_spill] sm:$0xff] %v15476_v49 }
 0x122   :  { %12672 = vmatmul.mubr.msk.bf16.gmra.mrb[140].mxu0 %vm556_vm2, %v15016_v47  ;;  %v10810_v47 = vld [vmem:[%s18851_s3 + $0x10] sm:$0xff] }
 0x123   :  { %v13997_v35 = vpack.c.bf16 %v10811_v29, %v10810_v47  ;;  %v1577_v47 = vld [vmem:[%s18851_s3 + $0x8] sm:$0x3] }
 0x125   :  { %v15479_v50 = vpop.f32.mrb[36].mxu0  ;;  %13999 = vmatprep.subr.msk.bf16.mxu0 %vm15549_vm5, %v13997_v35  ;;  %14298 = vmatprep.subr.msk.bf16.mxu1 %vm15549_vm5, %v13997_v35 }
 0x126   :  { %v15483_v52 = vpop.f32.mrb[37].mxu0  ;;  %14002 = vmatpush3.bf16.msk.msra.mxu0 %vm15549_vm5, %v13997_v35  ;;  %14299 = vmatpush3.bf16.msk.msra.mxu1 %vm15549_vm5, %v13997_v35 }
 0x127   :  { %v15487_v54 = vpop.f32.mrb[38].mxu0 }
 0x128   :  { %v15491_v56 = vpop.f32.mrb[39].mxu0 }
 0x12d   :  { %v15495_v58 = vpop.f32.mrb[40].mxu0 }
 0x12e   :  { %v15499_v60 = vpop.f32.mrb[41].mxu0 }
 0x12f   :  { %v15503_v1 = vpop.f32.mrb[42].mxu0 }
 0x130   :  { %v15507_v7 = vpop.f32.mrb[43].mxu0 }
 0x135   :  { %v15511_v13 = vpop.f32.mrb[44].mxu0 }
 0x136   :  { %v15515_v19 = vpop.f32.mrb[45].mxu0 }
 0x137   :  { %v15519_v25 = vpop.f32.mrb[46].mxu0 }
 0x138   :  { %v15523_v31 = vpop.f32.mrb[47].mxu0 }
 0x13d   :  { %v15527_v37 = vpop.f32.mrb[48].mxu0 }
 0x13e   :  { %v15531_v43 = vpop.f32.mrb[49].mxu0 }
 0x13f   :  { %v15541_v17 = vpop.f32.mrb[50].mxu0 }
 0x140   :  { %v15545_v11 = vpop.f32.mrb[51].mxu0 }
 0x145   :  { %v15563_v29 = vpop.f32.mrb[52].mxu0 }
 0x146   :  { %19085 = vst [vmem:[#allocation25_spill] sm:$0xff] %v15563_v29  ;;  %v15567_v41 = vpop.f32.mrb[53].mxu0 }
 0x147   :  { %19086 = vst [vmem:[#allocation26_spill] sm:$0xff] %v15567_v41  ;;  %v15571_v23 = vpop.f32.mrb[54].mxu0 }
 0x148   :  { %19087 = vst [vmem:[#allocation27_spill] sm:$0xff] %v15571_v23  ;;  %v15575_v57 = vpop.f32.mrb[55].mxu0 }
 0x149   :  { %19088 = vst [vmem:[#allocation28_spill] sm:$0xff] %v15575_v57 }
 0x14d   :  { %v15579_v55 = vpop.f32.mrb[56].mxu0 }
 0x14e   :  { %19089 = vst [vmem:[#allocation29_spill] sm:$0xff] %v15579_v55  ;;  %v15583_v53 = vpop.f32.mrb[57].mxu0 }
 0x14f   :  { %19090 = vst [vmem:[#allocation30_spill] sm:$0xff] %v15583_v53  ;;  %v15587_v51 = vpop.f32.mrb[58].mxu0 }
 0x150   :  { %19091 = vst [vmem:[#allocation31_spill] sm:$0xff] %v15587_v51  ;;  %v15591_v23 = vpop.f32.mrb[59].mxu0 }
 0x151   :  { %19092 = vst [vmem:[#allocation32_spill] sm:$0xff] %v15591_v23  ;;  %v1576_v23 = vld [vmem:[%s18851_s3] sm:$0xff] }
 0x155   :  { %v15595_v57 = vpop.f32.mrb[60].mxu0 }
 0x156   :  { %19093 = vst [vmem:[#allocation33_spill] sm:$0xff] %v15595_v57  ;;  %v15599_v55 = vpop.f32.mrb[61].mxu0  ;;  %v15617_v57 = vpack.c.bf16 %v1577_v47, %v1576_v23  ;;  %v10997_v23 = vld [vmem:[%s18851_s3 + $0x70] sm:$0xff] }
 0x157   :  { %19094 = vst [vmem:[#allocation34_spill] sm:$0xff] %v15599_v55  ;;  %v15603_v53 = vpop.f32.mrb[62].mxu0 }
 0x158   :  { %19095 = vst [vmem:[#allocation35_spill] sm:$0xff] %v15603_v53  ;;  %v15607_v51 = vpop.f32.mrb[63].mxu0  ;;  %14005 = vmatprep.subr.msk.bf16.mxu0 %vm15549_vm5, %v15617_v57 }
 0x159   :  { %19096 = vst [vmem:[#allocation36_spill] sm:$0xff] %v15607_v51 }
 0x15d   :  { %v15619_v63 = vpop.f32.mrb[64].mxu0 }
 0x15e   :  { %19097 = vst [vmem:[#allocation37_spill] sm:$0xff] %v15619_v63  ;;  %v15623_v53 = vpop.f32.mrb[65].mxu0  ;;  %v15658_v63 = vpack.c.bf16 %v10998_v38, %v10997_v23 }
 0x15f   :  { %19098 = vst [vmem:[#allocation38_spill] sm:$0xff] %v15623_v53  ;;  %v15630_v51 = vpop.f32.mrb[66].mxu0 }
 0x160   :  { %19099 = vst [vmem:[#allocation39_spill] sm:$0xff] %v15630_v51  ;;  %v15634_v47 = vpop.f32.mrb[67].mxu0  ;;  %19105 = vst [vmem:[#allocation45_spill] sm:$0xff] %v15658_v63  ;;  %14041 = vmatprep.subr.msk.bf16.mxu1 %vm15549_vm5, %v15658_v63 }
 0x161   :  { %19100 = vst [vmem:[#allocation40_spill] sm:$0xff] %v15634_v47 }
 0x165   :  { %v15638_v59 = vpop.f32.mrb[68].mxu0 }
 0x166   :  { %19101 = vst [vmem:[#allocation41_spill] sm:$0xff] %v15638_v59  ;;  %v15642_v39 = vpop.f32.mrb[69].mxu0 }
 0x167   :  { %19102 = vst [vmem:[#allocation42_spill] sm:$0xff] %v15642_v39  ;;  %v15646_v53 = vpop.f32.mrb[70].mxu0 }
 0x168   :  { %19103 = vst [vmem:[#allocation43_spill] sm:$0xff] %v15646_v53  ;;  %v15656_v44 = vpop.f32.mrb[71].mxu0 }
 0x169   :  { %19104 = vst [vmem:[#allocation44_spill] sm:$0xff] %v15656_v44 }
 0x16d   :  { %v12605_v39 = vpop.f32.mrb[72].mxu0 }
 0x16e   :  { %v1102_v46 = vpop.f32.mrb[73].mxu0 }
 0x16f   :  { %v12606_v59 = vpop.f32.mrb[74].mxu0 }
 0x170   :  { %v1105_v45 = vpop.f32.mrb[75].mxu0 }
 0x175   :  { %v15665_v51 = vpop.f32.mrb[76].mxu0 }
 0x176   :  { %v15667_v42 = vpop.f32.mrb[77].mxu0 }
 0x177   :  { %v15669_v47 = vpop.f32.mrb[78].mxu0 }
 0x178   :  { %v15671_v53 = vpop.f32.mrb[79].mxu0 }
 0x17d   :  { %v15673_v38 = vpop.f32.mrb[80].mxu0 }
 0x17e   :  { %v15675_v23 = vpop.f32.mrb[81].mxu0 }
 0x17f   :  { %v15677_v35 = vpop.f32.mrb[82].mxu0 }
 0x180   :  { %v15679_v44 = vpop.f32.mrb[83].mxu0 }
 0x185   :  { %v15681_v49 = vpop.f32.mrb[84].mxu0 }
 0x186   :  { %v15683_v48 = vpop.f32.mrb[85].mxu0 }
 0x187   :  { %v15685_v40 = vpop.f32.mrb[86].mxu0 }
 0x188   :  { %v15687_v36 = vpop.f32.mrb[87].mxu0 }
 0x18d   :  { %v15689_v55 = vpop.f32.mrb[88].mxu0 }
 0x18e   :  { %19106 = vst [vmem:[#allocation46_spill] sm:$0xff] %v15689_v55  ;;  %v15691_v34 = vpop.f32.mrb[89].mxu0 }
 0x18f   :  { %19107 = vst [vmem:[#allocation47_spill] sm:$0xff] %v15691_v34  ;;  %v15693_v33 = vpop.f32.mrb[90].mxu0 }
 0x190   :  { %19108 = vst [vmem:[#allocation48_spill] sm:$0xff] %v15693_v33  ;;  %v15695_v63 = vpop.f32.mrb[91].mxu0 }
 0x191   :  { %19109 = vst [vmem:[#allocation49_spill] sm:$0xff] %v15695_v63 }
 0x195   :  { %v15697_v32 = vpop.f32.mrb[92].mxu0 }
 0x196   :  { %19110 = vst [vmem:[#allocation50_spill] sm:$0xff] %v15697_v32  ;;  %v15699_v30 = vpop.f32.mrb[93].mxu0 }
 0x197   :  { %19111 = vst [vmem:[#allocation51_spill] sm:$0xff] %v15699_v30  ;;  %v15701_v28 = vpop.f32.mrb[94].mxu0 }
 0x198   :  { %19112 = vst [vmem:[#allocation52_spill] sm:$0xff] %v15701_v28  ;;  %v15703_v27 = vpop.f32.mrb[95].mxu0 }
 0x199   :  { %19113 = vst [vmem:[#allocation53_spill] sm:$0xff] %v15703_v27 }
 0x19d   :  { %v15705_v26 = vpop.f32.mrb[96].mxu0 }
 0x19e   :  { %19114 = vst [vmem:[#allocation54_spill] sm:$0xff] %v15705_v26  ;;  %v15707_v24 = vpop.f32.mrb[97].mxu0 }
 0x19f   :  { %19115 = vst [vmem:[#allocation55_spill] sm:$0xff] %v15707_v24  ;;  %v15709_v41 = vpop.f32.mrb[98].mxu0 }
 0x1a0   :  { %19116 = vst [vmem:[#allocation56_spill] sm:$0xff] %v15709_v41  ;;  %v15711_v22 = vpop.f32.mrb[99].mxu0 }
 0x1a1   :  { %19117 = vst [vmem:[#allocation57_spill] sm:$0xff] %v15711_v22 }
 0x1a5   :  { %v15713_v29 = vpop.f32.mrb[100].mxu0 }
 0x1a6   :  { %19118 = vst [vmem:[#allocation58_spill] sm:$0xff] %v15713_v29  ;;  %v15715_v33 = vpop.f32.mrb[101].mxu0  ;;  %v15732_v29 = vld [vmem:[%s18850_s2] ss:$0 sm:$0xff] }
 0x1a7   :  { %19119 = vst [vmem:[#allocation59_spill] sm:$0xff] %v15715_v33  ;;  %v15717_v63 = vpop.f32.mrb[102].mxu0 }
 0x1a8   :  { %19120 = vst [vmem:[#allocation60_spill] sm:$0xff] %v15717_v63  ;;  %v15719_v32 = vpop.f32.mrb[103].mxu0 }
 0x1a9   :  { %19121 = vst [vmem:[#allocation61_spill] sm:$0xff] %v15719_v32  ;;  %v19126_v32 = vmax.f32 %v15339_v61, %v15479_v50 }
 0x1ad   :  { %v15721_v30 = vpop.f32.mrb[104].mxu0 }
 0x1ae   :  { %19122 = vst [vmem:[#allocation62_spill] sm:$0xff] %v15721_v30  ;;  %v15723_v28 = vpop.f32.mrb[105].mxu0 }
 0x1af   :  { %19123 = vst [vmem:[#allocation63_spill] sm:$0xff] %v15723_v28  ;;  %v15725_v27 = vpop.f32.mrb[106].mxu0 }
 0x1b0   :  { %19124 = vst [vmem:[#allocation64_spill] sm:$0xff] %v15725_v27  ;;  %v15727_v26 = vpop.f32.mrb[107].mxu0  ;;  %v19127_v27 = vmax.f32 %v15341_v62, %v15483_v52 }
 0x1b1   :  { %19125 = vst [vmem:[#allocation65_spill] sm:$0xff] %v15727_v26 }
 0x1b5   :  { %v12641_v24 = vpop.f32.mrb[108].mxu0 }
 0x1b6   :  { %v1427_v41 = vmax.f32 %v12605_v39, %v12641_v24  ;;  %v1246_v21 = vpop.f32.mrb[109].mxu0  ;;  %v19128_v39 = vmax.f32 %v15346_v0, %v15487_v54 }
 0x1b7   :  { %v1425_v33 = vmax.f32 %v1102_v46, %v1246_v21  ;;  %v12642_v63 = vpop.f32.mrb[110].mxu0  ;;  %v19129_v46 = vmax.f32 %v15351_v2, %v15491_v56  ;;  %v19131_v56 = vmax.f32 %v15357_v4, %v15499_v60  ;;  %v19133_v4 = vmax.f32 %v15367_v8, %v15507_v7 }
 0x1b8   :  { %v1463_v30 = vmax.f32 %v19126_v32, %v1427_v41  ;;  %v1428_v22 = vmax.f32 %v12606_v59, %v12642_v63  ;;  %v1249_v28 = vpop.f32.mrb[111].mxu0 }
 0x1b9   :  { %v1461_v26 = vmax.f32 %v19127_v27, %v1425_v33  ;;  %v1426_v34 = vmax.f32 %v1105_v45, %v1249_v28  ;;  %v10862_v33 = vld [vmem:[%s18851_s3 + $0x20] sm:$0xff]  ;;  %v19130_v45 = vmax.f32 %v15355_v3, %v15495_v58  ;;  %v19132_v58 = vmax.f32 %v15362_v6, %v15503_v1 }
 0x1ba   :  { %v1506_v24 = vadd.f32 %v15732_v29, %v1463_v30  ;;  %v1464_v55 = vmax.f32 %v19128_v39, %v1428_v22 }
 0x1bb   :  { %v1504_v21 = vadd.f32 %v15732_v29, %v1461_v26  ;;  %v1462_v61 = vmax.f32 %v19129_v46, %v1426_v34  ;;  %v10863_v34 = vld [vmem:[%s18851_s3 + $0x28] sm:$0x3] }
 0x1bc   :  { %v15748_v32 = vmax.f32 %v1506_v24, 0.0  ;;  %v1507_v50 = vadd.f32 %v15732_v29, %v1464_v55 }
 0x1bd   :  { %v15751_v59 = vmax.f32 %v1504_v21, 0.0  ;;  %v1505_v62 = vadd.f32 %v15732_v29, %v1462_v61  ;;  %v12645_v27 = vpop.f32.mrb[112].mxu0  ;;  %v15782_v21 = vpack.c.bf16 %v10863_v34, %v10862_v33 }
 0x1be   :  { %v15754_v28 = vmax.f32 %v1507_v50, 0.0  ;;  %v1431_v0 = vmax.f32 %v15665_v51, %v12645_v27  ;;  %v1262_v22 = vpop.f32.mrb[113].mxu0 }
 0x1bf   :  { %v15757_v26 = vmax.f32 %v1505_v62, 0.0  ;;  %v1429_v2 = vmax.f32 %v15667_v42, %v1262_v22  ;;  %v12646_v30 = vpop.f32.mrb[114].mxu0  ;;  %v1606_v55 = vrot.slane %v15751_v59, 1  ;;  %v1609_v42 = vrot.slane %v15748_v32, 1 }
 0x1c0   :  { %v1467_v51 = vmax.f32 %v19130_v45, %v1431_v0  ;;  %v1432_v52 = vmax.f32 %v15669_v47, %v12646_v30  ;;  %v1265_v54 = vpop.f32.mrb[115].mxu0  ;;  %v1611_v39 = vrot.slane %v15754_v28, 1 }
 0x1c1   :  { %v1465_v63 = vmax.f32 %v19131_v56, %v1429_v2  ;;  %v1430_v41 = vmax.f32 %v15671_v53, %v1265_v54  ;;  %v1607_v24 = vrot.slane %v15757_v26, 1  ;;  %v19137_v56 = vmax.f32 %v15378_v12, %v15519_v25 }
 0x1c2   :  { %v1510_v3 = vadd.f32 %v15732_v29, %v1467_v51  ;;  %v1468_v47 = vmax.f32 %v19132_v58, %v1432_v52  ;;  %v1612_v27 = vsel %vm1605_vm6, %v1609_v42, %v1611_v39 }
 0x1c3   :  { %v1508_v46 = vadd.f32 %v15732_v29, %v1465_v63  ;;  %v1466_v60 = vmax.f32 %v19133_v4, %v1430_v41  ;;  %v1608_v53 = vsel %vm1605_vm6, %v1606_v55, %v1607_v24  ;;  %v1610_v61 = vsel %vm1605_vm6, %v1607_v24, %v1609_v42 }
 0x1c4   :  { %v1511_v50 = vadd.f32 %v15732_v29, %v1468_v47  ;;  %12679 = vmatprep.mubr.msk.f32.mxu0 %vm1653_vm7, %v1608_v53  ;;  %v15797_v0 = vmax.f32 %v1510_v3, 0.0 }
 0x1c5   :  { %v15792_v62 = vmax.f32 %v1508_v46, 0.0  ;;  %v1509_v6 = vadd.f32 %v15732_v29, %v1466_v60  ;;  %v12649_v1 = vpop.f32.mrb[116].mxu0  ;;  %12680 = vmatmul.mubr.msk.f32.vlgmr.msra.gmra.mrb[144].mxu0 %vm1653_vm7, %v1610_v61 }
 0x1c6   :  { %v15799_v8 = vmax.f32 %v1511_v50, 0.0  ;;  %v1435_v7 = vmax.f32 %v15673_v38, %v12649_v1  ;;  %v1278_v22 = vpop.f32.mrb[117].mxu0  ;;  %12682 = vmatprep.mubr.msk.f32.mxu0 %vm1653_vm7, %v1612_v27  ;;  %14008 = vmatpush3.bf16.msk.msra.mxu0 %vm15549_vm5, %v15617_v57  ;;  %v19134_v38 = vmax.f32 %v15371_v9, %v15511_v13  ;;  %v19135_v57 = vmax.f32 %v15373_v10, %v15515_v19 }
 0x1c7   :  { %v15806_v2 = vmax.f32 %v1509_v6, 0.0  ;;  %v1433_v30 = vmax.f32 %v15675_v23, %v1278_v22  ;;  %v12650_v33 = vpop.f32.mrb[118].mxu0  ;;  %v1613_v34 = vrot.slane %v15792_v62, 1  ;;  %14011 = vmatprep.subr.msk.bf16.mxu0 %vm15549_vm5, %v15782_v21  ;;  %v1617_v9 = vrot.slane %v15797_v0, 1 }
 0x1c8   :  { %v1471_v45 = vmax.f32 %v19134_v38, %v1435_v7  ;;  %v1436_v51 = vmax.f32 %v15677_v35, %v12650_v33  ;;  %v1281_v52 = vpop.f32.mrb[119].mxu0  ;;  %v1619_v13 = vrot.slane %v15799_v8, 1  ;;  %v19138_v19 = vmax.f32 %v15383_v14, %v15523_v31 }
 0x1c9   :  { %v1469_v54 = vmax.f32 %v19135_v57, %v1433_v30  ;;  %v1434_v23 = vmax.f32 %v15679_v44, %v1281_v52  ;;  %v15822_v55 = vsel %vm1605_vm6, %v1611_v39, %v1613_v34  ;;  %v1615_v42 = vrot.slane %v15806_v2, 1  ;;  %v19148_v57 = vld [vmem:[#allocation46_spill] sm:$0xff] }
 0x1ca   :  { %19136 = vst [vmem:[#allocation66_spill] sm:$0xff] %v15822_v55  ;;  %v1472_v63 = vmax.f32 %v19137_v56, %v1436_v51  ;;  %12683 = vmatmul.mubr.msk.f32.gmra.mrb[146].mxu0 %vm1653_vm7, %v15822_v55  ;;  %v1514_v10 = vadd.f32 %v15732_v29, %v1471_v45  ;;  %v15855_v47 = vsel %vm1605_vm6, %v1617_v9, %v1619_v13  ;;  %v19226_v55 = vld [vmem:[#allocation38_spill] sm:$0xff] }
 0x1cb   :  { %v1512_v44 = vadd.f32 %v15732_v29, %v1469_v54  ;;  %v1470_v35 = vmax.f32 %v19138_v19, %v1434_v23  ;;  %v15838_v41 = vsel %vm1605_vm6, %v1613_v34, %v1615_v42  ;;  %v15847_v3 = vsel %vm1605_vm6, %v1615_v42, %v1617_v9  ;;  %v19152_v19 = vld [vmem:[#allocation25_spill] sm:$0xff] }
 0x1cc   :  { %19139 = vst [vmem:[#allocation67_spill] sm:$0xff] %v15838_v41  ;;  %v1515_v12 = vadd.f32 %v15732_v29, %v1472_v63  ;;  %12685 = vmatprep.mubr.msk.f32.mxu0 %vm1653_vm7, %v15838_v41  ;;  %19140 = vst [vmem:[#allocation68_spill] sm:$0xff] %v15847_v3  ;;  %v15857_v46 = vmax.f32 %v1514_v10, 0.0  ;;  %v19142_v27 = vmax.f32 %v15389_v16, %v15531_v43  ;;  %v19150_v63 = vld [vmem:[#allocation47_spill] sm:$0xff]  ;;  %v18917_v41 = vrot.slane %v15754_v28, 2 }
 0x1cd   :  { %v15843_v25 = vmax.f32 %v1512_v44, 0.0  ;;  %v1513_v24 = vadd.f32 %v15732_v29, %v1470_v35  ;;  %v12653_v39 = vpop.f32.mrb[120].mxu0  ;;  %v19151_v44 = vld [vmem:[#allocation5_spill] sm:$0xff] }
 0x1ce   :  { %v15849_v58 = vmax.f32 %v1515_v12, 0.0  ;;  %v1439_v14 = vmax.f32 %v15681_v49, %v12653_v39  ;;  %v1294_v31 = vpop.f32.mrb[121].mxu0  ;;  %12686 = vmatmul.mubr.msk.f32.gmra.mrb[148].mxu0 %vm1653_vm7, %v15847_v3  ;;  %v19141_v49 = vmax.f32 %v15387_v15, %v15527_v37  ;;  %v19144_v15 = vmax.f32 %v15394_v18, %v15541_v17  ;;  %v19224_v3 = vld [vmem:[#allocation60_spill] sm:$0xff] }
 0x1cf   :  { %v15859_v4 = vmax.f32 %v1513_v24, 0.0  ;;  %v1437_v60 = vmax.f32 %v15683_v48, %v1294_v31  ;;  %v12654_v53 = vpop.f32.mrb[122].mxu0  ;;  %12688 = vmatprep.mubr.msk.f32.mxu0 %vm1653_vm7, %v15855_v47  ;;  %v1621_v61 = vrot.slane %v15843_v25, 1  ;;  %v1625_v38 = vrot.slane %v15857_v46, 1  ;;  %v19154_v24 = vld [vmem:[#allocation48_spill] sm:$0xff] }
 0x1d0   :  { %v1475_v50 = vmax.f32 %v19141_v49, %v1439_v14  ;;  %v1440_v6 = vmax.f32 %v15685_v40, %v12654_v53  ;;  %v1297_v1 = vpop.f32.mrb[123].mxu0  ;;  %v1627_v40 = vrot.slane %v15849_v58, 1  ;;  %v19153_v35 = vmax.f32 %v19151_v44, %v19152_v19  ;;  %v19155_v53 = vld [vmem:[#allocation6_spill] sm:$0xff] }
 0x1d1   :  { %v1473_v7 = vmax.f32 %v19142_v27, %v1437_v60  ;;  %v1438_v22 = vmax.f32 %v15687_v36, %v1297_v1  ;;  %v15874_v48 = vsel %vm1605_vm6, %v1619_v13, %v1621_v61  ;;  %v1623_v30 = vrot.slane %v15859_v4, 1  ;;  %v19170_v44 = vld [vmem:[#allocation50_spill] sm:$0xff] }
 0x1d2   :  { %19143 = vst [vmem:[#allocation69_spill] sm:$0xff] %v15874_v48  ;;  %v1518_v33 = vadd.f32 %v15732_v29, %v1475_v50  ;;  %v1476_v37 = vmax.f32 %v19144_v15, %v1440_v6  ;;  %12689 = vmatmul.mubr.msk.f32.gmra.mrb[150].mxu0 %vm1653_vm7, %v15874_v48  ;;  %v19145_v36 = vmax.f32 %v15399_v20, %v15545_v11  ;;  %v19158_v6 = vld [vmem:[#allocation49_spill] sm:$0xff] }
 0x1d3   :  { %v1516_v16 = vadd.f32 %v15732_v29, %v1473_v7  ;;  %v15889_v34 = vsel %vm1605_vm6, %v1621_v61, %v1623_v30  ;;  %v15901_v20 = vsel %vm1605_vm6, %v1623_v30, %v1625_v38  ;;  %v15909_v42 = vsel %vm1605_vm6, %v1625_v38, %v1627_v40  ;;  %v19156_v61 = vld [vmem:[#allocation26_spill] sm:$0xff]  ;;  %v19161_v30 = vld [vmem:[#allocation27_spill] sm:$0xff]  ;;  %v19165_v38 = vld [vmem:[#allocation28_spill] sm:$0xff] }
 0x1d4   :  { %v1474_v43 = vmax.f32 %v19145_v36, %v1438_v22  ;;  %19146 = vst [vmem:[#allocation70_spill] sm:$0xff] %v15889_v34  ;;  %v15892_v45 = vmax.f32 %v1518_v33, 0.0  ;;  %v1519_v18 = vadd.f32 %v15732_v29, %v1476_v37  ;;  %12691 = vmatprep.mubr.msk.f32.mxu0 %vm1653_vm7, %v15889_v34  ;;  %19147 = vst [vmem:[#allocation71_spill] sm:$0xff] %v15901_v20  ;;  %v19160_v22 = vld [vmem:[#allocation7_spill] sm:$0xff] }
 0x1d5   :  { %v15897_v17 = vmax.f32 %v1516_v16, 0.0  ;;  %v12657_v52 = vpop.f32.mrb[124].mxu0  ;;  %19149 = vst [vmem:[#allocation46_spill] sm:$0xff] %v15909_v42  ;;  %v19157_v49 = vmax.f32 %v19155_v53, %v19156_v61  ;;  %v19162_v33 = vmax.f32 %v19160_v22, %v19161_v30  ;;  %v19174_v61 = vld [vmem:[#allocation9_spill] sm:$0xff] }
 0x1d6   :  { %v1517_v51 = vadd.f32 %v15732_v29, %v1474_v43  ;;  %v15903_v11 = vmax.f32 %v1519_v18, 0.0  ;;  %v1443_v54 = vmax.f32 %v19148_v57, %v12657_v52  ;;  %v1310_v23 = vpop.f32.mrb[125].mxu0  ;;  %12692 = vmatmul.mubr.msk.f32.gmra.mrb[152].mxu0 %vm1653_vm7, %v15901_v20  ;;  %v1633_v31 = vrot.slane %v15892_v45, 1  ;;  %v19164_v43 = vld [vmem:[#allocation8_spill] sm:$0xff] }
 0x1d7   :  { %v1441_v9 = vmax.f32 %v19150_v63, %v1310_v23  ;;  %v12658_v13 = vpop.f32.mrb[126].mxu0  ;;  %12694 = vmatprep.mubr.msk.f32.mxu0 %vm1653_vm7, %v15909_v42  ;;  %v1629_v10 = vrot.slane %v15897_v17, 1 }
 0x1d8   :  { %v15911_v56 = vmax.f32 %v1517_v51, 0.0  ;;  %v1479_v12 = vmax.f32 %v19153_v35, %v1443_v54  ;;  %v1444_v39 = vmax.f32 %v19154_v24, %v12658_v13  ;;  %v1313_v14 = vpop.f32.mrb[127].mxu0  ;;  %v1635_v60 = vrot.slane %v15903_v11, 1  ;;  %v11025_v13 = vld [vmem:[%s18851_s3 + $0x88] sm:$0x3] }
 0x1d9   :  { %v1477_v50 = vmax.f32 %v19157_v49, %v1441_v9  ;;  %v1442_v1 = vmax.f32 %v19158_v6, %v1313_v14  ;;  %v15928_v27 = vsel %vm1605_vm6, %v1627_v40, %v1629_v10  ;;  %v19166_v40 = vmax.f32 %v19164_v43, %v19165_v38  ;;  %v11024_v9 = vld [vmem:[%s18851_s3 + $0x80] sm:$0xff] }
 0x1da   :  { %19159 = vst [vmem:[#allocation47_spill] sm:$0xff] %v15928_v27  ;;  %v1631_v7 = vrot.slane %v15911_v56, 1  ;;  %v1480_v15 = vmax.f32 %v19162_v33, %v1444_v39  ;;  %12695 = vmatmul.mubr.msk.f32.gmra.mrb[154].mxu0 %vm1653_vm7, %v15928_v27  ;;  %v15937_v37 = vsel %vm1605_vm6, %v1633_v31, %v1635_v60  ;;  %v1522_v16 = vadd.f32 %v15732_v29, %v1479_v12  ;;  %v19173_v39 = vld [vmem:[#allocation51_spill] sm:$0xff]  ;;  %v19175_v49 = vld [vmem:[#allocation29_spill] sm:$0xff]  ;;  %v19178_v33 = vld [vmem:[#allocation10_spill] sm:$0xff] }
 0x1db   :  { %19163 = vst [vmem:[#allocation5_spill] sm:$0xff] %v15937_v37  ;;  %v1520_v36 = vadd.f32 %v15732_v29, %v1477_v50  ;;  %v1478_v18 = vmax.f32 %v19166_v40, %v1442_v1  ;;  %12700 = vmatprep.mubr.msk.f32.mxu1 %vm1653_vm7, %v15937_v37  ;;  %v19176_v50 = vmax.f32 %v19174_v61, %v19175_v49  ;;  %v19177_v1 = vld [vmem:[#allocation52_spill] sm:$0xff]  ;;  %v19181_v43 = vld [vmem:[#allocation53_spill] sm:$0xff] }
 0x1dc   :  { %v15947_v51 = vsel %vm1605_vm6, %v1629_v10, %v1631_v7  ;;  %v1523_v52 = vadd.f32 %v15732_v29, %v1480_v15  ;;  %v15956_v63 = vsel %vm1605_vm6, %v1631_v7, %v1633_v31  ;;  %v15969_v12 = vmax.f32 %v1522_v16, 0.0  ;;  %v19179_v15 = vld [vmem:[#allocation30_spill] sm:$0xff]  ;;  %v19189_v49 = vld [vmem:[#allocation45_spill] sm:$0xff] }
 0x1dd   :  { %19167 = vst [vmem:[#allocation25_spill] sm:$0xff] %v15947_v51  ;;  %12697 = vmatprep.mubr.msk.f32.mxu0 %vm1653_vm7, %v15947_v51  ;;  %v15952_v57 = vmax.f32 %v1520_v36, 0.0  ;;  %v1521_v54 = vadd.f32 %v15732_v29, %v1478_v18  ;;  %v12661_v23 = vpop.f32.mrb[128].mxu0  ;;  %19168 = vst [vmem:[#allocation48_spill] sm:$0xff] %v15956_v63  ;;  %v15981_v30 = vpack.c.bf16 %v11025_v13, %v11024_v9  ;;  %v19183_v9 = vld [vmem:[#allocation11_spill] sm:$0xff]  ;;  %v19247_v37 = vld [vmem:[#allocation65_spill] sm:$0xff] }
 0x1de   :  { %v15964_v10 = vmax.f32 %v1523_v52, 0.0  ;;  %v1447_v19 = vmax.f32 %v19170_v44, %v12661_v23  ;;  %v1326_v35 = vpop.f32.mrb[129].mxu0  ;;  %12698 = vmatmul.mubr.msk.f32.gmra.mrb[156].mxu0 %vm1653_vm7, %v15956_v63  ;;  %19171 = vst [vmem:[#allocation26_spill] sm:$0xff] %v15969_v12  ;;  %v19180_v16 = vmax.f32 %v19178_v33, %v19179_v15  ;;  %v10889_v52 = vld [vmem:[%s18851_s3 + $0x30] sm:$0xff]  ;;  %v10916_v27 = vld [vmem:[%s18851_s3 + $0x40] sm:$0xff] }
 0x1df   :  { %v15971_v24 = vmax.f32 %v1521_v54, 0.0  ;;  %v1445_v14 = vmax.f32 %v19173_v39, %v1326_v35  ;;  %v12662_v31 = vpop.f32.mrb[130].mxu0  ;;  %12719 = vmatprep.mubr.msk.f32.mxu0 %vm1653_vm7, %v15751_v59  ;;  %v1637_v53 = vrot.slane %v15952_v57, 1  ;;  %v10890_v54 = vld [vmem:[%s18851_s3 + $0x38] sm:$0x3]  ;;  %v19186_v39 = vld [vmem:[#allocation12_spill] sm:$0xff] }
 0x1e0   :  { %19169 = vst [vmem:[#allocation6_spill] sm:$0xff] %v15964_v10  ;;  %v1483_v6 = vmax.f32 %v19176_v50, %v1447_v19  ;;  %v1448_v7 = vmax.f32 %v19177_v1, %v12662_v31  ;;  %v1329_v22 = vpop.f32.mrb[131].mxu0  ;;  %v19184_v13 = vld [vmem:[#allocation31_spill] sm:$0xff] }
 0x1e1   :  { %19172 = vst [vmem:[#allocation49_spill] sm:$0xff] %v15971_v24  ;;  %v1481_v36 = vmax.f32 %v19180_v16, %v1445_v14  ;;  %v1446_v38 = vmax.f32 %v19181_v43, %v1329_v22  ;;  %v15988_v40 = vsel %vm1605_vm6, %v1635_v60, %v1637_v53  ;;  %v1639_v18 = vrot.slane %v15971_v24, 1  ;;  %v19187_v14 = vld [vmem:[#allocation32_spill] sm:$0xff] }
 0x1e2   :  { %19182 = vst [vmem:[#allocation7_spill] sm:$0xff] %v15988_v40  ;;  %v1526_v23 = vadd.f32 %v15732_v29, %v1483_v6  ;;  %v19185_v44 = vmax.f32 %v19183_v9, %v19184_v13  ;;  %12701 = vmatmul.mubr.msk.f32.vlgmr.msra.gmra.mrb[0].mxu1 %vm1653_vm7, %v15988_v40  ;;  %12720 = vmatmul.mubr.msk.f32.vlgmr.msra.gmra.mrb[144].mxu0 %vm1653_vm7, %v15757_v26  ;;  %v1643_v60 = vrot.slane %v15964_v10, 1  ;;  %v1641_v6 = vrot.slane %v15969_v12, 1  ;;  %v19198_v9 = vld [vmem:[#allocation55_spill] sm:$0xff] }
 0x1e3   :  { %v1524_v35 = vadd.f32 %v15732_v29, %v1481_v36  ;;  %v19188_v31 = vmax.f32 %v19186_v39, %v19187_v14  ;;  %12722 = vmatprep.mubr.msk.f32.mxu0 %vm1653_vm7, %v15748_v32  ;;  %14044 = vmatpush3.bf16.msk.msra.mxu1 %vm15549_vm5, %v19189_v49  ;;  %v16016_v50 = vsel %vm1605_vm6, %v1637_v53, %v1639_v18  ;;  %v19194_v36 = vld [vmem:[#allocation54_spill] sm:$0xff] }
 0x1e4   :  { %v1484_v19 = vmax.f32 %v19185_v44, %v1448_v7  ;;  %19190 = vst [vmem:[#allocation27_spill] sm:$0xff] %v16016_v50  ;;  %12703 = vmatprep.mubr.msk.f32.mxu1 %vm1653_vm7, %v16016_v50  ;;  %14047 = vmatprep.subr.msk.bf16.mxu1 %vm15549_vm5, %v15981_v30  ;;  %v16025_v7 = vpack.c.bf16 %v10890_v54, %v10889_v52  ;;  %v19203_v49 = vld [vmem:[#allocation14_spill] sm:$0xff]  ;;  %v19230_v50 = vld [vmem:[#allocation39_spill] sm:$0xff] }
 0x1e5   :  { %v1482_v61 = vmax.f32 %v19188_v31, %v1446_v38  ;;  %v16027_v22 = vmax.f32 %v1524_v35, 0.0  ;;  %v12665_v15 = vpop.f32.mrb[132].mxu0  ;;  %v16031_v53 = vsel %vm1605_vm6, %v1639_v18, %v1641_v6  ;;  %14014 = vmatpush3.bf16.msk.msra.mxu0 %vm15549_vm5, %v15782_v21  ;;  %v16044_v52 = vsel %vm1605_vm6, %v1641_v6, %v1643_v60  ;;  %v19200_v35 = vld [vmem:[#allocation33_spill] sm:$0xff]  ;;  %v19204_v6 = vld [vmem:[#allocation34_spill] sm:$0xff] }
 0x1e6   :  { %v1527_v1 = vadd.f32 %v15732_v29, %v1484_v19  ;;  %19192 = vst [vmem:[#allocation28_spill] sm:$0xff] %v16031_v53  ;;  %v1451_v43 = vmax.f32 %v19194_v36, %v12665_v15  ;;  %v1342_v38 = vpop.f32.mrb[133].mxu0  ;;  %12704 = vmatmul.mubr.msk.f32.gmra.mrb[2].mxu1 %vm1653_vm7, %v16031_v53  ;;  %12723 = vmatmul.mubr.msk.f32.gmra.mrb[146].mxu0 %vm1653_vm7, %v15754_v28  ;;  %19195 = vst [vmem:[#allocation51_spill] sm:$0xff] %v16044_v52  ;;  %v16046_v18 = vmax.f32 %v1526_v23, 0.0  ;;  %v19199_v19 = vld [vmem:[#allocation13_spill] sm:$0xff]  ;;  %v19202_v23 = vld [vmem:[#allocation56_spill] sm:$0xff] }
 0x1e7   :  { %19191 = vst [vmem:[#allocation8_spill] sm:$0xff] %v16027_v22  ;;  %v1525_v33 = vadd.f32 %v15732_v29, %v1482_v61  ;;  %v1449_v21 = vmax.f32 %v19198_v9, %v1342_v38  ;;  %v12666_v13 = vpop.f32.mrb[134].mxu0  ;;  %12706 = vmatprep.mubr.msk.f32.mxu1 %vm1653_vm7, %v16044_v52  ;;  %12725 = vmatprep.mubr.msk.f32.mxu0 %vm1653_vm7, %v15792_v62  ;;  %v1645_v44 = vrot.slane %v16027_v22, 1  ;;  %v19206_v15 = vld [vmem:[#allocation57_spill] sm:$0xff]  ;;  %v19208_v9 = vld [vmem:[#allocation15_spill] sm:$0xff]  ;;  %v2140_v52 = vrot.slane %v15806_v2, 2 }
 0x1e8   :  { %v16036_v16 = vmax.f32 %v1527_v1, 0.0  ;;  %19196 = vst [vmem:[#allocation9_spill] sm:$0xff] %v16046_v18  ;;  %v19201_v39 = vmax.f32 %v19199_v19, %v19200_v35  ;;  %v1452_v31 = vmax.f32 %v19202_v23, %v12666_v13  ;;  %v1345_v61 = vpop.f32.mrb[135].mxu0  ;;  %14017 = vmatprep.subr.msk.bf16.mxu0 %vm15549_vm5, %v16025_v7  ;;  %v19205_v1 = vmax.f32 %v19203_v49, %v19204_v6  ;;  %v19209_v19 = vld [vmem:[#allocation35_spill] sm:$0xff]  ;;  %v19213_v23 = vld [vmem:[#allocation36_spill] sm:$0xff] }
 0x1e9   :  { %v16048_v54 = vmax.f32 %v1525_v33, 0.0  ;;  %v1450_v36 = vmax.f32 %v19206_v15, %v1345_v61  ;;  %v16072_v38 = vsel %vm1605_vm6, %v1643_v60, %v1645_v44  ;;  %v19210_v13 = vmax.f32 %v19208_v9, %v19209_v19  ;;  %v19217_v15 = vld [vmem:[#allocation58_spill] sm:$0xff]  ;;  %v19229_v53 = vld [vmem:[#allocation19_spill] sm:$0xff] }
 0x1ea   :  { %19193 = vst [vmem:[#allocation50_spill] sm:$0xff] %v16036_v16  ;;  %v16059_v14 = vmax.f32 %v19201_v39, %v1451_v43  ;;  %v16068_v33 = vmax.f32 %v19205_v1, %v1449_v21  ;;  %19207 = vst [vmem:[#allocation52_spill] sm:$0xff] %v16072_v38  ;;  %12707 = vmatmul.mubr.msk.f32.gmra.mrb[4].mxu1 %vm1653_vm7, %v16072_v38  ;;  %12726 = vmatmul.mubr.msk.f32.gmra.mrb[148].mxu0 %vm1653_vm7, %v15806_v2  ;;  %v16085_v21 = vrot.slane %v16036_v16, 1  ;;  %v19212_v39 = vld [vmem:[#allocation16_spill] sm:$0xff]  ;;  %v19228_v38 = vld [vmem:[#allocation61_spill] sm:$0xff] }
 0x1eb   :  { %19197 = vst [vmem:[#allocation29_spill] sm:$0xff] %v16048_v54  ;;  %v1647_v43 = vrot.slane %v16048_v54, 1  ;;  %v16078_v35 = vmax.f32 %v19210_v13, %v1452_v31  ;;  %v19214_v60 = vmax.f32 %v19212_v39, %v19213_v23  ;;  %12728 = vmatprep.mubr.msk.f32.mxu0 %vm1653_vm7, %v15797_v0  ;;  %v1649_v49 = vrot.slane %v16046_v18, 1  ;;  %v19219_v13 = vld [vmem:[#allocation59_spill] sm:$0xff] }
 0x1ec   :  { %19211 = vst [vmem:[#allocation10_spill] sm:$0xff] %v16085_v21  ;;  %v2172_v20 = vrot.slane %v16048_v54, 2 }
 0x1ed   :  { %v16090_v61 = vmax.f32 %v19214_v60, %v1450_v36  ;;  %v16095_v31 = vsel %vm1605_vm6, %v1645_v44, %v1647_v43  ;;  %v12669_v6 = vpop.f32.mrb[136].mxu0  ;;  %v16101_v1 = vsel %vm1605_vm6, %v1647_v43, %v1649_v49  ;;  %v16110_v44 = vsel %vm1605_vm6, %v1649_v49, %v16085_v21  ;;  %v19220_v43 = vld [vmem:[#allocation17_spill] sm:$0xff] }
 0x1ee   :  { %19215 = vst [vmem:[#allocation30_spill] sm:$0xff] %v16095_v31  ;;  %12709 = vmatprep.mubr.msk.f32.mxu1 %vm1653_vm7, %v16095_v31  ;;  %19216 = vst [vmem:[#allocation53_spill] sm:$0xff] %v16101_v1  ;;  %v1455_v9 = vmax.f32 %v19217_v15, %v12669_v6  ;;  %v1358_v19 = vpop.f32.mrb[137].mxu0  ;;  %12729 = vmatmul.mubr.msk.f32.gmra.mrb[150].mxu0 %vm1653_vm7, %v15799_v8  ;;  %v2138_v36 = vrot.slane %v15792_v62, 2  ;;  %v19221_v60 = vld [vmem:[#allocation37_spill] sm:$0xff]  ;;  %v19225_v31 = vld [vmem:[#allocation18_spill] sm:$0xff] }
 0x1ef   :  { %12710 = vmatmul.mubr.msk.f32.gmra.mrb[6].mxu1 %vm1653_vm7, %v16101_v1  ;;  %19218 = vst [vmem:[#allocation11_spill] sm:$0xff] %v16110_v44  ;;  %v1453_v39 = vmax.f32 %v19219_v13, %v1358_v19  ;;  %v12670_v23 = vpop.f32.mrb[138].mxu0  ;;  %12731 = vmatprep.mubr.msk.f32.mxu0 %vm1653_vm7, %v15843_v25  ;;  %v19222_v6 = vmax.f32 %v19220_v43, %v19221_v60 }
 0x1f0   :  { %12712 = vmatprep.mubr.msk.f32.mxu1 %vm1653_vm7, %v16110_v44  ;;  %v1456_v1 = vmax.f32 %v19224_v3, %v12670_v23  ;;  %v1361_v49 = vpop.f32.mrb[139].mxu0  ;;  %v19227_v19 = vmax.f32 %v19225_v31, %v19226_v55  ;;  %v19231_v43 = vmax.f32 %v19229_v53, %v19230_v50  ;;  %v16144_v55 = vsel %vm2130_vm8, %v18917_v41, %v2138_v36  ;;  %v11051_v3 = vld [vmem:[%s18851_s3 + $0x90] sm:$0xff]  ;;  %v11052_v50 = vld [vmem:[%s18851_s3 + $0x98] sm:$0x3]  ;;  %v19233_v53 = vld [vmem:[#allocation20_spill] sm:$0xff] }
 0x1f1   :  { %v16121_v15 = vmax.f32 %v19222_v6, %v1455_v9  ;;  %v1454_v44 = vmax.f32 %v19228_v38, %v1361_v49  ;;  %v19234_v38 = vld [vmem:[#allocation40_spill] sm:$0xff]  ;;  %v16163_v60 = vsel %vm2130_vm8, %v2138_v36, %v2140_v52  ;;  %v2144_v6 = vrot.slane %v15799_v8, 2  ;;  %v19237_v36 = vld [vmem:[#allocation63_spill] sm:$0xff] }
 0x1f2   :  { %v16128_v13 = vmax.f32 %v19227_v19, %v1453_v39  ;;  %v16135_v9 = vmax.f32 %v19231_v43, %v1456_v1  ;;  %12732 = vmatmul.mubr.msk.f32.gmra.mrb[152].mxu0 %vm1653_vm7, %v15859_v4  ;;  %v19235_v31 = vmax.f32 %v19233_v53, %v19234_v38  ;;  %v2142_v39 = vrot.slane %v15797_v0, 2  ;;  %v19236_v19 = vld [vmem:[#allocation62_spill] sm:$0xff] }
 0x1f3   :  { %19223 = vst [vmem:[#allocation31_spill] sm:$0xff] %v16121_v15  ;;  %12713 = vmatmul.mubr.msk.f32.gmra.mrb[8].mxu1 %vm1653_vm7, %v16085_v21  ;;  %12734 = vmatprep.mubr.msk.f32.mxu0 %vm1653_vm7, %v15857_v46  ;;  %v16166_v49 = vpack.c.bf16 %v11052_v50, %v11051_v3  ;;  %v2146_v38 = vrot.slane %v15843_v25, 2  ;;  %v19238_v3 = vld [vmem:[#allocation21_spill] sm:$0xff] }
 0x1f4   :  { %19232 = vst [vmem:[#allocation12_spill] sm:$0xff] %v16135_v9  ;;  %v16155_v1 = vmax.f32 %v19235_v31, %v1454_v44  ;;  %12959 = vmatprep.mubr.msk.f32.mxu1 %vm1653_vm7, %v16144_v55  ;;  %v16174_v53 = vsel %vm2130_vm8, %v2140_v52, %v2142_v39  ;;  %v19239_v50 = vld [vmem:[#allocation41_spill] sm:$0xff]  ;;  %v19242_v9 = vld [vmem:[#allocation64_spill] sm:$0xff]  ;;  %v16198_v51 = vsel %vm2130_vm8, %v2142_v39, %v2144_v6 }
 0x1f5   :  { %v12673_v23 = vpop.f32.mrb[140].mxu0  ;;  %v19254_v39 = vld [vmem:[#allocation44_spill] sm:$0xff] }
 0x1f6   :  { %v1459_v43 = vmax.f32 %v19236_v19, %v12673_v23  ;;  %v1374_v44 = vpop.f32.mrb[141].mxu0  ;;  %12735 = vmatmul.mubr.msk.f32.gmra.mrb[154].mxu0 %vm1653_vm7, %v15849_v58  ;;  %v19240_v23 = vmax.f32 %v19238_v3, %v19239_v50 }
 0x1f7   :  { %12960 = vmatmul.mubr.msk.f32.vlgmr.msra.gmra.mrb[10].mxu1 %vm1653_vm7, %v16163_v60  ;;  %v1457_v31 = vmax.f32 %v19237_v36, %v1374_v44  ;;  %v12674_v41 = vpop.f32.mrb[142].mxu0  ;;  %12737 = vmatprep.mubr.msk.f32.mxu0 %vm1653_vm7, %v15897_v17  ;;  %v19243_v44 = vld [vmem:[#allocation22_spill] sm:$0xff] }
 0x1f8   :  { %12962 = vmatprep.mubr.msk.f32.mxu1 %vm1653_vm7, %v16174_v53  ;;  %v16185_v19 = vmax.f32 %v19240_v23, %v1459_v43  ;;  %v1460_v15 = vmax.f32 %v19242_v9, %v12674_v41  ;;  %14050 = vmatpush3.bf16.msk.msra.mxu1 %vm15549_vm5, %v15981_v30  ;;  %v1377_v52 = vpop.f32.mrb[143].mxu0  ;;  %v19244_v36 = vld [vmem:[#allocation42_spill] sm:$0xff]  ;;  %v2148_v43 = vrot.slane %v15859_v4, 2  ;;  %v19248_v41 = vld [vmem:[#allocation23_spill] sm:$0xff] }
 0x1f9   :  { %v19245_v21 = vmax.f32 %v19243_v44, %v19244_v36  ;;  %v1458_v63 = vmax.f32 %v19247_v37, %v1377_v52  ;;  %14053 = vmatprep.subr.msk.bf16.mxu1 %vm15549_vm5, %v16166_v49  ;;  %v19249_v9 = vld [vmem:[#allocation43_spill] sm:$0xff]  ;;  %v16214_v37 = vsel %vm2130_vm8, %v2144_v6, %v2146_v38  ;;  %v2152_v52 = vrot.slane %v15849_v58, 2 }
 0x1fa   :  { %19241 = vst [vmem:[#allocation32_spill] sm:$0xff] %v16185_v19  ;;  %v19250_v30 = vmax.f32 %v19248_v41, %v19249_v9  ;;  %12738 = vmatmul.mubr.msk.f32.gmra.mrb[156].mxu0 %vm1653_vm7, %v15911_v56  ;;  %19252 = vst [vmem:[#allocation55_spill] sm:$0xff] %v16214_v37  ;;  %v16227_v23 = vsel %vm2130_vm8, %v2146_v38, %v2148_v43  ;;  %v2154_v6 = vrot.slane %v15897_v17, 2  ;;  %v2156_v44 = vrot.slane %v15911_v56, 2 }
 0x1fb   :  { %v16194_v40 = vmax.f32 %v19245_v21, %v1457_v31  ;;  %12963 = vmatmul.mubr.msk.f32.gmra.mrb[12].mxu1 %vm1653_vm7, %v16198_v51  ;;  %v19253_v21 = vld [vmem:[#allocation24_spill] sm:$0xff]  ;;  %12740 = vmatprep.mubr.msk.f32.mxu0 %vm1653_vm7, %v15892_v45  ;;  %19257 = vst [vmem:[#allocation33_spill] sm:$0xff] %v16227_v23  ;;  %v2160_v9 = vrot.slane %v15903_v11, 2  ;;  %v1528_v19 = vadd.f32 %v15732_v29, %v16068_v33  ;;  %v10917_v33 = vld [vmem:[%s18851_s3 + $0x48] sm:$0x3] }
 0x1fc   :  { %v16207_v3 = vmax.f32 %v19250_v30, %v1460_v15  ;;  %v19255_v31 = vmax.f32 %v19253_v21, %v19254_v39  ;;  %12965 = vmatprep.mubr.msk.f32.mxu1 %vm1653_vm7, %v16214_v37  ;;  %v2150_v15 = vrot.slane %v15857_v46, 2  ;;  %v16251_v36 = vsel %vm2130_vm8, %v2152_v52, %v2154_v6 }
 0x1fd   :  { %19246 = vst [vmem:[#allocation45_spill] sm:$0xff] %v16194_v40  ;;  %19260 = vst [vmem:[#allocation34_spill] sm:$0xff] %v16251_v36  ;;  %v16259_v41 = vsel %vm2130_vm8, %v2154_v6, %v2156_v44  ;;  %v2162_v21 = vrot.slane %v15952_v57, 2  ;;  %v2131_v6 = vrot.slane %v15751_v59, 2  ;;  %v16324_v34 = vpack.c.bf16 %v10917_v33, %v10916_v27 }
 0x1fe   :  { %19251 = vst [vmem:[#allocation54_spill] sm:$0xff] %v16207_v3  ;;  %v16219_v50 = vmax.f32 %v19255_v31, %v1458_v63  ;;  %12741 = vmatmul.mubr.msk.f32.gmra.mrb[158].mxu0 %vm1653_vm7, %v15903_v11  ;;  %v16235_v63 = vsel %vm2130_vm8, %v2148_v43, %v2150_v15  ;;  %v16243_v38 = vsel %vm2130_vm8, %v2150_v15, %v2152_v52  ;;  %v2158_v43 = vrot.slane %v15892_v45, 2 }
 0x1ff   :  { %12966 = vmatmul.mubr.msk.f32.gmra.mrb[14].mxu1 %vm1653_vm7, %v16227_v23  ;;  %19258 = vst [vmem:[#allocation56_spill] sm:$0xff] %v16235_v63  ;;  %12743 = vmatprep.mubr.msk.f32.mxu0 %vm1653_vm7, %v15952_v57  ;;  %19259 = vst [vmem:[#allocation14_spill] sm:$0xff] %v16243_v38  ;;  %v2164_v31 = vrot.slane %v15971_v24, 2  ;;  %v16283_v15 = vsel %vm2130_vm8, %v2160_v9, %v2162_v21  ;;  %v2132_v52 = vrot.slane %v15757_v26, 2  ;;  %v2134_v3 = vrot.slane %v15748_v32, 2 }
 0x200   :  { %19256 = vst [vmem:[#allocation13_spill] sm:$0xff] %v16219_v50  ;;  %12968 = vmatprep.mubr.msk.f32.mxu1 %vm1653_vm7, %v16235_v63  ;;  %19261 = vst [vmem:[#allocation57_spill] sm:$0xff] %v16259_v41  ;;  %v16267_v30 = vsel %vm2130_vm8, %v2156_v44, %v2158_v43  ;;  %v16275_v39 = vsel %vm2130_vm8, %v2158_v43, %v2160_v9  ;;  %v2166_v44 = vrot.slane %v15969_v12, 2  ;;  %v2168_v9 = vrot.slane %v15964_v10, 2 }
 0x201   :  { %19262 = vst [vmem:[#allocation15_spill] sm:$0xff] %v16267_v30  ;;  %19263 = vst [vmem:[#allocation35_spill] sm:$0xff] %v16275_v39  ;;  %v16293_v43 = vsel %vm2130_vm8, %v2162_v21, %v2164_v31  ;;  %v2133_v50 = vsel %vm2130_vm8, %v2131_v6, %v2132_v52  ;;  %v2170_v21 = vrot.slane %v16027_v22, 2  ;;  %v2135_v6 = vsel %vm2130_vm8, %v2132_v52, %v2134_v3 }
 0x202   :  { %12744 = vmatmul.mubr.msk.f32.gmra.mrb[160].mxu0 %vm1653_vm7, %v15971_v24  ;;  %19264 = vst [vmem:[#allocation16_spill] sm:$0xff] %v16283_v15  ;;  %19265 = vst [vmem:[#allocation36_spill] sm:$0xff] %v16293_v43  ;;  %v16305_v40 = vsel %vm2130_vm8, %v2164_v31, %v2166_v44  ;;  %v1529_v31 = vadd.f32 %v15732_v29, %v16090_v61  ;;  %v16321_v42 = vsel %vm2130_vm8, %v2166_v44, %v2168_v9 }
 0x203   :  { %12969 = vmatmul.mubr.msk.f32.gmra.mrb[16].mxu1 %vm1653_vm7, %v16243_v38  ;;  %12746 = vmatprep.mubr.msk.f32.mxu0 %vm1653_vm7, %v15969_v12  ;;  %19266 = vst [vmem:[#allocation58_spill] sm:$0xff] %v16305_v40  ;;  %19267 = vst [vmem:[#allocation59_spill] sm:$0xff] %v16321_v42  ;;  %v16326_v48 = vmax.f32 %v1528_v19, 0.0  ;;  %v16335_v61 = vsel %vm2130_vm8, %v2168_v9, %v2170_v21  ;;  %v1530_v27 = vadd.f32 %v15732_v29, %v16059_v14 }
 0x204   :  { %12971 = vmatprep.mubr.msk.f32.mxu1 %vm1653_vm7, %v16251_v36  ;;  %19270 = vst [vmem:[#allocation37_spill] sm:$0xff] %v16335_v61  ;;  %v2174_v19 = vrot.slane %v16046_v18, 2  ;;  %v16346_v44 = vmax.f32 %v1529_v31, 0.0  ;;  %v16352_v9 = vrot.slane %v16036_v16, 2  ;;  %v18937_v31 = vrot.slane %v15754_v28, 3 }
 0x205   :  { %19268 = vst [vmem:[#allocation17_spill] sm:$0xff] %v16326_v48  ;;  %v16369_v14 = vmax.f32 %v1530_v27, 0.0  ;;  %v11078_v27 = vld [vmem:[%s18851_s3 + $0xa0] sm:$0xff] }
 0x206   :  { %12747 = vmatmul.mubr.msk.f32.gmra.mrb[162].mxu0 %vm1653_vm7, %v15964_v10  ;;  %19271 = vst [vmem:[#allocation60_spill] sm:$0xff] %v16346_v44  ;;  %v16362_v29 = vsel %vm2130_vm8, %v2172_v20, %v2174_v19 }
 0x207   :  { %12972 = vmatmul.mubr.msk.f32.gmra.mrb[18].mxu1 %vm1653_vm7, %v16259_v41  ;;  %12749 = vmatprep.mubr.msk.f32.mxu0 %vm1653_vm7, %v16027_v22  ;;  %19273 = vst [vmem:[#allocation38_spill] sm:$0xff] %v16362_v29  ;;  %19274 = vst [vmem:[#allocation61_spill] sm:$0xff] %v16369_v14 }
 0x208   :  { %12974 = vmatprep.mubr.msk.f32.mxu1 %vm1653_vm7, %v16267_v30 }
 0x20a   :  { %12750 = vmatmul.mubr.msk.f32.gmra.mrb[164].mxu0 %vm1653_vm7, %v16048_v54 }
 0x20b   :  { %12975 = vmatmul.mubr.msk.f32.gmra.mrb[20].mxu1 %vm1653_vm7, %v16275_v39  ;;  %12752 = vmatprep.mubr.msk.f32.mxu0 %vm1653_vm7, %v16046_v18 }
 0x20c   :  { %12977 = vmatprep.mubr.msk.f32.mxu1 %vm1653_vm7, %v16283_v15 }
 0x20e   :  { %12753 = vmatmul.mubr.msk.f32.gmra.mrb[166].mxu0 %vm1653_vm7, %v16036_v16 }
 0x20f   :  { %12978 = vmatmul.mubr.msk.f32.gmra.mrb[22].mxu1 %vm1653_vm7, %v16293_v43  ;;  %12759 = vmatprep.mubr.msk.f32.mxu0 %vm1653_vm7, %v2133_v50  ;;  %v19269_v50 = vrot.slane %v15754_v28, 2 }
 0x210   :  { %12980 = vmatprep.mubr.msk.f32.mxu1 %vm1653_vm7, %v16305_v40 }
 0x211   :  { %v2137_v52 = vsel %vm2130_vm8, %v2134_v3, %v19269_v50  ;;  %v16349_v3 = vsel %vm2130_vm8, %v2170_v21, %v2172_v20  ;;  %v16373_v21 = vsel %vm2130_vm8, %v2174_v19, %v16352_v9  ;;  %v2450_v50 = vrot.slane %v15806_v2, 3  ;;  %v11079_v19 = vld [vmem:[%s18851_s3 + $0xa8] sm:$0x3] }
 0x212   :  { %12760 = vmatmul.mubr.msk.f32.vlgmr.msra.gmra.mrb[144].mxu0 %vm1653_vm7, %v2135_v6  ;;  %19272 = vst [vmem:[#allocation18_spill] sm:$0xff] %v16349_v3  ;;  %19275 = vst [vmem:[#allocation19_spill] sm:$0xff] %v16373_v21  ;;  %v2448_v6 = vrot.slane %v15792_v62, 3 }
 0x213   :  { %12981 = vmatmul.mubr.msk.f32.gmra.mrb[24].mxu1 %vm1653_vm7, %v16321_v42  ;;  %12762 = vmatprep.mubr.msk.f32.mxu0 %vm1653_vm7, %v2137_v52 }
 0x214   :  { %12983 = vmatprep.mubr.msk.f32.mxu1 %vm1653_vm7, %v16335_v61  ;;  %14020 = vmatpush3.bf16.msk.msra.mxu0 %vm15549_vm5, %v16025_v7  ;;  %v3514_v7 = vrot.slane %v16326_v48, 2  ;;  %v16416_v52 = vsel %vm774_vm1, %v18937_v31, %v2448_v6  ;;  %v2454_v31 = vrot.slane %v15799_v8, 3 }
 0x215   :  { %14023 = vmatprep.subr.msk.bf16.mxu0 %vm15549_vm5, %v16324_v34 }
 0x216   :  { %12763 = vmatmul.mubr.msk.f32.gmra.mrb[146].mxu0 %vm1653_vm7, %v16144_v55  ;;  %v3516_v55 = vrot.slane %v16346_v44, 2  ;;  %v16382_v20 = vsel %vm2130_vm8, %v16352_v9, %v3514_v7 }
 0x217   :  { %12984 = vmatmul.mubr.msk.f32.gmra.mrb[26].mxu1 %vm1653_vm7, %v16349_v3  ;;  %12765 = vmatprep.mubr.msk.f32.mxu0 %vm1653_vm7, %v16163_v60  ;;  %19276 = vst [vmem:[#allocation39_spill] sm:$0xff] %v16382_v20  ;;  %v16389_v60 = vrot.slane %v16369_v14, 2 }
 0x218   :  { %12986 = vmatprep.mubr.msk.f32.mxu1 %vm1653_vm7, %v16362_v29  ;;  %v16392_v33 = vsel %vm2130_vm8, %v3514_v7, %v3516_v55  ;;  %v2452_v7 = vrot.slane %v15797_v0, 3 }
 0x219   :  { %19277 = vst [vmem:[#allocation20_spill] sm:$0xff] %v16389_v60  ;;  %19278 = vst [vmem:[#allocation40_spill] sm:$0xff] %v16392_v33 }
 0x21a   :  { %12766 = vmatmul.mubr.msk.f32.gmra.mrb[148].mxu0 %vm1653_vm7, %v16174_v53  ;;  %v16400_v53 = vsel %vm2130_vm8, %v3516_v55, %v16389_v60  ;;  %v16430_v55 = vsel %vm774_vm1, %v2448_v6, %v2450_v50  ;;  %v16451_v6 = vsel %vm774_vm1, %v2452_v7, %v2454_v31 }
 0x21b   :  { %12987 = vmatmul.mubr.msk.f32.gmra.mrb[28].mxu1 %vm1653_vm7, %v16373_v21  ;;  %12768 = vmatprep.mubr.msk.f32.mxu0 %vm1653_vm7, %v16198_v51  ;;  %19279 = vst [vmem:[#allocation62_spill] sm:$0xff] %v16400_v53 }
 0x21c   :  { %12989 = vmatprep.mubr.msk.f32.mxu1 %vm1653_vm7, %v16382_v20  ;;  %v2464_v20 = vrot.slane %v15897_v17, 3 }
 0x21e   :  { %12769 = vmatmul.mubr.msk.f32.gmra.mrb[150].mxu0 %vm1653_vm7, %v16214_v37 }
 0x21f   :  { %12990 = vmatmul.mubr.msk.f32.gmra.mrb[30].mxu1 %vm1653_vm7, %v16392_v33  ;;  %12771 = vmatprep.mubr.msk.f32.mxu0 %vm1653_vm7, %v16227_v23  ;;  %v2456_v33 = vrot.slane %v15843_v25, 3 }
 0x220   :  { %12992 = vmatprep.mubr.msk.f32.mxu1 %vm1653_vm7, %v16400_v53  ;;  %v16440_v53 = vsel %vm774_vm1, %v2450_v50, %v2452_v7  ;;  %v2462_v7 = vrot.slane %v15849_v58, 3 }
 0x221   :  { %v16462_v50 = vsel %vm774_vm1, %v2454_v31, %v2456_v33 }
 0x222   :  { %12772 = vmatmul.mubr.msk.f32.gmra.mrb[152].mxu0 %vm1653_vm7, %v16235_v63 }
 0x223   :  { %12993 = vmatmul.mubr.msk.f32.gmra.mrb[32].mxu1 %vm1653_vm7, %v16389_v60  ;;  %12774 = vmatprep.mubr.msk.f32.mxu0 %vm1653_vm7, %v16243_v38  ;;  %v16433_v60 = vpack.c.bf16 %v11079_v19, %v11078_v27  ;;  %v2458_v27 = vrot.slane %v15859_v4, 3  ;;  %v2482_v38 = vrot.slane %v16048_v54, 3 }
 0x224   :  { %12999 = vmatprep.mubr.msk.f32.mxu1 %vm1653_vm7, %v16416_v52 }
 0x225   :  { %v16470_v19 = vsel %vm774_vm1, %v2456_v33, %v2458_v27 }
 0x226   :  { %12775 = vmatmul.mubr.msk.f32.gmra.mrb[154].mxu0 %vm1653_vm7, %v16251_v36  ;;  %v10944_v36 = vld [vmem:[%s18851_s3 + $0x58] sm:$0x3] }
 0x227   :  { %13000 = vmatmul.mubr.msk.f32.vlgmr.msra.gmra.mrb[10].mxu1 %vm1653_vm7, %v16430_v55  ;;  %12777 = vmatprep.mubr.msk.f32.mxu0 %vm1653_vm7, %v16259_v41  ;;  %v2480_v41 = vrot.slane %v16027_v22, 3 }
 0x228   :  { %13002 = vmatprep.mubr.msk.f32.mxu1 %vm1653_vm7, %v16440_v53  ;;  %14056 = vmatpush3.bf16.msk.msra.mxu1 %vm15549_vm5, %v16166_v49  ;;  %v2460_v49 = vrot.slane %v15857_v46, 3 }
 0x229   :  { %14059 = vmatprep.subr.msk.bf16.mxu1 %vm15549_vm5, %v16433_v60 }
 0x22a   :  { %12778 = vmatmul.mubr.msk.f32.gmra.mrb[156].mxu0 %vm1653_vm7, %v16267_v30  ;;  %v16478_v31 = vsel %vm774_vm1, %v2458_v27, %v2460_v49  ;;  %v16486_v33 = vsel %vm774_vm1, %v2460_v49, %v2462_v7  ;;  %v16494_v27 = vsel %vm774_vm1, %v2462_v7, %v2464_v20  ;;  %v2468_v49 = vrot.slane %v15892_v45, 3 }
 0x22b   :  { %13003 = vmatmul.mubr.msk.f32.gmra.mrb[12].mxu1 %vm1653_vm7, %v16451_v6  ;;  %12780 = vmatprep.mubr.msk.f32.mxu0 %vm1653_vm7, %v16275_v39  ;;  %19280 = vst [vmem:[#allocation63_spill] sm:$0xff] %v16478_v31  ;;  %19281 = vst [vmem:[#allocation21_spill] sm:$0xff] %v16486_v33  ;;  %v2466_v39 = vrot.slane %v15911_v56, 3  ;;  %v2478_v30 = vrot.slane %v15964_v10, 3 }
 0x22c   :  { %13005 = vmatprep.mubr.msk.f32.mxu1 %vm1653_vm7, %v16462_v50  ;;  %19282 = vst [vmem:[#allocation41_spill] sm:$0xff] %v16494_v27 }
 0x22d   :  { %v16510_v7 = vsel %vm774_vm1, %v2466_v39, %v2468_v49  ;;  %v16572_v37 = vsel %vm774_vm1, %v2478_v30, %v2480_v41 }
 0x22e   :  { %12781 = vmatmul.mubr.msk.f32.gmra.mrb[158].mxu0 %vm1653_vm7, %v16283_v15  ;;  %v2470_v15 = vrot.slane %v15903_v11, 3  ;;  %19284 = vst [vmem:[#allocation22_spill] sm:$0xff] %v16510_v7  ;;  %19291 = vst [vmem:[#allocation44_spill] sm:$0xff] %v16572_v37 }
 0x22f   :  { %13006 = vmatmul.mubr.msk.f32.gmra.mrb[14].mxu1 %vm1653_vm7, %v16470_v19  ;;  %12783 = vmatprep.mubr.msk.f32.mxu0 %vm1653_vm7, %v16293_v43  ;;  %v16502_v43 = vsel %vm774_vm1, %v2464_v20, %v2466_v39 }
 0x230   :  { %13008 = vmatprep.mubr.msk.f32.mxu1 %vm1653_vm7, %v16478_v31  ;;  %19283 = vst [vmem:[#allocation64_spill] sm:$0xff] %v16502_v43  ;;  %v16518_v20 = vsel %vm774_vm1, %v2468_v49, %v2470_v15  ;;  %v2441_v49 = vrot.slane %v15751_v59, 3 }
 0x231   :  { %19285 = vst [vmem:[#allocation42_spill] sm:$0xff] %v16518_v20 }
 0x232   :  { %12784 = vmatmul.mubr.msk.f32.gmra.mrb[160].mxu0 %vm1653_vm7, %v16305_v40  ;;  %v2474_v40 = vrot.slane %v15971_v24, 3 }
 0x233   :  { %13009 = vmatmul.mubr.msk.f32.gmra.mrb[16].mxu1 %vm1653_vm7, %v16486_v33  ;;  %12786 = vmatprep.mubr.msk.f32.mxu0 %vm1653_vm7, %v16321_v42  ;;  %v2472_v42 = vrot.slane %v15952_v57, 3 }
 0x234   :  { %13011 = vmatprep.mubr.msk.f32.mxu1 %vm1653_vm7, %v16494_v27 }
 0x235   :  { %v16526_v39 = vsel %vm774_vm1, %v2470_v15, %v2472_v42 }
 0x236   :  { %12787 = vmatmul.mubr.msk.f32.gmra.mrb[162].mxu0 %vm1653_vm7, %v16335_v61  ;;  %19286 = vst [vmem:[#allocation65_spill] sm:$0xff] %v16526_v39  ;;  %v2442_v61 = vrot.slane %v15757_v26, 3 }
 0x237   :  { %13012 = vmatmul.mubr.msk.f32.gmra.mrb[18].mxu1 %vm1653_vm7, %v16502_v43  ;;  %12789 = vmatprep.mubr.msk.f32.mxu0 %vm1653_vm7, %v16349_v3  ;;  %v2476_v3 = vrot.slane %v15969_v12, 3 }
 0x238   :  { %13014 = vmatprep.mubr.msk.f32.mxu1 %vm1653_vm7, %v16510_v7  ;;  %v2443_v15 = vsel %vm774_vm1, %v2441_v49, %v2442_v61 }
 0x239   :  { %v16560_v49 = vsel %vm774_vm1, %v2476_v3, %v2478_v30  ;;  %v3745_v30 = vrot.slane %v16346_v44, 3 }
 0x23a   :  { %12790 = vmatmul.mubr.msk.f32.gmra.mrb[164].mxu0 %vm1653_vm7, %v16362_v29  ;;  %v16536_v29 = vsel %vm774_vm1, %v2472_v42, %v2474_v40  ;;  %v10943_v42 = vld [vmem:[%s18851_s3 + $0x50] sm:$0xff]  ;;  %19289 = vst [vmem:[#allocation24_spill] sm:$0xff] %v16560_v49 }
 0x23b   :  { %13015 = vmatmul.mubr.msk.f32.gmra.mrb[20].mxu1 %vm1653_vm7, %v16518_v20  ;;  %12792 = vmatprep.mubr.msk.f32.mxu0 %vm1653_vm7, %v16373_v21  ;;  %19287 = vst [vmem:[#allocation23_spill] sm:$0xff] %v16536_v29  ;;  %v16545_v21 = vsel %vm774_vm1, %v2474_v40, %v2476_v3  ;;  %v16563_v63 = vpack.c.bf16 %v10944_v36, %v10943_v42  ;;  %v2484_v36 = vrot.slane %v16046_v18, 3  ;;  %v16585_v3 = vrot.slane %v16036_v16, 3 }
 0x23c   :  { %13017 = vmatprep.mubr.msk.f32.mxu1 %vm1653_vm7, %v16526_v39  ;;  %19288 = vst [vmem:[#allocation43_spill] sm:$0xff] %v16545_v21  ;;  %v2758_v42 = vrot.slane %v15792_v62, 4 }
 0x23e   :  { %12793 = vmatmul.mubr.msk.f32.gmra.mrb[166].mxu0 %vm1653_vm7, %v16352_v9  ;;  %v2444_v9 = vrot.slane %v15748_v32, 3 }
 0x23f   :  { %13018 = vmatmul.mubr.msk.f32.gmra.mrb[22].mxu1 %vm1653_vm7, %v16536_v29  ;;  %12799 = vmatprep.mubr.msk.f32.mxu0 %vm1653_vm7, %v2443_v15  ;;  %v19290_v15 = vrot.slane %v15754_v28, 3 }
 0x240   :  { %13020 = vmatprep.mubr.msk.f32.mxu1 %vm1653_vm7, %v16545_v21  ;;  %v2445_v40 = vsel %vm774_vm1, %v2442_v61, %v2444_v9  ;;  %v16582_v61 = vsel %vm774_vm1, %v2480_v41, %v2482_v38  ;;  %v16604_v41 = vsel %vm774_vm1, %v2484_v36, %v16585_v3 }
 0x241   :  { %v2447_v23 = vsel %vm774_vm1, %v2444_v9, %v19290_v15  ;;  %19292 = vst [vmem:[#allocation72_spill] sm:$0xff] %v16582_v61  ;;  %19294 = vst [vmem:[#allocation74_spill] sm:$0xff] %v16604_v41  ;;  %v18976_v9 = vrot.slane %v15754_v28, 4 }
 0x242   :  { %12800 = vmatmul.mubr.msk.f32.vlgmr.msra.gmra.mrb[144].mxu0 %vm1653_vm7, %v2445_v40  ;;  %v2760_v40 = vrot.slane %v15806_v2, 4 }
 0x243   :  { %13021 = vmatmul.mubr.msk.f32.gmra.mrb[24].mxu1 %vm1653_vm7, %v16560_v49  ;;  %12802 = vmatprep.mubr.msk.f32.mxu0 %vm1653_vm7, %v2447_v23  ;;  %v16595_v23 = vsel %vm774_vm1, %v2482_v38, %v2484_v36  ;;  %v16647_v15 = vsel %vm773_vm0, %v18976_v9, %v2758_v42  ;;  %v11105_v36 = vld [vmem:[%s18851_s3 + $0xb0] sm:$0xff]  ;;  %v2764_v9 = vrot.slane %v15799_v8, 4 }
 0x244   :  { %13023 = vmatprep.mubr.msk.f32.mxu1 %vm1653_vm7, %v16572_v37  ;;  %14026 = vmatpush3.bf16.msk.msra.mxu0 %vm15549_vm5, %v16324_v34  ;;  %19293 = vst [vmem:[#allocation73_spill] sm:$0xff] %v16595_v23  ;;  %v3743_v34 = vrot.slane %v16326_v48, 3 }
 0x245   :  { %14029 = vmatprep.subr.msk.bf16.mxu0 %vm15549_vm5, %v16563_v63 }
 0x246   :  { %12803 = vmatmul.mubr.msk.f32.gmra.mrb[146].mxu0 %vm1653_vm7, %v16416_v52  ;;  %v16613_v38 = vsel %vm774_vm1, %v16585_v3, %v3743_v34  ;;  %v16620_v52 = vrot.slane %v16369_v14, 3 }
 0x247   :  { %13024 = vmatmul.mubr.msk.f32.gmra.mrb[26].mxu1 %vm1653_vm7, %v16582_v61  ;;  %12805 = vmatprep.mubr.msk.f32.mxu0 %vm1653_vm7, %v16430_v55  ;;  %19295 = vst [vmem:[#allocation75_spill] sm:$0xff] %v16613_v38  ;;  %v16623_v55 = vsel %vm774_vm1, %v3743_v34, %v3745_v30  ;;  %v11106_v34 = vld [vmem:[%s18851_s3 + $0xb8] sm:$0x3] }
 0x248   :  { %13026 = vmatprep.mubr.msk.f32.mxu1 %vm1653_vm7, %v16595_v23  ;;  %19296 = vst [vmem:[#allocation76_spill] sm:$0xff] %v16620_v52  ;;  %19297 = vst [vmem:[#allocation77_spill] sm:$0xff] %v16623_v55 }
 0x24a   :  { %12806 = vmatmul.mubr.msk.f32.gmra.mrb[148].mxu0 %vm1653_vm7, %v16440_v53  ;;  %v16631_v53 = vsel %vm774_vm1, %v3745_v30, %v16620_v52  ;;  %v2762_v30 = vrot.slane %v15797_v0, 4 }
 0x24b   :  { %13027 = vmatmul.mubr.msk.f32.gmra.mrb[28].mxu1 %vm1653_vm7, %v16604_v41  ;;  %12808 = vmatprep.mubr.msk.f32.mxu0 %vm1653_vm7, %v16451_v6  ;;  %19298 = vst [vmem:[#allocation78_spill] sm:$0xff] %v16631_v53  ;;  %v19520_v5 = vld [vmem:[#allocation73_spill] sm:$0xff] }
 0x24c   :  { %13029 = vmatprep.mubr.msk.f32.mxu1 %vm1653_vm7, %v16613_v38  ;;  %v2766_v38 = vrot.slane %v15843_v25, 4 }
 0x24e   :  { %12809 = vmatmul.mubr.msk.f32.gmra.mrb[150].mxu0 %vm1653_vm7, %v16462_v50 }
 0x24f   :  { %13030 = vmatmul.mubr.msk.f32.gmra.mrb[30].mxu1 %vm1653_vm7, %v16623_v55  ;;  %12811 = vmatprep.mubr.msk.f32.mxu0 %vm1653_vm7, %v16470_v19  ;;  %v16671_v55 = vsel %vm773_vm0, %v2760_v40, %v2762_v30 }
 0x250   :  { %13032 = vmatprep.mubr.msk.f32.mxu1 %vm1653_vm7, %v16631_v53  ;;  %v16664_v53 = vpack.c.bf16 %v11106_v34, %v11105_v36  ;;  %v2768_v36 = vrot.slane %v15859_v4, 4 }
 0x252   :  { %12812 = vmatmul.mubr.msk.f32.gmra.mrb[152].mxu0 %vm1653_vm7, %v16478_v31  ;;  %v16701_v34 = vsel %vm773_vm0, %v2766_v38, %v2768_v36 }
 0x253   :  { %13033 = vmatmul.mubr.msk.f32.gmra.mrb[32].mxu1 %vm1653_vm7, %v16620_v52  ;;  %12814 = vmatprep.mubr.msk.f32.mxu0 %vm1653_vm7, %v16486_v33  ;;  %v16661_v52 = vsel %vm773_vm0, %v2758_v42, %v2760_v40  ;;  %v16682_v42 = vsel %vm773_vm0, %v2762_v30, %v2764_v9  ;;  %v16693_v40 = vsel %vm773_vm0, %v2764_v9, %v2766_v38  ;;  %v2772_v30 = vrot.slane %v15849_v58, 4 }
 0x254   :  { %13039 = vmatprep.mubr.msk.f32.mxu1 %vm1653_vm7, %v16647_v15 }
 0x256   :  { %12815 = vmatmul.mubr.msk.f32.gmra.mrb[154].mxu0 %vm1653_vm7, %v16494_v27  ;;  %v2792_v27 = vrot.slane %v16048_v54, 4 }
 0x257   :  { %13040 = vmatmul.mubr.msk.f32.vlgmr.msra.gmra.mrb[10].mxu1 %vm1653_vm7, %v16661_v52  ;;  %12817 = vmatprep.mubr.msk.f32.mxu0 %vm1653_vm7, %v16502_v43  ;;  %v2788_v43 = vrot.slane %v15964_v10, 4 }
 0x258   :  { %13042 = vmatprep.mubr.msk.f32.mxu1 %vm1653_vm7, %v16671_v55  ;;  %14062 = vmatpush3.bf16.msk.msra.mxu1 %vm15549_vm5, %v16433_v60  ;;  %v2770_v60 = vrot.slane %v15857_v46, 4 }
 0x259   :  { %14065 = vmatprep.subr.msk.bf16.mxu1 %vm15549_vm5, %v16664_v53 }
 0x25a   :  { %12818 = vmatmul.mubr.msk.f32.gmra.mrb[156].mxu0 %vm1653_vm7, %v16510_v7  ;;  %v16709_v9 = vsel %vm773_vm0, %v2768_v36, %v2770_v60  ;;  %v16717_v38 = vsel %vm773_vm0, %v2770_v60, %v2772_v30  ;;  %v2776_v7 = vrot.slane %v15911_v56, 4  ;;  %v2778_v60 = vrot.slane %v15892_v45, 4 }
 0x25b   :  { %13043 = vmatmul.mubr.msk.f32.gmra.mrb[12].mxu1 %vm1653_vm7, %v16682_v42  ;;  %12820 = vmatprep.mubr.msk.f32.mxu0 %vm1653_vm7, %v16518_v20  ;;  %v2774_v20 = vrot.slane %v15897_v17, 4 }
 0x25c   :  { %13045 = vmatprep.mubr.msk.f32.mxu1 %vm1653_vm7, %v16693_v40 }
 0x25d   :  { %v16725_v36 = vsel %vm773_vm0, %v2772_v30, %v2774_v20  ;;  %v16741_v30 = vsel %vm773_vm0, %v2776_v7, %v2778_v60 }
 0x25e   :  { %12821 = vmatmul.mubr.msk.f32.gmra.mrb[158].mxu0 %vm1653_vm7, %v16526_v39  ;;  %v2780_v39 = vrot.slane %v15903_v11, 4 }
 0x25f   :  { %13046 = vmatmul.mubr.msk.f32.gmra.mrb[14].mxu1 %vm1653_vm7, %v16701_v34  ;;  %12823 = vmatprep.mubr.msk.f32.mxu0 %vm1653_vm7, %v16536_v29  ;;  %v16733_v29 = vsel %vm773_vm0, %v2774_v20, %v2776_v7 }
 0x260   :  { %13048 = vmatprep.mubr.msk.f32.mxu1 %vm1653_vm7, %v16709_v9  ;;  %v16749_v20 = vsel %vm773_vm0, %v2778_v60, %v2780_v39  ;;  %v2751_v60 = vrot.slane %v15751_v59, 4  ;;  %v2790_v59 = vrot.slane %v16027_v22, 4 }
 0x262   :  { %12824 = vmatmul.mubr.msk.f32.gmra.mrb[160].mxu0 %vm1653_vm7, %v16545_v21  ;;  %v2784_v21 = vrot.slane %v15971_v24, 4 }
 0x263   :  { %13049 = vmatmul.mubr.msk.f32.gmra.mrb[16].mxu1 %vm1653_vm7, %v16717_v38  ;;  %12826 = vmatprep.mubr.msk.f32.mxu0 %vm1653_vm7, %v16560_v49  ;;  %v2782_v49 = vrot.slane %v15952_v57, 4 }
 0x264   :  { %13051 = vmatprep.mubr.msk.f32.mxu1 %vm1653_vm7, %v16725_v36 }
 0x265   :  { %v16757_v7 = vsel %vm773_vm0, %v2780_v39, %v2782_v49 }
 0x266   :  { %12827 = vmatmul.mubr.msk.f32.gmra.mrb[162].mxu0 %vm1653_vm7, %v16572_v37  ;;  %v2752_v37 = vrot.slane %v15757_v26, 4 }
 0x267   :  { %13052 = vmatmul.mubr.msk.f32.gmra.mrb[18].mxu1 %vm1653_vm7, %v16733_v29  ;;  %12829 = vmatprep.mubr.msk.f32.mxu0 %vm1653_vm7, %v16582_v61  ;;  %v2786_v61 = vrot.slane %v15969_v12, 4 }
 0x268   :  { %13054 = vmatprep.mubr.msk.f32.mxu1 %vm1653_vm7, %v16741_v30  ;;  %v2753_v26 = vsel %vm773_vm0, %v2751_v60, %v2752_v37 }
 0x269   :  { %v16776_v39 = vsel %vm773_vm0, %v2784_v21, %v2786_v61  ;;  %v16791_v60 = vsel %vm773_vm0, %v2786_v61, %v2788_v43  ;;  %v16813_v61 = vsel %vm773_vm0, %v2790_v59, %v2792_v27 }
 0x26a   :  { %12830 = vmatmul.mubr.msk.f32.gmra.mrb[164].mxu0 %vm1653_vm7, %v16595_v23  ;;  %v16767_v23 = vsel %vm773_vm0, %v2782_v49, %v2784_v21  ;;  %v10970_v49 = vld [vmem:[%s18851_s3 + $0x60] sm:$0xff] }
 0x26b   :  { %13055 = vmatmul.mubr.msk.f32.gmra.mrb[20].mxu1 %vm1653_vm7, %v16749_v20  ;;  %12832 = vmatprep.mubr.msk.f32.mxu0 %vm1653_vm7, %v16604_v41  ;;  %v10971_v41 = vld [vmem:[%s18851_s3 + $0x68] sm:$0x3] }
 0x26c   :  { %13057 = vmatprep.mubr.msk.f32.mxu1 %vm1653_vm7, %v16757_v7  ;;  %v16794_v33 = vpack.c.bf16 %v10971_v41, %v10970_v49  ;;  %v2796_v41 = vrot.slane %v16036_v16, 4  ;;  %v11132_v49 = vld [vmem:[%s18851_s3 + $0xc0] sm:$0xff] }
 0x26e   :  { %12833 = vmatmul.mubr.msk.f32.gmra.mrb[166].mxu0 %vm1653_vm7, %v16585_v3  ;;  %v2754_v3 = vrot.slane %v15748_v32, 4  ;;  %v16803_v32 = vsel %vm773_vm0, %v2788_v43, %v2790_v59  ;;  %v3974_v59 = vrot.slane %v16346_v44, 4 }
 0x26f   :  { %13058 = vmatmul.mubr.msk.f32.gmra.mrb[22].mxu1 %vm1653_vm7, %v16767_v23  ;;  %12839 = vmatprep.mubr.msk.f32.mxu0 %vm1653_vm7, %v2753_v26  ;;  %v19299_v26 = vrot.slane %v15754_v28, 4 }
 0x270   :  { %13060 = vmatprep.mubr.msk.f32.mxu1 %vm1653_vm7, %v16776_v39  ;;  %v2755_v21 = vsel %vm773_vm0, %v2752_v37, %v2754_v3  ;;  %v2794_v37 = vrot.slane %v16046_v18, 4 }
 0x271   :  { %v2757_v31 = vsel %vm773_vm0, %v2754_v3, %v19299_v26  ;;  %v11133_v3 = vld [vmem:[%s18851_s3 + $0xc8] sm:$0x3] }
 0x272   :  { %12840 = vmatmul.mubr.msk.f32.vlgmr.msra.gmra.mrb[144].mxu0 %vm1653_vm7, %v2755_v21  ;;  %v16824_v43 = vsel %vm773_vm0, %v2792_v27, %v2794_v37  ;;  %v16878_v21 = vpack.c.bf16 %v11133_v3, %v11132_v49  ;;  %v19307_v49 = vld [vmem:[#allocation71_spill] sm:$0xff]  ;;  %v19308_v3 = vld [vmem:[#allocation46_spill] sm:$0xff] }
 0x273   :  { %13061 = vmatmul.mubr.msk.f32.gmra.mrb[24].mxu1 %vm1653_vm7, %v16791_v60  ;;  %12842 = vmatprep.mubr.msk.f32.mxu0 %vm1653_vm7, %v2757_v31  ;;  %v16832_v31 = vsel %vm773_vm0, %v2794_v37, %v2796_v41  ;;  %v19303_v37 = vld [vmem:[#allocation69_spill] sm:$0xff] }
 0x274   :  { %13063 = vmatprep.mubr.msk.f32.mxu1 %vm1653_vm7, %v16803_v32  ;;  %14032 = vmatpush3.bf16.msk.msra.mxu0 %vm15549_vm5, %v16563_v63  ;;  %v3972_v63 = vrot.slane %v16326_v48, 4 }
 0x275   :  { %14035 = vmatprep.subr.msk.bf16.mxu0 %vm15549_vm5, %v16794_v33 }
 0x276   :  { %12843 = vmatmul.mubr.msk.f32.gmra.mrb[146].mxu0 %vm1653_vm7, %v16647_v15  ;;  %v16840_v27 = vsel %vm773_vm0, %v2796_v41, %v3972_v63  ;;  %v16850_v15 = vsel %vm773_vm0, %v3972_v63, %v3974_v59 }
 0x277   :  { %13064 = vmatmul.mubr.msk.f32.gmra.mrb[26].mxu1 %vm1653_vm7, %v16813_v61  ;;  %12845 = vmatprep.mubr.msk.f32.mxu0 %vm1653_vm7, %v16661_v52  ;;  %v16847_v52 = vrot.slane %v16369_v14, 4 }
 0x278   :  { %13066 = vmatprep.mubr.msk.f32.mxu1 %vm1653_vm7, %v16824_v43 }
 0x27a   :  { %12846 = vmatmul.mubr.msk.f32.gmra.mrb[148].mxu0 %vm1653_vm7, %v16671_v55  ;;  %v16858_v55 = vsel %vm773_vm0, %v3974_v59, %v16847_v52 }
 0x27b   :  { %13067 = vmatmul.mubr.msk.f32.gmra.mrb[28].mxu1 %vm1653_vm7, %v16832_v31  ;;  %12848 = vmatprep.mubr.msk.f32.mxu0 %vm1653_vm7, %v16682_v42 }
 0x27c   :  { %13069 = vmatprep.mubr.msk.f32.mxu1 %vm1653_vm7, %v16840_v27 }
 0x27e   :  { %12849 = vmatmul.mubr.msk.f32.gmra.mrb[150].mxu0 %vm1653_vm7, %v16693_v40 }
 0x27f   :  { %13070 = vmatmul.mubr.msk.f32.gmra.mrb[30].mxu1 %vm1653_vm7, %v16850_v15  ;;  %12851 = vmatprep.mubr.msk.f32.mxu0 %vm1653_vm7, %v16701_v34 }
 0x280   :  { %13072 = vmatprep.mubr.msk.f32.mxu1 %vm1653_vm7, %v16858_v55 }
 0x282   :  { %12852 = vmatmul.mubr.msk.f32.gmra.mrb[152].mxu0 %vm1653_vm7, %v16709_v9 }
 0x283   :  { %13073 = vmatmul.mubr.msk.f32.gmra.mrb[32].mxu1 %vm1653_vm7, %v16847_v52  ;;  %12854 = vmatprep.mubr.msk.f32.mxu0 %vm1653_vm7, %v16717_v38 }
 0x284   :  { %13079 = vmatprep.mubr.msk.f32.mxu1 %vm1653_vm7, %v15797_v0 }
 0x286   :  { %12855 = vmatmul.mubr.msk.f32.gmra.mrb[154].mxu0 %vm1653_vm7, %v16725_v36 }
 0x287   :  { %13080 = vmatmul.mubr.msk.f32.vlgmr.msra.gmra.mrb[10].mxu1 %vm1653_vm7, %v15799_v8  ;;  %12857 = vmatprep.mubr.msk.f32.mxu0 %vm1653_vm7, %v16733_v29 }
 0x288   :  { %13082 = vmatprep.mubr.msk.f32.mxu1 %vm1653_vm7, %v15843_v25  ;;  %14068 = vmatpush3.bf16.msk.msra.mxu1 %vm15549_vm5, %v16664_v53 }
 0x289   :  { %14071 = vmatprep.subr.msk.bf16.mxu1 %vm15549_vm5, %v16878_v21 }
 0x28a   :  { %12858 = vmatmul.mubr.msk.f32.gmra.mrb[156].mxu0 %vm1653_vm7, %v16741_v30 }
 0x28b   :  { %13083 = vmatmul.mubr.msk.f32.gmra.mrb[12].mxu1 %vm1653_vm7, %v15859_v4  ;;  %12860 = vmatprep.mubr.msk.f32.mxu0 %vm1653_vm7, %v16749_v20 }
 0x28c   :  { %13085 = vmatprep.mubr.msk.f32.mxu1 %vm1653_vm7, %v15857_v46 }
 0x28e   :  { %12861 = vmatmul.mubr.msk.f32.gmra.mrb[158].mxu0 %vm1653_vm7, %v16757_v7 }
 0x28f   :  { %13086 = vmatmul.mubr.msk.f32.gmra.mrb[14].mxu1 %vm1653_vm7, %v15849_v58  ;;  %12863 = vmatprep.mubr.msk.f32.mxu0 %vm1653_vm7, %v16767_v23 }
 0x290   :  { %13088 = vmatprep.mubr.msk.f32.mxu1 %vm1653_vm7, %v15897_v17 }
 0x292   :  { %12864 = vmatmul.mubr.msk.f32.gmra.mrb[160].mxu0 %vm1653_vm7, %v16776_v39 }
 0x293   :  { %13089 = vmatmul.mubr.msk.f32.gmra.mrb[16].mxu1 %vm1653_vm7, %v15911_v56  ;;  %12866 = vmatprep.mubr.msk.f32.mxu0 %vm1653_vm7, %v16791_v60 }
 0x294   :  { %13091 = vmatprep.mubr.msk.f32.mxu1 %vm1653_vm7, %v15892_v45 }
 0x296   :  { %12867 = vmatmul.mubr.msk.f32.gmra.mrb[162].mxu0 %vm1653_vm7, %v16803_v32 }
 0x297   :  { %13092 = vmatmul.mubr.msk.f32.gmra.mrb[18].mxu1 %vm1653_vm7, %v15903_v11  ;;  %12869 = vmatprep.mubr.msk.f32.mxu0 %vm1653_vm7, %v16813_v61 }
 0x298   :  { %13094 = vmatprep.mubr.msk.f32.mxu1 %vm1653_vm7, %v15952_v57 }
 0x29a   :  { %12870 = vmatmul.mubr.msk.f32.gmra.mrb[164].mxu0 %vm1653_vm7, %v16824_v43 }
 0x29b   :  { %13095 = vmatmul.mubr.msk.f32.gmra.mrb[20].mxu1 %vm1653_vm7, %v15971_v24  ;;  %12872 = vmatprep.mubr.msk.f32.mxu0 %vm1653_vm7, %v16832_v31 }
 0x29c   :  { %13097 = vmatprep.mubr.msk.f32.mxu1 %vm1653_vm7, %v15969_v12 }
 0x29e   :  { %12873 = vmatmul.mubr.msk.f32.gmra.mrb[166].mxu0 %vm1653_vm7, %v2796_v41  ;;  %v19304_v41 = vld [vmem:[#allocation70_spill] sm:$0xff] }
 0x29f   :  { %13098 = vmatmul.mubr.msk.f32.gmra.mrb[22].mxu1 %vm1653_vm7, %v15964_v10  ;;  %12879 = vmatprep.mubr.msk.f32.mxu0 %vm1653_vm7, %v15754_v28  ;;  %v16963_v28 = vld [vmem:[%s18850_s2] ss:$0 sm:$0xff] }
 0x2a0   :  { %13100 = vmatprep.mubr.msk.f32.mxu1 %vm1653_vm7, %v16027_v22  ;;  %19300 = vst [vmem:[#allocation79_spill] sm:$0xff] %v16963_v28 }
 0x2a2   :  { %12880 = vmatmul.mubr.msk.f32.vlgmr.msra.gmra.mrb[144].mxu0 %vm1653_vm7, %v15792_v62  ;;  %v1531_v62 = vadd.f32 %v16963_v28, %v16078_v35 }
 0x2a3   :  { %13101 = vmatmul.mubr.msk.f32.gmra.mrb[24].mxu1 %vm1653_vm7, %v16048_v54  ;;  %12882 = vmatprep.mubr.msk.f32.mxu0 %vm1653_vm7, %v15806_v2  ;;  %v1533_v2 = vadd.f32 %v16963_v28, %v16155_v1  ;;  %v11160_v1 = vld [vmem:[%s18851_s3 + $0xd8] sm:$0x3] }
 0x2a4   :  { %13103 = vmatprep.mubr.msk.f32.mxu1 %vm1653_vm7, %v16046_v18  ;;  %14038 = vmatpush3.bf16.msk.msra.mxu0 %vm15549_vm5, %v16794_v33 }
 0x2a6   :  { %12883 = vmatmul.mubr.msk.f32.gmra.mrb[146].mxu0 %vm1653_vm7, %v15797_v0  ;;  %v1532_v0 = vadd.f32 %v16963_v28, %v16128_v13  ;;  %v11159_v13 = vld [vmem:[%s18851_s3 + $0xd0] sm:$0xff] }
 0x2a7   :  { %13104 = vmatmul.mubr.msk.f32.gmra.mrb[26].mxu1 %vm1653_vm7, %v16036_v16  ;;  %12885 = vmatprep.mubr.msk.f32.mxu0 %vm1653_vm7, %v15799_v8  ;;  %v16977_v8 = vmax.f32 %v1531_v62, 0.0  ;;  %v17009_v53 = vpack.c.bf16 %v11160_v1, %v11159_v13  ;;  %v19325_v28 = vld [vmem:[#allocation30_spill] sm:$0xff] }
 0x2a8   :  { %13106 = vmatprep.mubr.msk.f32.mxu1 %vm1653_vm7, %v16326_v48  ;;  %v16981_v35 = vmax.f32 %v1532_v0, 0.0  ;;  %v19311_v0 = vld [vmem:[#allocation47_spill] sm:$0xff] }
 0x2aa   :  { %12886 = vmatmul.mubr.msk.f32.gmra.mrb[148].mxu0 %vm1653_vm7, %v15843_v25  ;;  %v16991_v25 = vmax.f32 %v1533_v2, 0.0  ;;  %v19312_v2 = vld [vmem:[#allocation25_spill] sm:$0xff] }
 0x2ab   :  { %13107 = vmatmul.mubr.msk.f32.gmra.mrb[28].mxu1 %vm1653_vm7, %v16346_v44  ;;  %12888 = vmatprep.mubr.msk.f32.mxu0 %vm1653_vm7, %v15859_v4 }
 0x2ac   :  { %13109 = vmatprep.mubr.msk.f32.mxu1 %vm1653_vm7, %v16369_v14 }
 0x2ae   :  { %12889 = vmatmul.mubr.msk.f32.gmra.mrb[150].mxu0 %vm1653_vm7, %v15857_v46 }
 0x2af   :  { %13110 = vmatmul.mubr.msk.f32.gmra.mrb[30].mxu1 %vm1653_vm7, %v16977_v8  ;;  %12891 = vmatprep.mubr.msk.f32.mxu0 %vm1653_vm7, %v15849_v58 }
 0x2b0   :  { %13112 = vmatprep.mubr.msk.f32.mxu1 %vm1653_vm7, %v16981_v35 }
 0x2b2   :  { %12892 = vmatmul.mubr.msk.f32.gmra.mrb[152].mxu0 %vm1653_vm7, %v15897_v17 }
 0x2b3   :  { %13113 = vmatmul.mubr.msk.f32.gmra.mrb[32].mxu1 %vm1653_vm7, %v16991_v25  ;;  %12894 = vmatprep.mubr.msk.f32.mxu0 %vm1653_vm7, %v15911_v56 }
 0x2b4   :  { %13119 = vmatprep.mubr.msk.f32.mxu1 %vm1653_vm7, %v15855_v47 }
 0x2b5   :  { %v17007_v33 = vpop.f32.mrb[0].mxu1 }
 0x2b6   :  { %19301 = vst [vmem:[#allocation80_spill] sm:$0xff] %v17007_v33  ;;  %v17011_v26 = vpop.f32.mrb[1].mxu1  ;;  %12895 = vmatmul.mubr.msk.f32.gmra.mrb[154].mxu0 %vm1653_vm7, %v15892_v45  ;;  %v19324_v33 = vld [vmem:[#allocation66_spill] sm:$0xff] }
 0x2b7   :  { %19302 = vst [vmem:[#allocation81_spill] sm:$0xff] %v17011_v26  ;;  %13120 = vmatmul.mubr.msk.f32.vlgmr.msra.gmra.mrb[10].mxu1 %vm1653_vm7, %v19303_v37  ;;  %12897 = vmatprep.mubr.msk.f32.mxu0 %vm1653_vm7, %v15903_v11  ;;  %v19321_v26 = vld [vmem:[#allocation28_spill] sm:$0xff] }
 0x2b8   :  { %13122 = vmatprep.mubr.msk.f32.mxu1 %vm1653_vm7, %v19304_v41  ;;  %14074 = vmatpush3.bf16.msk.msra.mxu1 %vm15549_vm5, %v16878_v21 }
 0x2b9   :  { %v17024_v63 = vpop.f32.mrb[2].mxu1  ;;  %14077 = vmatprep.subr.msk.bf16.mxu1 %vm15549_vm5, %v17009_v53 }
 0x2ba   :  { %19305 = vst [vmem:[#allocation69_spill] sm:$0xff] %v17024_v63  ;;  %v17029_v59 = vpop.f32.mrb[3].mxu1  ;;  %12898 = vmatmul.mubr.msk.f32.gmra.mrb[156].mxu0 %vm1653_vm7, %v15952_v57 }
 0x2bb   :  { %19306 = vst [vmem:[#allocation70_spill] sm:$0xff] %v17029_v59  ;;  %13123 = vmatmul.mubr.msk.f32.gmra.mrb[12].mxu1 %vm1653_vm7, %v19307_v49  ;;  %12900 = vmatprep.mubr.msk.f32.mxu0 %vm1653_vm7, %v15971_v24 }
 0x2bc   :  { %13125 = vmatprep.mubr.msk.f32.mxu1 %vm1653_vm7, %v19308_v3 }
 0x2bd   :  { %v17039_v21 = vpop.f32.mrb[4].mxu1 }
 0x2be   :  { %19309 = vst [vmem:[#allocation71_spill] sm:$0xff] %v17039_v21  ;;  %v17041_v62 = vpop.f32.mrb[5].mxu1  ;;  %12901 = vmatmul.mubr.msk.f32.gmra.mrb[158].mxu0 %vm1653_vm7, %v15969_v12  ;;  %v19316_v21 = vld [vmem:[#allocation5_spill] sm:$0xff]  ;;  %v19329_v12 = vld [vmem:[#allocation11_spill] sm:$0xff] }
 0x2bf   :  { %19310 = vst [vmem:[#allocation46_spill] sm:$0xff] %v17041_v62  ;;  %13126 = vmatmul.mubr.msk.f32.gmra.mrb[14].mxu1 %vm1653_vm7, %v19311_v0  ;;  %12903 = vmatprep.mubr.msk.f32.mxu0 %vm1653_vm7, %v15964_v10  ;;  %v19315_v62 = vld [vmem:[#allocation48_spill] sm:$0xff] }
 0x2c0   :  { %13128 = vmatprep.mubr.msk.f32.mxu1 %vm1653_vm7, %v19312_v2  ;;  %v19328_v10 = vld [vmem:[#allocation68_spill] sm:$0xff] }
 0x2c2   :  { %v17051_v13 = vpop.f32.mrb[6].mxu1  ;;  %12904 = vmatmul.mubr.msk.f32.gmra.mrb[160].mxu0 %vm1653_vm7, %v16027_v22  ;;  %v3287_v22 = vrot.slane %v16346_v44, 1 }
 0x2c3   :  { %19313 = vst [vmem:[#allocation47_spill] sm:$0xff] %v17051_v13  ;;  %v17053_v1 = vpop.f32.mrb[7].mxu1  ;;  %13129 = vmatmul.mubr.msk.f32.gmra.mrb[16].mxu1 %vm1653_vm7, %v19315_v62  ;;  %12906 = vmatprep.mubr.msk.f32.mxu0 %vm1653_vm7, %v16048_v54  ;;  %v19320_v13 = vld [vmem:[#allocation27_spill] sm:$0xff]  ;;  %v19327_v54 = vld [vmem:[#allocation53_spill] sm:$0xff] }
 0x2c4   :  { %19314 = vst [vmem:[#allocation25_spill] sm:$0xff] %v17053_v1  ;;  %13131 = vmatprep.mubr.msk.f32.mxu1 %vm1653_vm7, %v19316_v21  ;;  %v19319_v1 = vld [vmem:[#allocation7_spill] sm:$0xff] }
 0x2c6   :  { %v17063_v59 = vpop.f32.mrb[8].mxu1  ;;  %12907 = vmatmul.mubr.msk.f32.gmra.mrb[162].mxu0 %vm1653_vm7, %v16046_v18  ;;  %v19326_v18 = vld [vmem:[#allocation67_spill] sm:$0xff] }
 0x2c7   :  { %19317 = vst [vmem:[#allocation48_spill] sm:$0xff] %v17063_v59  ;;  %v17065_v63 = vpop.f32.mrb[9].mxu1  ;;  %13132 = vmatmul.mubr.msk.f32.gmra.mrb[18].mxu1 %vm1653_vm7, %v19319_v1  ;;  %12909 = vmatprep.mubr.msk.f32.mxu0 %vm1653_vm7, %v16036_v16  ;;  %v19323_v59 = vld [vmem:[#allocation52_spill] sm:$0xff]  ;;  %v3285_v16 = vrot.slane %v16326_v48, 1 }
 0x2c8   :  { %19318 = vst [vmem:[#allocation5_spill] sm:$0xff] %v17065_v63  ;;  %13134 = vmatprep.mubr.msk.f32.mxu1 %vm1653_vm7, %v19320_v13  ;;  %v19322_v63 = vld [vmem:[#allocation51_spill] sm:$0xff] }
 0x2ca   :  { %12910 = vmatmul.mubr.msk.f32.gmra.mrb[164].mxu0 %vm1653_vm7, %v16326_v48 }
 0x2cb   :  { %13135 = vmatmul.mubr.msk.f32.gmra.mrb[20].mxu1 %vm1653_vm7, %v19321_v26  ;;  %12912 = vmatprep.mubr.msk.f32.mxu0 %vm1653_vm7, %v16346_v44  ;;  %v4425_v44 = vrot.slane %v16977_v8, 1 }
 0x2cc   :  { %13137 = vmatprep.mubr.msk.f32.mxu1 %vm1653_vm7, %v19322_v63 }
 0x2ce   :  { %12913 = vmatmul.mubr.msk.f32.gmra.mrb[166].mxu0 %vm1653_vm7, %v16369_v14 }
 0x2cf   :  { %13138 = vmatmul.mubr.msk.f32.gmra.mrb[22].mxu1 %vm1653_vm7, %v19323_v59  ;;  %12919 = vmatprep.mubr.msk.f32.mxu0 %vm1653_vm7, %v19324_v33  ;;  %v19330_v33 = vld [vmem:[#allocation10_spill] sm:$0xff] }
 0x2d0   :  { %13140 = vmatprep.mubr.msk.f32.mxu1 %vm1653_vm7, %v19325_v28  ;;  %v17103_v24 = vsel %vm1605_vm6, %v19330_v33, %v3285_v16 }
 0x2d1   :  { %19331 = vst [vmem:[#allocation7_spill] sm:$0xff] %v17103_v24 }
 0x2d2   :  { %12920 = vmatmul.mubr.msk.f32.vlgmr.msra.gmra.mrb[144].mxu0 %vm1653_vm7, %v19326_v18  ;;  %v17110_v18 = vsel %vm1605_vm6, %v3285_v16, %v3287_v22 }
 0x2d3   :  { %13141 = vmatmul.mubr.msk.f32.gmra.mrb[24].mxu1 %vm1653_vm7, %v19327_v54  ;;  %12922 = vmatprep.mubr.msk.f32.mxu0 %vm1653_vm7, %v19328_v10  ;;  %19332 = vst [vmem:[#allocation27_spill] sm:$0xff] %v17110_v18  ;;  %v3289_v10 = vrot.slane %v16369_v14, 1 }
 0x2d4   :  { %13143 = vmatprep.mubr.msk.f32.mxu1 %vm1653_vm7, %v19329_v12 }
 0x2d5   :  { %v17119_v33 = vsel %vm1605_vm6, %v3287_v22, %v3289_v10  ;;  %v17127_v16 = vsel %vm1605_vm6, %v3289_v10, %v4425_v44 }
 0x2d6   :  { %12923 = vmatmul.mubr.msk.f32.gmra.mrb[146].mxu0 %vm1653_vm7, %v15855_v47  ;;  %19333 = vst [vmem:[#allocation28_spill] sm:$0xff] %v17119_v33  ;;  %v4427_v47 = vrot.slane %v16981_v35, 1  ;;  %19334 = vst [vmem:[#allocation51_spill] sm:$0xff] %v17127_v16 }
 0x2d7   :  { %13144 = vmatmul.mubr.msk.f32.gmra.mrb[26].mxu1 %vm1653_vm7, %v17103_v24  ;;  %12925 = vmatprep.mubr.msk.f32.mxu0 %vm1653_vm7, %v19303_v37  ;;  %v17130_v37 = vrot.slane %v16991_v25, 1 }
 0x2d8   :  { %13146 = vmatprep.mubr.msk.f32.mxu1 %vm1653_vm7, %v17110_v18  ;;  %v17137_v22 = vsel %vm1605_vm6, %v4425_v44, %v4427_v47  ;;  %v11186_v44 = vld [vmem:[%s18851_s3 + $0xe0] sm:$0xff] }
 0x2d9   :  { %19335 = vst [vmem:[#allocation52_spill] sm:$0xff] %v17130_v37  ;;  %19336 = vst [vmem:[#allocation66_spill] sm:$0xff] %v17137_v22 }
 0x2da   :  { %12926 = vmatmul.mubr.msk.f32.gmra.mrb[148].mxu0 %vm1653_vm7, %v19304_v41  ;;  %v17145_v41 = vsel %vm1605_vm6, %v4427_v47, %v17130_v37  ;;  %v11187_v47 = vld [vmem:[%s18851_s3 + $0xe8] sm:$0x3] }
 0x2db   :  { %13147 = vmatmul.mubr.msk.f32.gmra.mrb[28].mxu1 %vm1653_vm7, %v17119_v33  ;;  %12928 = vmatprep.mubr.msk.f32.mxu0 %vm1653_vm7, %v19307_v49  ;;  %19337 = vst [vmem:[#allocation67_spill] sm:$0xff] %v17145_v41 }
 0x2dc   :  { %13149 = vmatprep.mubr.msk.f32.mxu1 %vm1653_vm7, %v17127_v16  ;;  %v4654_v16 = vrot.slane %v16977_v8, 2 }
 0x2de   :  { %12929 = vmatmul.mubr.msk.f32.gmra.mrb[150].mxu0 %vm1653_vm7, %v19308_v3 }
 0x2df   :  { %13150 = vmatmul.mubr.msk.f32.gmra.mrb[30].mxu1 %vm1653_vm7, %v17137_v22  ;;  %12931 = vmatprep.mubr.msk.f32.mxu0 %vm1653_vm7, %v19311_v0  ;;  %v19338_v22 = vld [vmem:[#allocation55_spill] sm:$0xff] }
 0x2e0   :  { %13152 = vmatprep.mubr.msk.f32.mxu1 %vm1653_vm7, %v17145_v41  ;;  %v14081_v41 = vpack.c.bf16 %v11187_v47, %v11186_v44  ;;  %v19344_v44 = vld [vmem:[#allocation15_spill] sm:$0xff] }
 0x2e1   :  { %v19345_v47 = vld [vmem:[#allocation35_spill] sm:$0xff] }
 0x2e2   :  { %12932 = vmatmul.mubr.msk.f32.gmra.mrb[152].mxu0 %vm1653_vm7, %v19312_v2 }
 0x2e3   :  { %13153 = vmatmul.mubr.msk.f32.gmra.mrb[32].mxu1 %vm1653_vm7, %v17130_v37  ;;  %12934 = vmatprep.mubr.msk.f32.mxu0 %vm1653_vm7, %v19315_v62  ;;  %v19339_v37 = vld [vmem:[#allocation33_spill] sm:$0xff] }
 0x2e4   :  { %13159 = vmatprep.mubr.msk.f32.mxu1 %vm1653_vm7, %v16198_v51  ;;  %v19340_v51 = vld [vmem:[#allocation56_spill] sm:$0xff] }
 0x2e6   :  { %12935 = vmatmul.mubr.msk.f32.gmra.mrb[154].mxu0 %vm1653_vm7, %v19316_v21 }
 0x2e7   :  { %13160 = vmatmul.mubr.msk.f32.vlgmr.msra.gmra.mrb[10].mxu1 %vm1653_vm7, %v19338_v22  ;;  %12937 = vmatprep.mubr.msk.f32.mxu0 %vm1653_vm7, %v19319_v1  ;;  %v19341_v22 = vld [vmem:[#allocation14_spill] sm:$0xff] }
 0x2e8   :  { %13162 = vmatprep.mubr.msk.f32.mxu1 %vm1653_vm7, %v19339_v37  ;;  %14080 = vmatpush3.bf16.msk.msra.mxu1 %vm15549_vm5, %v17009_v53  ;;  %v19342_v37 = vld [vmem:[#allocation34_spill] sm:$0xff]  ;;  %v19343_v53 = vld [vmem:[#allocation57_spill] sm:$0xff] }
 0x2e9   :  { %14083 = vmatprep.subr.msk.bf16.mxu1 %vm15549_vm5, %v14081_v41 }
 0x2ea   :  { %12938 = vmatmul.mubr.msk.f32.gmra.mrb[156].mxu0 %vm1653_vm7, %v19320_v13 }
 0x2eb   :  { %13163 = vmatmul.mubr.msk.f32.gmra.mrb[12].mxu1 %vm1653_vm7, %v19340_v51  ;;  %12940 = vmatprep.mubr.msk.f32.mxu0 %vm1653_vm7, %v19321_v26  ;;  %v19353_v51 = vld [vmem:[#allocation19_spill] sm:$0xff] }
 0x2ec   :  { %13165 = vmatprep.mubr.msk.f32.mxu1 %vm1653_vm7, %v19341_v22  ;;  %v19351_v22 = vld [vmem:[#allocation18_spill] sm:$0xff] }
 0x2ee   :  { %12941 = vmatmul.mubr.msk.f32.gmra.mrb[158].mxu0 %vm1653_vm7, %v19322_v63 }
 0x2ef   :  { %13166 = vmatmul.mubr.msk.f32.gmra.mrb[14].mxu1 %vm1653_vm7, %v19342_v37  ;;  %12943 = vmatprep.mubr.msk.f32.mxu0 %vm1653_vm7, %v19323_v59  ;;  %v19346_v37 = vld [vmem:[#allocation16_spill] sm:$0xff] }
 0x2f0   :  { %13168 = vmatprep.mubr.msk.f32.mxu1 %vm1653_vm7, %v19343_v53  ;;  %v19347_v53 = vld [vmem:[#allocation36_spill] sm:$0xff] }
 0x2f2   :  { %12944 = vmatmul.mubr.msk.f32.gmra.mrb[160].mxu0 %vm1653_vm7, %v19325_v28 }
 0x2f3   :  { %13169 = vmatmul.mubr.msk.f32.gmra.mrb[16].mxu1 %vm1653_vm7, %v19344_v44  ;;  %12946 = vmatprep.mubr.msk.f32.mxu0 %vm1653_vm7, %v19327_v54  ;;  %v19348_v44 = vld [vmem:[#allocation58_spill] sm:$0xff] }
 0x2f4   :  { %13171 = vmatprep.mubr.msk.f32.mxu1 %vm1653_vm7, %v19345_v47  ;;  %v19349_v47 = vld [vmem:[#allocation59_spill] sm:$0xff] }
 0x2f6   :  { %12947 = vmatmul.mubr.msk.f32.gmra.mrb[162].mxu0 %vm1653_vm7, %v19329_v12 }
 0x2f7   :  { %13172 = vmatmul.mubr.msk.f32.gmra.mrb[18].mxu1 %vm1653_vm7, %v19346_v37  ;;  %12949 = vmatprep.mubr.msk.f32.mxu0 %vm1653_vm7, %v17103_v24  ;;  %v19350_v37 = vld [vmem:[#allocation37_spill] sm:$0xff] }
 0x2f8   :  { %13174 = vmatprep.mubr.msk.f32.mxu1 %vm1653_vm7, %v19347_v53  ;;  %v19352_v53 = vld [vmem:[#allocation38_spill] sm:$0xff] }
 0x2fa   :  { %12950 = vmatmul.mubr.msk.f32.gmra.mrb[164].mxu0 %vm1653_vm7, %v17110_v18 }
 0x2fb   :  { %13175 = vmatmul.mubr.msk.f32.gmra.mrb[20].mxu1 %vm1653_vm7, %v19348_v44  ;;  %12952 = vmatprep.mubr.msk.f32.mxu0 %vm1653_vm7, %v17119_v33  ;;  %v19354_v44 = vld [vmem:[#allocation39_spill] sm:$0xff] }
 0x2fc   :  { %13177 = vmatprep.mubr.msk.f32.mxu1 %vm1653_vm7, %v19349_v47  ;;  %v19355_v47 = vld [vmem:[#allocation40_spill] sm:$0xff] }
 0x2fe   :  { %12953 = vmatmul.mubr.msk.f32.gmra.mrb[166].mxu0 %vm1653_vm7, %v3289_v10  ;;  %v4656_v10 = vrot.slane %v16981_v35, 2 }
 0x2ff   :  { %13178 = vmatmul.mubr.msk.f32.gmra.mrb[22].mxu1 %vm1653_vm7, %v19350_v37  ;;  %v19356_v37 = vld [vmem:[#allocation62_spill] sm:$0xff] }
 0x300   :  { %13180 = vmatprep.mubr.msk.f32.mxu1 %vm1653_vm7, %v19351_v22  ;;  %v19357_v22 = vld [vmem:[#allocation20_spill] sm:$0xff] }
 0x301   :  { %v17237_v33 = vsel %vm2130_vm8, %v19357_v22, %v4654_v16  ;;  %v11213_v22 = vld [vmem:[%s18851_s3 + $0xf0] sm:$0xff] }
 0x302   :  { %19358 = vst [vmem:[#allocation68_spill] sm:$0xff] %v17237_v33 }
 0x303   :  { %13181 = vmatmul.mubr.msk.f32.gmra.mrb[24].mxu1 %vm1653_vm7, %v19352_v53  ;;  %v17240_v53 = vrot.slane %v16991_v25, 2 }
 0x304   :  { %13183 = vmatprep.mubr.msk.f32.mxu1 %vm1653_vm7, %v19353_v51 }
 0x305   :  { %19359 = vst [vmem:[#allocation10_spill] sm:$0xff] %v17240_v53 }
 0x307   :  { %13184 = vmatmul.mubr.msk.f32.gmra.mrb[26].mxu1 %vm1653_vm7, %v19354_v44  ;;  %v17245_v44 = vsel %vm2130_vm8, %v4654_v16, %v4656_v10 }
 0x308   :  { %13186 = vmatprep.mubr.msk.f32.mxu1 %vm1653_vm7, %v19355_v47  ;;  %19360 = vst [vmem:[#allocation55_spill] sm:$0xff] %v17245_v44  ;;  %v17251_v47 = vsel %vm2130_vm8, %v4656_v10, %v17240_v53  ;;  %v19362_v10 = vld [vmem:[#allocation63_spill] sm:$0xff] }
 0x309   :  { %19361 = vst [vmem:[#allocation33_spill] sm:$0xff] %v17251_v47 }
 0x30b   :  { %13187 = vmatmul.mubr.msk.f32.gmra.mrb[28].mxu1 %vm1653_vm7, %v19356_v37 }
 0x30c   :  { %13189 = vmatprep.mubr.msk.f32.mxu1 %vm1653_vm7, %v17237_v33  ;;  %v11214_v33 = vld [vmem:[%s18851_s3 + $0xf8] sm:$0x3] }
 0x30d   :  { %v14087_v16 = vpack.c.bf16 %v11214_v33, %v11213_v22  ;;  %v19365_v33 = vld [vmem:[#allocation64_spill] sm:$0xff]  ;;  %v19369_v22 = vld [vmem:[#allocation23_spill] sm:$0xff] }
 0x30f   :  { %13190 = vmatmul.mubr.msk.f32.gmra.mrb[30].mxu1 %vm1653_vm7, %v17245_v44 }
 0x310   :  { %13192 = vmatprep.mubr.msk.f32.mxu1 %vm1653_vm7, %v17251_v47 }
 0x313   :  { %13193 = vmatmul.mubr.msk.f32.gmra.mrb[32].mxu1 %vm1653_vm7, %v17240_v53  ;;  %v19363_v53 = vld [vmem:[#allocation21_spill] sm:$0xff] }
 0x314   :  { %13199 = vmatprep.mubr.msk.f32.mxu1 %vm1653_vm7, %v16451_v6  ;;  %v19364_v6 = vld [vmem:[#allocation41_spill] sm:$0xff] }
 0x317   :  { %13200 = vmatmul.mubr.msk.f32.vlgmr.msra.gmra.mrb[10].mxu1 %vm1653_vm7, %v16462_v50  ;;  %v19366_v50 = vld [vmem:[#allocation22_spill] sm:$0xff] }
 0x318   :  { %13202 = vmatprep.mubr.msk.f32.mxu1 %vm1653_vm7, %v16470_v19  ;;  %14086 = vmatpush3.bf16.msk.msra.mxu1 %vm15549_vm5, %v14081_v41  ;;  %v19367_v19 = vld [vmem:[#allocation42_spill] sm:$0xff]  ;;  %v19368_v41 = vld [vmem:[#allocation65_spill] sm:$0xff] }
 0x319   :  { %14089 = vmatprep.subr.msk.bf16.mxu1 %vm15549_vm5, %v14087_v16 }
 0x31b   :  { %13203 = vmatmul.mubr.msk.f32.gmra.mrb[12].mxu1 %vm1653_vm7, %v19362_v10  ;;  %v19370_v10 = vld [vmem:[#allocation43_spill] sm:$0xff] }
 0x31c   :  { %13205 = vmatprep.mubr.msk.f32.mxu1 %vm1653_vm7, %v19363_v53  ;;  %v19371_v53 = vld [vmem:[#allocation24_spill] sm:$0xff] }
 0x31f   :  { %13206 = vmatmul.mubr.msk.f32.gmra.mrb[14].mxu1 %vm1653_vm7, %v19364_v6  ;;  %v19372_v6 = vld [vmem:[#allocation44_spill] sm:$0xff] }
 0x320   :  { %13208 = vmatprep.mubr.msk.f32.mxu1 %vm1653_vm7, %v19365_v33  ;;  %v19373_v33 = vld [vmem:[#allocation72_spill] sm:$0xff] }
 0x323   :  { %13209 = vmatmul.mubr.msk.f32.gmra.mrb[16].mxu1 %vm1653_vm7, %v19366_v50  ;;  %v19374_v50 = vld [vmem:[#allocation73_spill] sm:$0xff] }
 0x324   :  { %13211 = vmatprep.mubr.msk.f32.mxu1 %vm1653_vm7, %v19367_v19  ;;  %v19375_v19 = vld [vmem:[#allocation74_spill] sm:$0xff] }
 0x327   :  { %13212 = vmatmul.mubr.msk.f32.gmra.mrb[18].mxu1 %vm1653_vm7, %v19368_v41  ;;  %v19376_v41 = vld [vmem:[#allocation75_spill] sm:$0xff] }
 0x328   :  { %13214 = vmatprep.mubr.msk.f32.mxu1 %vm1653_vm7, %v19369_v22  ;;  %v19377_v22 = vld [vmem:[#allocation77_spill] sm:$0xff] }
 0x32b   :  { %13215 = vmatmul.mubr.msk.f32.gmra.mrb[20].mxu1 %vm1653_vm7, %v19370_v10  ;;  %v4883_v10 = vrot.slane %v16977_v8, 3 }
 0x32c   :  { %13217 = vmatprep.mubr.msk.f32.mxu1 %vm1653_vm7, %v19371_v53  ;;  %v4885_v53 = vrot.slane %v16981_v35, 3 }
 0x32f   :  { %13218 = vmatmul.mubr.msk.f32.gmra.mrb[22].mxu1 %vm1653_vm7, %v19372_v6  ;;  %v19378_v6 = vld [vmem:[#allocation78_spill] sm:$0xff] }
 0x330   :  { %13220 = vmatprep.mubr.msk.f32.mxu1 %vm1653_vm7, %v19373_v33  ;;  %v19379_v33 = vld [vmem:[#allocation76_spill] sm:$0xff] }
 0x331   :  { %v17311_v47 = vsel %vm774_vm1, %v19379_v33, %v4883_v10  ;;  %v11240_v33 = vld [vmem:[%s18851_s3 + $0x100] sm:$0xff] }
 0x332   :  { %19380 = vst [vmem:[#allocation62_spill] sm:$0xff] %v17311_v47 }
 0x333   :  { %13221 = vmatmul.mubr.msk.f32.gmra.mrb[24].mxu1 %vm1653_vm7, %v19374_v50  ;;  %v17314_v50 = vrot.slane %v16991_v25, 3 }
 0x334   :  { %13223 = vmatprep.mubr.msk.f32.mxu1 %vm1653_vm7, %v19375_v19 }
 0x337   :  { %13224 = vmatmul.mubr.msk.f32.gmra.mrb[26].mxu1 %vm1653_vm7, %v19376_v41  ;;  %v17319_v41 = vsel %vm774_vm1, %v4883_v10, %v4885_v53 }
 0x338   :  { %13226 = vmatprep.mubr.msk.f32.mxu1 %vm1653_vm7, %v19377_v22  ;;  %19381 = vst [vmem:[#allocation20_spill] sm:$0xff] %v17319_v41  ;;  %v17325_v22 = vsel %vm774_vm1, %v4885_v53, %v17314_v50  ;;  %v17388_v53 = vrot.slane %v16991_v25, 4 }
 0x33b   :  { %13227 = vmatmul.mubr.msk.f32.gmra.mrb[28].mxu1 %vm1653_vm7, %v19378_v6 }
 0x33c   :  { %13229 = vmatprep.mubr.msk.f32.mxu1 %vm1653_vm7, %v17311_v47  ;;  %v11241_v47 = vld [vmem:[%s18851_s3 + $0x108] sm:$0x3] }
 0x33d   :  { %v14093_v10 = vpack.c.bf16 %v11241_v47, %v11240_v33  ;;  %v11268_v33 = vld [vmem:[%s18851_s3 + $0x118] sm:$0x3] }
 0x33f   :  { %13230 = vmatmul.mubr.msk.f32.gmra.mrb[30].mxu1 %vm1653_vm7, %v17319_v41 }
 0x340   :  { %13232 = vmatprep.mubr.msk.f32.mxu1 %vm1653_vm7, %v17325_v22 }
 0x343   :  { %13233 = vmatmul.mubr.msk.f32.gmra.mrb[32].mxu1 %vm1653_vm7, %v17314_v50 }
 0x344   :  { %13239 = vmatprep.mubr.msk.f32.mxu1 %vm1653_vm7, %v16682_v42  ;;  %v5112_v42 = vrot.slane %v16977_v8, 4 }
 0x347   :  { %13240 = vmatmul.mubr.msk.f32.vlgmr.msra.gmra.mrb[10].mxu1 %vm1653_vm7, %v16693_v40  ;;  %v5114_v40 = vrot.slane %v16981_v35, 4 }
 0x348   :  { %13242 = vmatprep.mubr.msk.f32.mxu1 %vm1653_vm7, %v16701_v34  ;;  %14092 = vmatpush3.bf16.msk.msra.mxu1 %vm15549_vm5, %v14087_v16  ;;  %v17385_v34 = vsel %vm773_vm0, %v16847_v52, %v5112_v42  ;;  %v11267_v52 = vld [vmem:[%s18851_s3 + $0x110] sm:$0xff] }
 0x349   :  { %14095 = vmatprep.subr.msk.bf16.mxu1 %vm15549_vm5, %v14093_v10  ;;  %v17393_v47 = vsel %vm773_vm0, %v5112_v42, %v5114_v40  ;;  %v17399_v16 = vsel %vm773_vm0, %v5114_v40, %v17388_v53  ;;  %v14099_v42 = vpack.c.bf16 %v11268_v33, %v11267_v52  ;;  %v19386_v40 = vld [vmem:[#allocation29_spill] sm:$0xff]  ;;  %v19388_v33 = vld [vmem:[#allocation50_spill] sm:$0xff] }
 0x34a   :  { %v19387_v52 = vld [vmem:[#allocation9_spill] sm:$0xff] }
 0x34b   :  { %13243 = vmatmul.mubr.msk.f32.gmra.mrb[12].mxu1 %vm1653_vm7, %v16709_v9 }
 0x34c   :  { %13245 = vmatprep.mubr.msk.f32.mxu1 %vm1653_vm7, %v16717_v38 }
 0x34f   :  { %13246 = vmatmul.mubr.msk.f32.gmra.mrb[14].mxu1 %vm1653_vm7, %v16725_v36 }
 0x350   :  { %13248 = vmatprep.mubr.msk.f32.mxu1 %vm1653_vm7, %v16733_v29 }
 0x353   :  { %13249 = vmatmul.mubr.msk.f32.gmra.mrb[16].mxu1 %vm1653_vm7, %v16741_v30 }
 0x354   :  { %13251 = vmatprep.mubr.msk.f32.mxu1 %vm1653_vm7, %v16749_v20 }
 0x357   :  { %13252 = vmatmul.mubr.msk.f32.gmra.mrb[18].mxu1 %vm1653_vm7, %v16757_v7 }
 0x358   :  { %13254 = vmatprep.mubr.msk.f32.mxu1 %vm1653_vm7, %v16767_v23 }
 0x35b   :  { %13255 = vmatmul.mubr.msk.f32.gmra.mrb[20].mxu1 %vm1653_vm7, %v16776_v39 }
 0x35c   :  { %13257 = vmatprep.mubr.msk.f32.mxu1 %vm1653_vm7, %v16791_v60 }
 0x35f   :  { %13258 = vmatmul.mubr.msk.f32.gmra.mrb[22].mxu1 %vm1653_vm7, %v16803_v32 }
 0x360   :  { %13260 = vmatprep.mubr.msk.f32.mxu1 %vm1653_vm7, %v16813_v61 }
 0x363   :  { %13261 = vmatmul.mubr.msk.f32.gmra.mrb[24].mxu1 %vm1653_vm7, %v16824_v43 }
 0x364   :  { %13263 = vmatprep.mubr.msk.f32.mxu1 %vm1653_vm7, %v16832_v31 }
 0x367   :  { %13264 = vmatmul.mubr.msk.f32.gmra.mrb[26].mxu1 %vm1653_vm7, %v16840_v27 }
 0x368   :  { %13266 = vmatprep.mubr.msk.f32.mxu1 %vm1653_vm7, %v16850_v15 }
 0x36b   :  { %13267 = vmatmul.mubr.msk.f32.gmra.mrb[28].mxu1 %vm1653_vm7, %v16858_v55 }
 0x36c   :  { %13269 = vmatprep.mubr.msk.f32.mxu1 %vm1653_vm7, %v17385_v34 }
 0x36f   :  { %13270 = vmatmul.mubr.msk.f32.gmra.mrb[30].mxu1 %vm1653_vm7, %v17393_v47 }
 0x370   :  { %13272 = vmatprep.mubr.msk.f32.mxu1 %vm1653_vm7, %v17399_v16 }
 0x373   :  { %13273 = vmatmul.mubr.msk.f32.gmra.mrb[32].mxu1 %vm1653_vm7, %v17388_v53 }
 0x374   :  { %13279 = vmatprep.mubr.msk.f32.mxu1 %vm1653_vm7, %v15859_v4  ;;  %v19384_v4 = vld [vmem:[#allocation6_spill] sm:$0xff] }
 0x377   :  { %13280 = vmatmul.mubr.msk.f32.vlgmr.msra.gmra.mrb[10].mxu1 %vm1653_vm7, %v15857_v46  ;;  %v19383_v46 = vld [vmem:[#allocation26_spill] sm:$0xff] }
 0x378   :  { %13282 = vmatprep.mubr.msk.f32.mxu1 %vm1653_vm7, %v15849_v58  ;;  %14098 = vmatpush3.bf16.msk.msra.mxu1 %vm15549_vm5, %v14093_v10  ;;  %v19382_v58 = vld [vmem:[#allocation49_spill] sm:$0xff]  ;;  %v19385_v10 = vld [vmem:[#allocation8_spill] sm:$0xff] }
 0x379   :  { %14101 = vmatprep.subr.msk.bf16.mxu1 %vm15549_vm5, %v14099_v42 }
 0x37b   :  { %13283 = vmatmul.mubr.msk.f32.gmra.mrb[12].mxu1 %vm1653_vm7, %v15897_v17 }
 0x37c   :  { %13285 = vmatprep.mubr.msk.f32.mxu1 %vm1653_vm7, %v15911_v56 }
 0x37f   :  { %13286 = vmatmul.mubr.msk.f32.gmra.mrb[14].mxu1 %vm1653_vm7, %v15892_v45 }
 0x380   :  { %13288 = vmatprep.mubr.msk.f32.mxu1 %vm1653_vm7, %v15903_v11 }
 0x383   :  { %13289 = vmatmul.mubr.msk.f32.gmra.mrb[16].mxu1 %vm1653_vm7, %v15952_v57 }
 0x384   :  { %13291 = vmatprep.mubr.msk.f32.mxu1 %vm1653_vm7, %v19382_v58  ;;  %v19389_v58 = vld [vmem:[#allocation60_spill] sm:$0xff] }
 0x387   :  { %13292 = vmatmul.mubr.msk.f32.gmra.mrb[18].mxu1 %vm1653_vm7, %v19383_v46  ;;  %v19392_v46 = vld [vmem:[#allocation12_spill] sm:$0xff] }
 0x388   :  { %13294 = vmatprep.mubr.msk.f32.mxu1 %vm1653_vm7, %v19384_v4 }
 0x38b   :  { %13295 = vmatmul.mubr.msk.f32.gmra.mrb[20].mxu1 %vm1653_vm7, %v19385_v10  ;;  %v19390_v10 = vld [vmem:[#allocation31_spill] sm:$0xff] }
 0x38c   :  { %13297 = vmatprep.mubr.msk.f32.mxu1 %vm1653_vm7, %v19386_v40  ;;  %v19391_v40 = vld [vmem:[#allocation79_spill] sm:$0xff] }
 0x38d   :  { %v1534_v4 = vadd.f32 %v19391_v40, %v19390_v10  ;;  %v11294_v10 = vld [vmem:[%s18851_s3 + $0x120] sm:$0xff] }
 0x38f   :  { %13298 = vmatmul.mubr.msk.f32.gmra.mrb[22].mxu1 %vm1653_vm7, %v19387_v52  ;;  %v1535_v52 = vadd.f32 %v19391_v40, %v19392_v46 }
 0x390   :  { %13300 = vmatprep.mubr.msk.f32.mxu1 %vm1653_vm7, %v19388_v33 }
 0x391   :  { %v17465_v33 = vmax.f32 %v1535_v52, 0.0 }
 0x393   :  { %13301 = vmatmul.mubr.msk.f32.gmra.mrb[24].mxu1 %vm1653_vm7, %v16326_v48  ;;  %v17461_v48 = vmax.f32 %v1534_v4, 0.0  ;;  %v11295_v4 = vld [vmem:[%s18851_s3 + $0x128] sm:$0x3] }
 0x394   :  { %13303 = vmatprep.mubr.msk.f32.mxu1 %vm1653_vm7, %v19389_v58  ;;  %v19393_v58 = vld [vmem:[#allocation45_spill] sm:$0xff] }
 0x397   :  { %13304 = vmatmul.mubr.msk.f32.gmra.mrb[26].mxu1 %vm1653_vm7, %v16369_v14  ;;  %v1536_v14 = vadd.f32 %v19391_v40, %v19393_v58  ;;  %v17483_v58 = vpack.c.bf16 %v11295_v4, %v11294_v10 }
 0x398   :  { %13306 = vmatprep.mubr.msk.f32.mxu1 %vm1653_vm7, %v16977_v8 }
 0x399   :  { %v17471_v46 = vmax.f32 %v1536_v14, 0.0 }
 0x39b   :  { %13307 = vmatmul.mubr.msk.f32.gmra.mrb[28].mxu1 %vm1653_vm7, %v16981_v35 }
 0x39c   :  { %13309 = vmatprep.mubr.msk.f32.mxu1 %vm1653_vm7, %v16991_v25 }
 0x39f   :  { %13310 = vmatmul.mubr.msk.f32.gmra.mrb[30].mxu1 %vm1653_vm7, %v17461_v48 }
 0x3a0   :  { %13312 = vmatprep.mubr.msk.f32.mxu1 %vm1653_vm7, %v17465_v33 }
 0x3a3   :  { %13313 = vmatmul.mubr.msk.f32.gmra.mrb[32].mxu1 %vm1653_vm7, %v17471_v46 }
 0x3a4   :  { %13319 = vmatprep.mubr.msk.f32.mxu1 %vm1653_vm7, %v19307_v49 }
 0x3a5   :  { %v17485_v52 = vpop.f32.mrb[144].mxu0 }
 0x3a6   :  { %19394 = vst [vmem:[#allocation74_spill] sm:$0xff] %v17485_v52  ;;  %v17487_v14 = vpop.f32.mrb[145].mxu0 }
 0x3a7   :  { %19395 = vst [vmem:[#allocation78_spill] sm:$0xff] %v17487_v14  ;;  %13320 = vmatmul.mubr.msk.f32.vlgmr.msra.gmra.mrb[10].mxu1 %vm1653_vm7, %v19308_v3  ;;  %v19410_v14 = vld [vmem:[#allocation81_spill] sm:$0xff] }
 0x3a8   :  { %13322 = vmatprep.mubr.msk.f32.mxu1 %vm1653_vm7, %v19311_v0  ;;  %14104 = vmatpush3.bf16.msk.msra.mxu1 %vm15549_vm5, %v14099_v42 }
 0x3a9   :  { %14107 = vmatprep.subr.msk.bf16.mxu1 %vm15549_vm5, %v17483_v58  ;;  %v17498_v49 = vpop.f32.mrb[146].mxu0 }
 0x3aa   :  { %19396 = vst [vmem:[#allocation76_spill] sm:$0xff] %v17498_v49  ;;  %v17500_v10 = vpop.f32.mrb[147].mxu0 }
 0x3ab   :  { %19397 = vst [vmem:[#allocation31_spill] sm:$0xff] %v17500_v10  ;;  %13323 = vmatmul.mubr.msk.f32.gmra.mrb[12].mxu1 %vm1653_vm7, %v19312_v2 }
 0x3ac   :  { %13325 = vmatprep.mubr.msk.f32.mxu1 %vm1653_vm7, %v19315_v62 }
 0x3ad   :  { %v17506_v3 = vpop.f32.mrb[148].mxu0 }
 0x3ae   :  { %19398 = vst [vmem:[#allocation79_spill] sm:$0xff] %v17506_v3  ;;  %v17508_v0 = vpop.f32.mrb[149].mxu0 }
 0x3af   :  { %19399 = vst [vmem:[#allocation12_spill] sm:$0xff] %v17508_v0  ;;  %13326 = vmatmul.mubr.msk.f32.gmra.mrb[14].mxu1 %vm1653_vm7, %v19316_v21 }
 0x3b0   :  { %13328 = vmatprep.mubr.msk.f32.mxu1 %vm1653_vm7, %v19319_v1 }
 0x3b1   :  { %v17514_v42 = vpop.f32.mrb[150].mxu0 }
 0x3b2   :  { %19400 = vst [vmem:[#allocation45_spill] sm:$0xff] %v17514_v42  ;;  %v17516_v4 = vpop.f32.mrb[151].mxu0 }
 0x3b3   :  { %19401 = vst [vmem:[#allocation82_spill] sm:$0xff] %v17516_v4  ;;  %13329 = vmatmul.mubr.msk.f32.gmra.mrb[16].mxu1 %vm1653_vm7, %v19320_v13 }
 0x3b4   :  { %13331 = vmatprep.mubr.msk.f32.mxu1 %vm1653_vm7, %v19321_v26 }
 0x3b5   :  { %v17522_v10 = vpop.f32.mrb[152].mxu0 }
 0x3b6   :  { %19402 = vst [vmem:[#allocation83_spill] sm:$0xff] %v17522_v10  ;;  %v17524_v3 = vpop.f32.mrb[153].mxu0 }
 0x3b7   :  { %19403 = vst [vmem:[#allocation84_spill] sm:$0xff] %v17524_v3  ;;  %13332 = vmatmul.mubr.msk.f32.gmra.mrb[18].mxu1 %vm1653_vm7, %v19322_v63 }
 0x3b8   :  { %13334 = vmatprep.mubr.msk.f32.mxu1 %vm1653_vm7, %v19323_v59 }
 0x3b9   :  { %v17530_v0 = vpop.f32.mrb[154].mxu0 }
 0x3ba   :  { %19404 = vst [vmem:[#allocation85_spill] sm:$0xff] %v17530_v0  ;;  %v17532_v42 = vpop.f32.mrb[155].mxu0  ;;  %v19408_v0 = vld [vmem:[#allocation80_spill] sm:$0xff] }
 0x3bb   :  { %19405 = vst [vmem:[#allocation86_spill] sm:$0xff] %v17532_v42  ;;  %13335 = vmatmul.mubr.msk.f32.gmra.mrb[20].mxu1 %vm1653_vm7, %v19325_v28 }
 0x3bc   :  { %13337 = vmatprep.mubr.msk.f32.mxu1 %vm1653_vm7, %v19327_v54  ;;  %v19413_v54 = vld [vmem:[#allocation69_spill] sm:$0xff] }
 0x3bd   :  { %v17538_v4 = vpop.f32.mrb[156].mxu0 }
 0x3be   :  { %19406 = vst [vmem:[#allocation87_spill] sm:$0xff] %v17538_v4  ;;  %v17540_v10 = vpop.f32.mrb[157].mxu0  ;;  %v19412_v4 = vld [vmem:[#allocation28_spill] sm:$0xff] }
 0x3bf   :  { %19407 = vst [vmem:[#allocation88_spill] sm:$0xff] %v17540_v10  ;;  %13338 = vmatmul.mubr.msk.f32.gmra.mrb[22].mxu1 %vm1653_vm7, %v19329_v12 }
 0x3c0   :  { %13340 = vmatprep.mubr.msk.f32.mxu1 %vm1653_vm7, %v17103_v24  ;;  %v19415_v24 = vld [vmem:[#allocation51_spill] sm:$0xff] }
 0x3c1   :  { %v12942_v3 = vpop.f32.mrb[158].mxu0 }
 0x3c2   :  { %v17547_v49 = vadd.f32 %v12942_v3, %v19408_v0  ;;  %v3438_v42 = vpop.f32.mrb[159].mxu0  ;;  %v19416_v3 = vld [vmem:[#allocation70_spill] sm:$0xff] }
 0x3c3   :  { %13341 = vmatmul.mubr.msk.f32.gmra.mrb[24].mxu1 %vm1653_vm7, %v17110_v18  ;;  %v17552_v52 = vadd.f32 %v3438_v42, %v19410_v14  ;;  %v5565_v14 = vrot.slane %v17461_v48, 1 }
 0x3c4   :  { %19409 = vst [vmem:[#allocation80_spill] sm:$0xff] %v17547_v49  ;;  %13343 = vmatprep.mubr.msk.f32.mxu1 %vm1653_vm7, %v19412_v4  ;;  %v19418_v49 = vld [vmem:[#allocation66_spill] sm:$0xff]  ;;  %v19419_v4 = vld [vmem:[#allocation71_spill] sm:$0xff] }
 0x3c5   :  { %19411 = vst [vmem:[#allocation81_spill] sm:$0xff] %v17552_v52  ;;  %v12945_v10 = vpop.f32.mrb[160].mxu0  ;;  %v5567_v52 = vrot.slane %v17465_v33, 1 }
 0x3c6   :  { %v17557_v12 = vadd.f32 %v12945_v10, %v19413_v54  ;;  %v3448_v28 = vpop.f32.mrb[161].mxu0  ;;  %v19421_v10 = vld [vmem:[#allocation67_spill] sm:$0xff] }
 0x3c7   :  { %13344 = vmatmul.mubr.msk.f32.gmra.mrb[26].mxu1 %vm1653_vm7, %v19415_v24  ;;  %v17562_v0 = vadd.f32 %v3448_v28, %v19416_v3  ;;  %v17578_v28 = vrot.slane %v17471_v46, 1  ;;  %v19424_v3 = vld [vmem:[#allocation46_spill] sm:$0xff] }
 0x3c8   :  { %19414 = vst [vmem:[#allocation69_spill] sm:$0xff] %v17557_v12  ;;  %13346 = vmatprep.mubr.msk.f32.mxu1 %vm1653_vm7, %v19418_v49  ;;  %v19422_v12 = vld [vmem:[#allocation52_spill] sm:$0xff] }
 0x3c9   :  { %19417 = vst [vmem:[#allocation70_spill] sm:$0xff] %v17562_v0  ;;  %v12948_v42 = vpop.f32.mrb[162].mxu0  ;;  %v17575_v24 = vsel %vm1605_vm6, %v19422_v12, %v5565_v14  ;;  %v17595_v12 = vsel %vm1605_vm6, %v5567_v52, %v17578_v28 }
 0x3ca   :  { %v17569_v18 = vadd.f32 %v12948_v42, %v19419_v4  ;;  %v3458_v54 = vpop.f32.mrb[163].mxu0  ;;  %19423 = vst [vmem:[#allocation52_spill] sm:$0xff] %v17575_v24  ;;  %v17586_v4 = vsel %vm1605_vm6, %v5565_v14, %v5567_v52  ;;  %v19427_v42 = vld [vmem:[#allocation47_spill] sm:$0xff]  ;;  %19429 = vst [vmem:[#allocation90_spill] sm:$0xff] %v17595_v12 }
 0x3cb   :  { %13347 = vmatmul.mubr.msk.f32.gmra.mrb[28].mxu1 %vm1653_vm7, %v19421_v10  ;;  %v17581_v0 = vadd.f32 %v3458_v54, %v19424_v3  ;;  %19426 = vst [vmem:[#allocation89_spill] sm:$0xff] %v17586_v4  ;;  %v19430_v54 = vld [vmem:[#allocation25_spill] sm:$0xff]  ;;  %v11322_v14 = vld [vmem:[%s18851_s3 + $0x138] sm:$0x3] }
 0x3cc   :  { %19420 = vst [vmem:[#allocation71_spill] sm:$0xff] %v17569_v18  ;;  %13349 = vmatprep.mubr.msk.f32.mxu1 %vm1653_vm7, %v17575_v24  ;;  %v19438_v24 = vld [vmem:[#allocation34_spill] sm:$0xff] }
 0x3cd   :  { %19425 = vst [vmem:[#allocation46_spill] sm:$0xff] %v17581_v0  ;;  %v12951_v49 = vpop.f32.mrb[164].mxu0 }
 0x3ce   :  { %v17589_v18 = vadd.f32 %v12951_v49, %v19427_v42  ;;  %v3468_v10 = vpop.f32.mrb[165].mxu0  ;;  %v11321_v49 = vld [vmem:[%s18851_s3 + $0x130] sm:$0xff]  ;;  %v19432_v42 = vld [vmem:[#allocation48_spill] sm:$0xff] }
 0x3cf   :  { %13350 = vmatmul.mubr.msk.f32.gmra.mrb[30].mxu1 %vm1653_vm7, %v17586_v4  ;;  %v17598_v3 = vadd.f32 %v3468_v10, %v19430_v54  ;;  %v19434_v10 = vld [vmem:[#allocation5_spill] sm:$0xff]  ;;  %v19437_v4 = vld [vmem:[#allocation14_spill] sm:$0xff] }
 0x3d0   :  { %19428 = vst [vmem:[#allocation47_spill] sm:$0xff] %v17589_v18  ;;  %13352 = vmatprep.mubr.msk.f32.mxu1 %vm1653_vm7, %v17595_v12  ;;  %v14111_v12 = vpack.c.bf16 %v11322_v14, %v11321_v49  ;;  %v19444_v49 = vld [vmem:[#allocation58_spill] sm:$0xff]  ;;  %v19446_v14 = vld [vmem:[#allocation37_spill] sm:$0xff] }
 0x3d1   :  { %19431 = vst [vmem:[#allocation25_spill] sm:$0xff] %v17598_v3  ;;  %v12954_v0 = vpop.f32.mrb[166].mxu0  ;;  %v19436_v3 = vld [vmem:[#allocation56_spill] sm:$0xff] }
 0x3d2   :  { %v17609_v18 = vadd.f32 %v12954_v0, %v19432_v42  ;;  %v3478_v52 = vpop.f32.mrb[167].mxu0  ;;  %v19439_v0 = vld [vmem:[#allocation57_spill] sm:$0xff]  ;;  %v19440_v42 = vld [vmem:[#allocation15_spill] sm:$0xff] }
 0x3d3   :  { %13353 = vmatmul.mubr.msk.f32.gmra.mrb[32].mxu1 %vm1653_vm7, %v17578_v28  ;;  %v17614_v54 = vadd.f32 %v3478_v52, %v19434_v10  ;;  %v19447_v52 = vld [vmem:[#allocation18_spill] sm:$0xff] }
 0x3d4   :  { %19433 = vst [vmem:[#allocation48_spill] sm:$0xff] %v17609_v18  ;;  %13359 = vmatprep.mubr.msk.f32.mxu1 %vm1653_vm7, %v19436_v3  ;;  %v19441_v3 = vld [vmem:[#allocation35_spill] sm:$0xff]  ;;  %v19448_v10 = vld [vmem:[#allocation38_spill] sm:$0xff]  ;;  %v19450_v18 = vld [vmem:[#allocation40_spill] sm:$0xff] }
 0x3d5   :  { %19435 = vst [vmem:[#allocation5_spill] sm:$0xff] %v17614_v54  ;;  %v19449_v54 = vld [vmem:[#allocation39_spill] sm:$0xff] }
 0x3d7   :  { %13360 = vmatmul.mubr.msk.f32.vlgmr.msra.gmra.mrb[10].mxu1 %vm1653_vm7, %v19437_v4  ;;  %v19442_v4 = vld [vmem:[#allocation16_spill] sm:$0xff] }
 0x3d8   :  { %13362 = vmatprep.mubr.msk.f32.mxu1 %vm1653_vm7, %v19438_v24  ;;  %14110 = vmatpush3.bf16.msk.msra.mxu1 %vm15549_vm5, %v17483_v58  ;;  %v19443_v24 = vld [vmem:[#allocation36_spill] sm:$0xff]  ;;  %v19445_v58 = vld [vmem:[#allocation59_spill] sm:$0xff] }
 0x3d9   :  { %14113 = vmatprep.subr.msk.bf16.mxu1 %vm15549_vm5, %v14111_v12 }
 0x3db   :  { %13363 = vmatmul.mubr.msk.f32.gmra.mrb[12].mxu1 %vm1653_vm7, %v19439_v0 }
 0x3dc   :  { %13365 = vmatprep.mubr.msk.f32.mxu1 %vm1653_vm7, %v19440_v42 }
 0x3df   :  { %13366 = vmatmul.mubr.msk.f32.gmra.mrb[14].mxu1 %vm1653_vm7, %v19441_v3 }
 0x3e0   :  { %13368 = vmatprep.mubr.msk.f32.mxu1 %vm1653_vm7, %v19442_v4 }
 0x3e3   :  { %13369 = vmatmul.mubr.msk.f32.gmra.mrb[16].mxu1 %vm1653_vm7, %v19443_v24 }
 0x3e4   :  { %13371 = vmatprep.mubr.msk.f32.mxu1 %vm1653_vm7, %v19444_v49 }
 0x3e7   :  { %13372 = vmatmul.mubr.msk.f32.gmra.mrb[18].mxu1 %vm1653_vm7, %v19445_v58  ;;  %v19451_v58 = vld [vmem:[#allocation68_spill] sm:$0xff] }
 0x3e8   :  { %13374 = vmatprep.mubr.msk.f32.mxu1 %vm1653_vm7, %v19446_v14 }
 0x3eb   :  { %13375 = vmatmul.mubr.msk.f32.gmra.mrb[20].mxu1 %vm1653_vm7, %v19447_v52  ;;  %v5796_v52 = vrot.slane %v17465_v33, 2 }
 0x3ec   :  { %13377 = vmatprep.mubr.msk.f32.mxu1 %vm1653_vm7, %v19448_v10  ;;  %v5794_v10 = vrot.slane %v17461_v48, 2 }
 0x3ef   :  { %13378 = vmatmul.mubr.msk.f32.gmra.mrb[22].mxu1 %vm1653_vm7, %v19353_v51  ;;  %v19452_v51 = vld [vmem:[#allocation33_spill] sm:$0xff] }
 0x3f0   :  { %13380 = vmatprep.mubr.msk.f32.mxu1 %vm1653_vm7, %v19449_v54  ;;  %v19453_v54 = vld [vmem:[#allocation10_spill] sm:$0xff] }
 0x3f1   :  { %v17665_v14 = vsel %vm2130_vm8, %v19453_v54, %v5794_v10  ;;  %v11348_v54 = vld [vmem:[%s18851_s3 + $0x140] sm:$0xff] }
 0x3f2   :  { %19454 = vst [vmem:[#allocation56_spill] sm:$0xff] %v17665_v14 }
 0x3f3   :  { %13381 = vmatmul.mubr.msk.f32.gmra.mrb[24].mxu1 %vm1653_vm7, %v19450_v18  ;;  %v17668_v18 = vrot.slane %v17471_v46, 2 }
 0x3f4   :  { %13383 = vmatprep.mubr.msk.f32.mxu1 %vm1653_vm7, %v19356_v37 }
 0x3f5   :  { %19455 = vst [vmem:[#allocation14_spill] sm:$0xff] %v17668_v18 }
 0x3f7   :  { %13384 = vmatmul.mubr.msk.f32.gmra.mrb[26].mxu1 %vm1653_vm7, %v19451_v58  ;;  %v17673_v58 = vsel %vm2130_vm8, %v5794_v10, %v5796_v52  ;;  %v19458_v10 = vld [vmem:[#allocation63_spill] sm:$0xff] }
 0x3f8   :  { %13386 = vmatprep.mubr.msk.f32.mxu1 %vm1653_vm7, %v17245_v44  ;;  %19456 = vst [vmem:[#allocation34_spill] sm:$0xff] %v17673_v58  ;;  %v17679_v44 = vsel %vm2130_vm8, %v5796_v52, %v17668_v18  ;;  %v19459_v52 = vld [vmem:[#allocation21_spill] sm:$0xff] }
 0x3f9   :  { %19457 = vst [vmem:[#allocation57_spill] sm:$0xff] %v17679_v44 }
 0x3fb   :  { %13387 = vmatmul.mubr.msk.f32.gmra.mrb[28].mxu1 %vm1653_vm7, %v19452_v51  ;;  %v19460_v51 = vld [vmem:[#allocation41_spill] sm:$0xff] }
 0x3fc   :  { %13389 = vmatprep.mubr.msk.f32.mxu1 %vm1653_vm7, %v17665_v14  ;;  %v11349_v14 = vld [vmem:[%s18851_s3 + $0x148] sm:$0x3] }
 0x3ff   :  { %13390 = vmatmul.mubr.msk.f32.gmra.mrb[30].mxu1 %vm1653_vm7, %v17673_v58  ;;  %v14117_v58 = vpack.c.bf16 %v11349_v14, %v11348_v54  ;;  %v19464_v14 = vld [vmem:[#allocation65_spill] sm:$0xff]  ;;  %v19465_v54 = vld [vmem:[#allocation23_spill] sm:$0xff] }
 0x400   :  { %13392 = vmatprep.mubr.msk.f32.mxu1 %vm1653_vm7, %v17679_v44  ;;  %v19461_v44 = vld [vmem:[#allocation64_spill] sm:$0xff] }
 0x403   :  { %13393 = vmatmul.mubr.msk.f32.gmra.mrb[32].mxu1 %vm1653_vm7, %v17668_v18  ;;  %v19462_v18 = vld [vmem:[#allocation22_spill] sm:$0xff] }
 0x404   :  { %13399 = vmatprep.mubr.msk.f32.mxu1 %vm1653_vm7, %v19458_v10  ;;  %v19463_v10 = vld [vmem:[#allocation42_spill] sm:$0xff] }
 0x407   :  { %13400 = vmatmul.mubr.msk.f32.vlgmr.msra.gmra.mrb[10].mxu1 %vm1653_vm7, %v19459_v52  ;;  %v19468_v52 = vld [vmem:[#allocation44_spill] sm:$0xff] }
 0x408   :  { %13402 = vmatprep.mubr.msk.f32.mxu1 %vm1653_vm7, %v19460_v51  ;;  %14116 = vmatpush3.bf16.msk.msra.mxu1 %vm15549_vm5, %v14111_v12  ;;  %v19466_v51 = vld [vmem:[#allocation43_spill] sm:$0xff]  ;;  %v19467_v12 = vld [vmem:[#allocation24_spill] sm:$0xff] }
 0x409   :  { %14119 = vmatprep.subr.msk.bf16.mxu1 %vm15549_vm5, %v14117_v58 }
 0x40b   :  { %13403 = vmatmul.mubr.msk.f32.gmra.mrb[12].mxu1 %vm1653_vm7, %v19461_v44  ;;  %v19469_v44 = vld [vmem:[#allocation72_spill] sm:$0xff] }
 0x40c   :  { %13405 = vmatprep.mubr.msk.f32.mxu1 %vm1653_vm7, %v19462_v18  ;;  %v19470_v18 = vld [vmem:[#allocation73_spill] sm:$0xff] }
 0x40f   :  { %13406 = vmatmul.mubr.msk.f32.gmra.mrb[14].mxu1 %vm1653_vm7, %v19463_v10 }
 0x410   :  { %13408 = vmatprep.mubr.msk.f32.mxu1 %vm1653_vm7, %v19464_v14  ;;  %v19471_v14 = vld [vmem:[#allocation75_spill] sm:$0xff] }
 0x413   :  { %13409 = vmatmul.mubr.msk.f32.gmra.mrb[16].mxu1 %vm1653_vm7, %v19465_v54  ;;  %v19472_v54 = vld [vmem:[#allocation77_spill] sm:$0xff] }
 0x414   :  { %13411 = vmatprep.mubr.msk.f32.mxu1 %vm1653_vm7, %v19466_v51 }
 0x417   :  { %13412 = vmatmul.mubr.msk.f32.gmra.mrb[18].mxu1 %vm1653_vm7, %v19467_v12  ;;  %v19473_v12 = vld [vmem:[#allocation62_spill] sm:$0xff] }
 0x418   :  { %13414 = vmatprep.mubr.msk.f32.mxu1 %vm1653_vm7, %v19468_v52 }
 0x41b   :  { %13415 = vmatmul.mubr.msk.f32.gmra.mrb[20].mxu1 %vm1653_vm7, %v19469_v44  ;;  %v6025_v44 = vrot.slane %v17465_v33, 3 }
 0x41c   :  { %13417 = vmatprep.mubr.msk.f32.mxu1 %vm1653_vm7, %v19470_v18  ;;  %v6023_v18 = vrot.slane %v17461_v48, 3 }
 0x41f   :  { %13418 = vmatmul.mubr.msk.f32.gmra.mrb[22].mxu1 %vm1653_vm7, %v19375_v19 }
 0x420   :  { %13420 = vmatprep.mubr.msk.f32.mxu1 %vm1653_vm7, %v19471_v14  ;;  %v17739_v14 = vsel %vm774_vm1, %v17314_v50, %v6023_v18  ;;  %v11375_v50 = vld [vmem:[%s18851_s3 + $0x150] sm:$0xff] }
 0x421   :  { %19474 = vst [vmem:[#allocation15_spill] sm:$0xff] %v17739_v14 }
 0x423   :  { %13421 = vmatmul.mubr.msk.f32.gmra.mrb[24].mxu1 %vm1653_vm7, %v19472_v54  ;;  %v17742_v54 = vrot.slane %v17471_v46, 3 }
 0x424   :  { %13423 = vmatprep.mubr.msk.f32.mxu1 %vm1653_vm7, %v19378_v6 }
 0x427   :  { %13424 = vmatmul.mubr.msk.f32.gmra.mrb[26].mxu1 %vm1653_vm7, %v19473_v12  ;;  %v17747_v12 = vsel %vm774_vm1, %v6023_v18, %v6025_v44 }
 0x428   :  { %13426 = vmatprep.mubr.msk.f32.mxu1 %vm1653_vm7, %v17319_v41  ;;  %v17753_v41 = vsel %vm774_vm1, %v6025_v44, %v17742_v54  ;;  %v17816_v44 = vrot.slane %v17471_v46, 4 }
 0x42b   :  { %13427 = vmatmul.mubr.msk.f32.gmra.mrb[28].mxu1 %vm1653_vm7, %v17325_v22 }
 0x42c   :  { %13429 = vmatprep.mubr.msk.f32.mxu1 %vm1653_vm7, %v17739_v14  ;;  %v11376_v14 = vld [vmem:[%s18851_s3 + $0x158] sm:$0x3] }
 0x42d   :  { %v14123_v18 = vpack.c.bf16 %v11376_v14, %v11375_v50  ;;  %v11403_v50 = vld [vmem:[%s18851_s3 + $0x168] sm:$0x3] }
 0x42f   :  { %13430 = vmatmul.mubr.msk.f32.gmra.mrb[30].mxu1 %vm1653_vm7, %v17747_v12 }
 0x430   :  { %13432 = vmatprep.mubr.msk.f32.mxu1 %vm1653_vm7, %v17753_v41 }
 0x433   :  { %13433 = vmatmul.mubr.msk.f32.gmra.mrb[32].mxu1 %vm1653_vm7, %v17742_v54 }
 0x434   :  { %13439 = vmatprep.mubr.msk.f32.mxu1 %vm1653_vm7, %v16709_v9  ;;  %v6252_v9 = vrot.slane %v17461_v48, 4 }
 0x437   :  { %13440 = vmatmul.mubr.msk.f32.vlgmr.msra.gmra.mrb[10].mxu1 %vm1653_vm7, %v16717_v38  ;;  %v6254_v38 = vrot.slane %v17465_v33, 4 }
 0x438   :  { %13442 = vmatprep.mubr.msk.f32.mxu1 %vm1653_vm7, %v16725_v36  ;;  %14122 = vmatpush3.bf16.msk.msra.mxu1 %vm15549_vm5, %v14117_v58  ;;  %v17813_v36 = vsel %vm773_vm0, %v17388_v53, %v6252_v9  ;;  %v11402_v53 = vld [vmem:[%s18851_s3 + $0x160] sm:$0xff] }
 0x439   :  { %14125 = vmatprep.subr.msk.bf16.mxu1 %vm15549_vm5, %v14123_v18  ;;  %v17821_v58 = vsel %vm773_vm0, %v6252_v9, %v6254_v38  ;;  %v17827_v14 = vsel %vm773_vm0, %v6254_v38, %v17816_v44  ;;  %v14129_v9 = vpack.c.bf16 %v11403_v50, %v11402_v53  ;;  %v19476_v38 = vld [vmem:[#allocation26_spill] sm:$0xff]  ;;  %v19480_v53 = vld [vmem:[#allocation9_spill] sm:$0xff]  ;;  %v19483_v50 = vld [vmem:[#allocation60_spill] sm:$0xff] }
 0x43b   :  { %13443 = vmatmul.mubr.msk.f32.gmra.mrb[12].mxu1 %vm1653_vm7, %v16733_v29 }
 0x43c   :  { %13445 = vmatprep.mubr.msk.f32.mxu1 %vm1653_vm7, %v16741_v30 }
 0x43f   :  { %13446 = vmatmul.mubr.msk.f32.gmra.mrb[14].mxu1 %vm1653_vm7, %v16749_v20 }
 0x440   :  { %13448 = vmatprep.mubr.msk.f32.mxu1 %vm1653_vm7, %v16757_v7 }
 0x443   :  { %13449 = vmatmul.mubr.msk.f32.gmra.mrb[16].mxu1 %vm1653_vm7, %v16767_v23 }
 0x444   :  { %13451 = vmatprep.mubr.msk.f32.mxu1 %vm1653_vm7, %v16776_v39 }
 0x447   :  { %13452 = vmatmul.mubr.msk.f32.gmra.mrb[18].mxu1 %vm1653_vm7, %v16791_v60 }
 0x448   :  { %13454 = vmatprep.mubr.msk.f32.mxu1 %vm1653_vm7, %v16803_v32 }
 0x44b   :  { %13455 = vmatmul.mubr.msk.f32.gmra.mrb[20].mxu1 %vm1653_vm7, %v16813_v61 }
 0x44c   :  { %13457 = vmatprep.mubr.msk.f32.mxu1 %vm1653_vm7, %v16824_v43 }
 0x44f   :  { %13458 = vmatmul.mubr.msk.f32.gmra.mrb[22].mxu1 %vm1653_vm7, %v16832_v31 }
 0x450   :  { %13460 = vmatprep.mubr.msk.f32.mxu1 %vm1653_vm7, %v16840_v27 }
 0x453   :  { %13461 = vmatmul.mubr.msk.f32.gmra.mrb[24].mxu1 %vm1653_vm7, %v16850_v15 }
 0x454   :  { %13463 = vmatprep.mubr.msk.f32.mxu1 %vm1653_vm7, %v16858_v55 }
 0x457   :  { %13464 = vmatmul.mubr.msk.f32.gmra.mrb[26].mxu1 %vm1653_vm7, %v17385_v34 }
 0x458   :  { %13466 = vmatprep.mubr.msk.f32.mxu1 %vm1653_vm7, %v17393_v47 }
 0x45b   :  { %13467 = vmatmul.mubr.msk.f32.gmra.mrb[28].mxu1 %vm1653_vm7, %v17399_v16 }
 0x45c   :  { %13469 = vmatprep.mubr.msk.f32.mxu1 %vm1653_vm7, %v17813_v36 }
 0x45f   :  { %13470 = vmatmul.mubr.msk.f32.gmra.mrb[30].mxu1 %vm1653_vm7, %v17821_v58 }
 0x460   :  { %13472 = vmatprep.mubr.msk.f32.mxu1 %vm1653_vm7, %v17827_v14 }
 0x463   :  { %13473 = vmatmul.mubr.msk.f32.gmra.mrb[32].mxu1 %vm1653_vm7, %v17816_v44 }
 0x464   :  { %13479 = vmatprep.mubr.msk.f32.mxu1 %vm1653_vm7, %v15897_v17  ;;  %v19475_v17 = vld [vmem:[#allocation49_spill] sm:$0xff] }
 0x467   :  { %13480 = vmatmul.mubr.msk.f32.vlgmr.msra.gmra.mrb[10].mxu1 %vm1653_vm7, %v15911_v56  ;;  %v19477_v56 = vld [vmem:[#allocation6_spill] sm:$0xff] }
 0x468   :  { %13482 = vmatprep.mubr.msk.f32.mxu1 %vm1653_vm7, %v15892_v45  ;;  %14128 = vmatpush3.bf16.msk.msra.mxu1 %vm15549_vm5, %v14123_v18  ;;  %v19478_v45 = vld [vmem:[#allocation8_spill] sm:$0xff]  ;;  %v19479_v18 = vld [vmem:[#allocation29_spill] sm:$0xff] }
 0x469   :  { %14131 = vmatprep.subr.msk.bf16.mxu1 %vm15549_vm5, %v14129_v9 }
 0x46b   :  { %13483 = vmatmul.mubr.msk.f32.gmra.mrb[12].mxu1 %vm1653_vm7, %v15903_v11  ;;  %v19481_v11 = vld [vmem:[#allocation50_spill] sm:$0xff] }
 0x46c   :  { %13485 = vmatprep.mubr.msk.f32.mxu1 %vm1653_vm7, %v15952_v57  ;;  %v19482_v57 = vld [vmem:[#allocation17_spill] sm:$0xff] }
 0x46f   :  { %13486 = vmatmul.mubr.msk.f32.gmra.mrb[14].mxu1 %vm1653_vm7, %v19475_v17  ;;  %v19484_v17 = vld [vmem:[#allocation61_spill] sm:$0xff] }
 0x470   :  { %13488 = vmatprep.mubr.msk.f32.mxu1 %vm1653_vm7, %v19476_v38  ;;  %v19485_v38 = vld [vmem:[#allocation13_spill] sm:$0xff] }
 0x473   :  { %13489 = vmatmul.mubr.msk.f32.gmra.mrb[16].mxu1 %vm1653_vm7, %v19477_v56  ;;  %v1537_v56 = vadd.f32 %v19391_v40, %v19485_v38 }
 0x474   :  { %13491 = vmatprep.mubr.msk.f32.mxu1 %vm1653_vm7, %v19478_v45  ;;  %v19486_v45 = vld [vmem:[#allocation32_spill] sm:$0xff] }
 0x477   :  { %13492 = vmatmul.mubr.msk.f32.gmra.mrb[18].mxu1 %vm1653_vm7, %v19479_v18  ;;  %v1538_v18 = vadd.f32 %v19391_v40, %v19486_v45 }
 0x478   :  { %13494 = vmatprep.mubr.msk.f32.mxu1 %vm1653_vm7, %v19480_v53  ;;  %v17891_v53 = vmax.f32 %v1537_v56, 0.0 }
 0x47b   :  { %13495 = vmatmul.mubr.msk.f32.gmra.mrb[20].mxu1 %vm1653_vm7, %v19481_v11  ;;  %v19497_v11 = vld [vmem:[#allocation52_spill] sm:$0xff] }
 0x47c   :  { %13497 = vmatprep.mubr.msk.f32.mxu1 %vm1653_vm7, %v19482_v57  ;;  %v6705_v57 = vrot.slane %v17891_v53, 1 }
 0x47e   :  { %v6706_v38 = vsel %vm1605_vm6, %v17578_v28, %v6705_v57  ;;  %v11457_v28 = vld [vmem:[%s18851_s3 + $0x188] sm:$0x3] }
 0x47f   :  { %13498 = vmatmul.mubr.msk.f32.gmra.mrb[22].mxu1 %vm1653_vm7, %v19483_v50  ;;  %v19498_v50 = vld [vmem:[#allocation89_spill] sm:$0xff] }
 0x480   :  { %13500 = vmatprep.mubr.msk.f32.mxu1 %vm1653_vm7, %v19484_v17  ;;  %v19499_v17 = vld [vmem:[#allocation90_spill] sm:$0xff] }
 0x483   :  { %13501 = vmatmul.mubr.msk.f32.gmra.mrb[24].mxu1 %vm1653_vm7, %v16977_v8  ;;  %v19487_v8 = vld [vmem:[#allocation54_spill] sm:$0xff] }
 0x484   :  { %13503 = vmatprep.mubr.msk.f32.mxu1 %vm1653_vm7, %v16981_v35  ;;  %v1539_v35 = vadd.f32 %v19391_v40, %v19487_v8  ;;  %v11430_v40 = vld [vmem:[%s18851_s3 + $0x178] sm:$0x3] }
 0x487   :  { %13504 = vmatmul.mubr.msk.f32.gmra.mrb[26].mxu1 %vm1653_vm7, %v16991_v25  ;;  %v17893_v25 = vmax.f32 %v1538_v18, 0.0 }
 0x488   :  { %13506 = vmatprep.mubr.msk.f32.mxu1 %vm1653_vm7, %v17461_v48  ;;  %v17899_v48 = vmax.f32 %v1539_v35, 0.0  ;;  %v11456_v35 = vld [vmem:[%s18851_s3 + $0x180] sm:$0xff] }
 0x489   :  { %v6707_v45 = vrot.slane %v17893_v25, 1 }
 0x48a   :  { %v6709_v56 = vrot.slane %v17899_v48, 1 }
 0x48b   :  { %13507 = vmatmul.mubr.msk.f32.gmra.mrb[28].mxu1 %vm1653_vm7, %v17465_v33  ;;  %v11429_v33 = vld [vmem:[%s18851_s3 + $0x170] sm:$0xff]  ;;  %v6708_v18 = vsel %vm1605_vm6, %v6705_v57, %v6707_v45 }
 0x48c   :  { %13509 = vmatprep.mubr.msk.f32.mxu1 %vm1653_vm7, %v17471_v46  ;;  %v14135_v46 = vpack.c.bf16 %v11430_v40, %v11429_v33  ;;  %v6710_v8 = vsel %vm1605_vm6, %v6707_v45, %v6709_v56  ;;  %v14141_v33 = vpack.c.bf16 %v11457_v28, %v11456_v35  ;;  %v19503_v40 = vld [vmem:[#allocation38_spill] sm:$0xff]  ;;  %v19518_v45 = vld [vmem:[#allocation24_spill] sm:$0xff]  ;;  %v19525_v35 = vld [vmem:[#allocation15_spill] sm:$0xff]  ;;  %v7167_v28 = vrot.slane %v17899_v48, 3 }
 0x48f   :  { %13510 = vmatmul.mubr.msk.f32.gmra.mrb[30].mxu1 %vm1653_vm7, %v17891_v53 }
 0x490   :  { %13512 = vmatprep.mubr.msk.f32.mxu1 %vm1653_vm7, %v17893_v25 }
 0x493   :  { %13513 = vmatmul.mubr.msk.f32.gmra.mrb[32].mxu1 %vm1653_vm7, %v17899_v48 }
 0x494   :  { %13519 = vmatprep.mubr.msk.f32.mxu1 %vm1653_vm7, %v19312_v2  ;;  %v19490_v2 = vld [vmem:[#allocation11_spill] sm:$0xff] }
 0x497   :  { %13520 = vmatmul.mubr.msk.f32.vlgmr.msra.gmra.mrb[10].mxu1 %vm1653_vm7, %v19315_v62  ;;  %v19489_v62 = vld [vmem:[#allocation53_spill] sm:$0xff] }
 0x498   :  { %13522 = vmatprep.mubr.msk.f32.mxu1 %vm1653_vm7, %v19316_v21  ;;  %14134 = vmatpush3.bf16.msk.msra.mxu1 %vm15549_vm5, %v14129_v9  ;;  %v19488_v21 = vld [vmem:[#allocation30_spill] sm:$0xff]  ;;  %v19496_v9 = vld [vmem:[#allocation67_spill] sm:$0xff] }
 0x499   :  { %14137 = vmatprep.subr.msk.bf16.mxu1 %vm15549_vm5, %v14135_v46 }
 0x49b   :  { %13523 = vmatmul.mubr.msk.f32.gmra.mrb[12].mxu1 %vm1653_vm7, %v19319_v1  ;;  %v19491_v1 = vld [vmem:[#allocation7_spill] sm:$0xff] }
 0x49c   :  { %13525 = vmatprep.mubr.msk.f32.mxu1 %vm1653_vm7, %v19320_v13  ;;  %v19492_v13 = vld [vmem:[#allocation27_spill] sm:$0xff] }
 0x49f   :  { %13526 = vmatmul.mubr.msk.f32.gmra.mrb[14].mxu1 %vm1653_vm7, %v19321_v26  ;;  %v19493_v26 = vld [vmem:[#allocation28_spill] sm:$0xff] }
 0x4a0   :  { %13528 = vmatprep.mubr.msk.f32.mxu1 %vm1653_vm7, %v19322_v63  ;;  %v19494_v63 = vld [vmem:[#allocation51_spill] sm:$0xff] }
 0x4a3   :  { %13529 = vmatmul.mubr.msk.f32.gmra.mrb[16].mxu1 %vm1653_vm7, %v19323_v59  ;;  %v19495_v59 = vld [vmem:[#allocation66_spill] sm:$0xff] }
 0x4a4   :  { %13531 = vmatprep.mubr.msk.f32.mxu1 %vm1653_vm7, %v19488_v21  ;;  %v19508_v21 = vld [vmem:[#allocation55_spill] sm:$0xff] }
 0x4a7   :  { %13532 = vmatmul.mubr.msk.f32.gmra.mrb[18].mxu1 %vm1653_vm7, %v19489_v62  ;;  %v19509_v62 = vld [vmem:[#allocation33_spill] sm:$0xff] }
 0x4a8   :  { %13534 = vmatprep.mubr.msk.f32.mxu1 %vm1653_vm7, %v19490_v2  ;;  %v19510_v2 = vld [vmem:[#allocation56_spill] sm:$0xff] }
 0x4ab   :  { %13535 = vmatmul.mubr.msk.f32.gmra.mrb[20].mxu1 %vm1653_vm7, %v19491_v1  ;;  %v6934_v1 = vrot.slane %v17891_v53, 2 }
 0x4ac   :  { %13537 = vmatprep.mubr.msk.f32.mxu1 %vm1653_vm7, %v19492_v13  ;;  %v19511_v13 = vld [vmem:[#allocation34_spill] sm:$0xff] }
 0x4af   :  { %13538 = vmatmul.mubr.msk.f32.gmra.mrb[22].mxu1 %vm1653_vm7, %v19493_v26  ;;  %v19512_v26 = vld [vmem:[#allocation57_spill] sm:$0xff] }
 0x4b0   :  { %13540 = vmatprep.mubr.msk.f32.mxu1 %vm1653_vm7, %v19494_v63 }
 0x4b3   :  { %13541 = vmatmul.mubr.msk.f32.gmra.mrb[24].mxu1 %vm1653_vm7, %v19495_v59  ;;  %v6938_v59 = vrot.slane %v17899_v48, 2 }
 0x4b4   :  { %13543 = vmatprep.mubr.msk.f32.mxu1 %vm1653_vm7, %v19496_v9  ;;  %v6936_v9 = vrot.slane %v17893_v25, 2 }
 0x4b6   :  { %v6939_v57 = vsel %vm2130_vm8, %v6936_v9, %v6938_v59 }
 0x4b7   :  { %13544 = vmatmul.mubr.msk.f32.gmra.mrb[26].mxu1 %vm1653_vm7, %v19497_v11  ;;  %v6937_v11 = vsel %vm2130_vm8, %v6934_v1, %v6936_v9 }
 0x4b8   :  { %13546 = vmatprep.mubr.msk.f32.mxu1 %vm1653_vm7, %v19498_v50  ;;  %v19514_v50 = vld [vmem:[#allocation64_spill] sm:$0xff] }
 0x4bb   :  { %13547 = vmatmul.mubr.msk.f32.gmra.mrb[28].mxu1 %vm1653_vm7, %v19499_v17  ;;  %v19515_v17 = vld [vmem:[#allocation22_spill] sm:$0xff] }
 0x4bc   :  { %13549 = vmatprep.mubr.msk.f32.mxu1 %vm1653_vm7, %v6706_v38  ;;  %v19516_v38 = vld [vmem:[#allocation65_spill] sm:$0xff] }
 0x4bf   :  { %13550 = vmatmul.mubr.msk.f32.gmra.mrb[30].mxu1 %vm1653_vm7, %v6708_v18  ;;  %v19519_v18 = vld [vmem:[#allocation72_spill] sm:$0xff] }
 0x4c0   :  { %13552 = vmatprep.mubr.msk.f32.mxu1 %vm1653_vm7, %v6710_v8  ;;  %v19522_v8 = vld [vmem:[#allocation77_spill] sm:$0xff] }
 0x4c3   :  { %13553 = vmatmul.mubr.msk.f32.gmra.mrb[32].mxu1 %vm1653_vm7, %v6709_v56  ;;  %v19517_v56 = vld [vmem:[#allocation23_spill] sm:$0xff] }
 0x4c4   :  { %13559 = vmatprep.mubr.msk.f32.mxu1 %vm1653_vm7, %v19439_v0  ;;  %v19500_v0 = vld [vmem:[#allocation59_spill] sm:$0xff] }
 0x4c7   :  { %13560 = vmatmul.mubr.msk.f32.vlgmr.msra.gmra.mrb[10].mxu1 %vm1653_vm7, %v19440_v42  ;;  %v19501_v42 = vld [vmem:[#allocation37_spill] sm:$0xff] }
 0x4c8   :  { %13562 = vmatprep.mubr.msk.f32.mxu1 %vm1653_vm7, %v19441_v3  ;;  %14140 = vmatpush3.bf16.msk.msra.mxu1 %vm15549_vm5, %v14135_v46  ;;  %v19502_v3 = vld [vmem:[#allocation18_spill] sm:$0xff]  ;;  %v19504_v46 = vld [vmem:[#allocation19_spill] sm:$0xff] }
 0x4c9   :  { %14143 = vmatprep.subr.msk.bf16.mxu1 %vm15549_vm5, %v14141_v33 }
 0x4cb   :  { %13563 = vmatmul.mubr.msk.f32.gmra.mrb[12].mxu1 %vm1653_vm7, %v19442_v4  ;;  %v19505_v4 = vld [vmem:[#allocation39_spill] sm:$0xff] }
 0x4cc   :  { %13565 = vmatprep.mubr.msk.f32.mxu1 %vm1653_vm7, %v19443_v24  ;;  %v19506_v24 = vld [vmem:[#allocation40_spill] sm:$0xff] }
 0x4cf   :  { %13566 = vmatmul.mubr.msk.f32.gmra.mrb[14].mxu1 %vm1653_vm7, %v19444_v49  ;;  %v19507_v49 = vld [vmem:[#allocation68_spill] sm:$0xff] }
 0x4d0   :  { %13568 = vmatprep.mubr.msk.f32.mxu1 %vm1653_vm7, %v19500_v0 }
 0x4d3   :  { %13569 = vmatmul.mubr.msk.f32.gmra.mrb[16].mxu1 %vm1653_vm7, %v19501_v42 }
 0x4d4   :  { %13571 = vmatprep.mubr.msk.f32.mxu1 %vm1653_vm7, %v19502_v3 }
 0x4d7   :  { %13572 = vmatmul.mubr.msk.f32.gmra.mrb[18].mxu1 %vm1653_vm7, %v19503_v40 }
 0x4d8   :  { %13574 = vmatprep.mubr.msk.f32.mxu1 %vm1653_vm7, %v19504_v46  ;;  %v19532_v46 = vld [vmem:[#allocation45_spill] sm:$0xff] }
 0x4db   :  { %13575 = vmatmul.mubr.msk.f32.gmra.mrb[20].mxu1 %vm1653_vm7, %v19505_v4 }
 0x4dc   :  { %13577 = vmatprep.mubr.msk.f32.mxu1 %vm1653_vm7, %v19506_v24 }
 0x4df   :  { %13578 = vmatmul.mubr.msk.f32.gmra.mrb[22].mxu1 %vm1653_vm7, %v19356_v37  ;;  %v19513_v37 = vld [vmem:[#allocation14_spill] sm:$0xff] }
 0x4e0   :  { %13580 = vmatprep.mubr.msk.f32.mxu1 %vm1653_vm7, %v19507_v49  ;;  %v6935_v63 = vsel %vm2130_vm8, %v19513_v37, %v6934_v1  ;;  %v19533_v49 = vld [vmem:[#allocation82_spill] sm:$0xff]  ;;  %v19534_v1 = vld [vmem:[#allocation83_spill] sm:$0xff]  ;;  %v19535_v37 = vld [vmem:[#allocation84_spill] sm:$0xff] }
 0x4e3   :  { %13581 = vmatmul.mubr.msk.f32.gmra.mrb[24].mxu1 %vm1653_vm7, %v19508_v21 }
 0x4e4   :  { %13583 = vmatprep.mubr.msk.f32.mxu1 %vm1653_vm7, %v19509_v62 }
 0x4e7   :  { %13584 = vmatmul.mubr.msk.f32.gmra.mrb[26].mxu1 %vm1653_vm7, %v19510_v2 }
 0x4e8   :  { %13586 = vmatprep.mubr.msk.f32.mxu1 %vm1653_vm7, %v19511_v13 }
 0x4eb   :  { %13587 = vmatmul.mubr.msk.f32.gmra.mrb[28].mxu1 %vm1653_vm7, %v19512_v26 }
 0x4ec   :  { %13589 = vmatprep.mubr.msk.f32.mxu1 %vm1653_vm7, %v6935_v63 }
 0x4ef   :  { %13590 = vmatmul.mubr.msk.f32.gmra.mrb[30].mxu1 %vm1653_vm7, %v6937_v11  ;;  %v19536_v11 = vld [vmem:[#allocation85_spill] sm:$0xff] }
 0x4f0   :  { %13592 = vmatprep.mubr.msk.f32.mxu1 %vm1653_vm7, %v6939_v57 }
 0x4f3   :  { %13593 = vmatmul.mubr.msk.f32.gmra.mrb[32].mxu1 %vm1653_vm7, %v6938_v59 }
 0x4f4   :  { %13599 = vmatprep.mubr.msk.f32.mxu1 %vm1653_vm7, %v19514_v50 }
 0x4f7   :  { %13600 = vmatmul.mubr.msk.f32.vlgmr.msra.gmra.mrb[10].mxu1 %vm1653_vm7, %v19515_v17  ;;  %v19537_v17 = vld [vmem:[#allocation86_spill] sm:$0xff] }
 0x4f8   :  { %13602 = vmatprep.mubr.msk.f32.mxu1 %vm1653_vm7, %v19463_v10  ;;  %14146 = vmatpush3.bf16.msk.msra.mxu1 %vm15549_vm5, %v14141_v33  ;;  %v19521_v10 = vld [vmem:[#allocation75_spill] sm:$0xff] }
 0x4fb   :  { %13603 = vmatmul.mubr.msk.f32.gmra.mrb[12].mxu1 %vm1653_vm7, %v19516_v38 }
 0x4fc   :  { %13605 = vmatprep.mubr.msk.f32.mxu1 %vm1653_vm7, %v19517_v56 }
 0x4ff   :  { %13606 = vmatmul.mubr.msk.f32.gmra.mrb[14].mxu1 %vm1653_vm7, %v19466_v51  ;;  %v19523_v51 = vld [vmem:[#allocation62_spill] sm:$0xff] }
 0x500   :  { %13608 = vmatprep.mubr.msk.f32.mxu1 %vm1653_vm7, %v19518_v45 }
 0x503   :  { %13609 = vmatmul.mubr.msk.f32.gmra.mrb[16].mxu1 %vm1653_vm7, %v19468_v52  ;;  %v19524_v52 = vld [vmem:[#allocation20_spill] sm:$0xff] }
 0x504   :  { %13611 = vmatprep.mubr.msk.f32.mxu1 %vm1653_vm7, %v19519_v18  ;;  %v19538_v18 = vld [vmem:[#allocation87_spill] sm:$0xff] }
 0x507   :  { %13612 = vmatmul.mubr.msk.f32.gmra.mrb[18].mxu1 %vm1653_vm7, %v19520_v5 }
 0x508   :  { %13614 = vmatprep.mubr.msk.f32.mxu1 %vm1653_vm7, %v19375_v19  ;;  %v7163_v19 = vrot.slane %v17891_v53, 3 }
 0x50b   :  { %13615 = vmatmul.mubr.msk.f32.gmra.mrb[20].mxu1 %vm1653_vm7, %v19521_v10 }
 0x50c   :  { %13617 = vmatprep.mubr.msk.f32.mxu1 %vm1653_vm7, %v19522_v8  ;;  %v19539_v8 = vld [vmem:[#allocation88_spill] sm:$0xff] }
 0x50f   :  { %13618 = vmatmul.mubr.msk.f32.gmra.mrb[22].mxu1 %vm1653_vm7, %v19378_v6  ;;  %v7164_v6 = vsel %vm774_vm1, %v17742_v54, %v7163_v19 }
 0x510   :  { %13620 = vmatprep.mubr.msk.f32.mxu1 %vm1653_vm7, %v19523_v51 }
 0x513   :  { %13621 = vmatmul.mubr.msk.f32.gmra.mrb[24].mxu1 %vm1653_vm7, %v19524_v52 }
 0x514   :  { %13623 = vmatprep.mubr.msk.f32.mxu1 %vm1653_vm7, %v17325_v22  ;;  %v7165_v22 = vrot.slane %v17893_v25, 3 }
 0x516   :  { %v7166_v33 = vsel %vm774_vm1, %v7163_v19, %v7165_v22  ;;  %v7168_v0 = vsel %vm774_vm1, %v7165_v22, %v7167_v28  ;;  %v19540_v19 = vld [vmem:[#allocation80_spill] sm:$0xff]  ;;  %v19541_v22 = vld [vmem:[#allocation81_spill] sm:$0xff] }
 0x517   :  { %13624 = vmatmul.mubr.msk.f32.gmra.mrb[26].mxu1 %vm1653_vm7, %v19525_v35 }
 0x518   :  { %13626 = vmatprep.mubr.msk.f32.mxu1 %vm1653_vm7, %v17747_v12  ;;  %v19529_v12 = vld [vmem:[#allocation31_spill] sm:$0xff] }
 0x51b   :  { %13627 = vmatmul.mubr.msk.f32.gmra.mrb[28].mxu1 %vm1653_vm7, %v17753_v41 }
 0x51c   :  { %13629 = vmatprep.mubr.msk.f32.mxu1 %vm1653_vm7, %v7164_v6 }
 0x51f   :  { %13630 = vmatmul.mubr.msk.f32.gmra.mrb[30].mxu1 %vm1653_vm7, %v7166_v33 }
 0x520   :  { %13632 = vmatprep.mubr.msk.f32.mxu1 %vm1653_vm7, %v7168_v0 }
 0x523   :  { %13633 = vmatmul.mubr.msk.f32.gmra.mrb[32].mxu1 %vm1653_vm7, %v7167_v28 }
 0x524   :  { %13639 = vmatprep.mubr.msk.f32.mxu1 %vm1653_vm7, %v16733_v29  ;;  %v7392_v29 = vrot.slane %v17891_v53, 4 }
 0x527   :  { %13640 = vmatmul.mubr.msk.f32.vlgmr.msra.gmra.mrb[10].mxu1 %vm1653_vm7, %v16741_v30  ;;  %v7396_v30 = vrot.slane %v17899_v48, 4  ;;  %v19531_v48 = vld [vmem:[#allocation12_spill] sm:$0xff] }
 0x528   :  { %13642 = vmatprep.mubr.msk.f32.mxu1 %vm1653_vm7, %v16749_v20  ;;  %v7394_v20 = vrot.slane %v17893_v25, 4 }
 0x52b   :  { %13643 = vmatmul.mubr.msk.f32.gmra.mrb[12].mxu1 %vm1653_vm7, %v16757_v7  ;;  %v7395_v7 = vsel %vm773_vm0, %v7392_v29, %v7394_v20 }
 0x52c   :  { %13645 = vmatprep.mubr.msk.f32.mxu1 %vm1653_vm7, %v16767_v23  ;;  %v7393_v23 = vsel %vm773_vm0, %v17816_v44, %v7392_v29 }
 0x52f   :  { %13646 = vmatmul.mubr.msk.f32.gmra.mrb[14].mxu1 %vm1653_vm7, %v16776_v39  ;;  %v7397_v39 = vsel %vm773_vm0, %v7394_v20, %v7396_v30 }
 0x530   :  { %13648 = vmatprep.mubr.msk.f32.mxu1 %vm1653_vm7, %v16791_v60  ;;  %v15052_v60 = vmov 0.0|0.0  }
 0x531   :  { %14147 = vmatprep.subr.bf16.mxu0 %v15052_v60  ;;  %14184 = vmatprep.subr.bf16.mxu1 %v15052_v60 }
 0x533   :  { %13649 = vmatmul.mubr.msk.f32.gmra.mrb[16].mxu1 %vm1653_vm7, %v16803_v32  ;;  %v7619_v32 = vld [vmem:[%s18853_s5 + $0x8] sm:$0xff] }
 0x534   :  { %13651 = vmatprep.mubr.msk.f32.mxu1 %vm1653_vm7, %v16813_v61  ;;  %11484 = vmatprep.mubr.msk.f32.mxu0 %vm7650_vm9, %v7619_v32 }
 0x537   :  { %13652 = vmatmul.mubr.msk.f32.gmra.mrb[18].mxu1 %vm1653_vm7, %v16824_v43  ;;  %v19526_v43 = vld [vmem:[#allocation74_spill] sm:$0xff] }
 0x538   :  { %13654 = vmatprep.mubr.msk.f32.mxu1 %vm1653_vm7, %v16832_v31 }
 0x53b   :  { %13655 = vmatmul.mubr.msk.f32.gmra.mrb[20].mxu1 %vm1653_vm7, %v16840_v27 }
 0x53c   :  { %13657 = vmatprep.mubr.msk.f32.mxu1 %vm1653_vm7, %v16850_v15  ;;  %v19527_v15 = vld [vmem:[#allocation78_spill] sm:$0xff] }
 0x53f   :  { %13658 = vmatmul.mubr.msk.f32.gmra.mrb[22].mxu1 %vm1653_vm7, %v16858_v55 }
 0x540   :  { %13660 = vmatprep.mubr.msk.f32.mxu1 %vm1653_vm7, %v17385_v34 }
 0x543   :  { %13661 = vmatmul.mubr.msk.f32.gmra.mrb[24].mxu1 %vm1653_vm7, %v17393_v47  ;;  %v19528_v47 = vld [vmem:[#allocation76_spill] sm:$0xff] }
 0x544   :  { %13663 = vmatprep.mubr.msk.f32.mxu1 %vm1653_vm7, %v17399_v16 }
 0x547   :  { %13664 = vmatmul.mubr.msk.f32.gmra.mrb[26].mxu1 %vm1653_vm7, %v17813_v36 }
 0x548   :  { %13666 = vmatprep.mubr.msk.f32.mxu1 %vm1653_vm7, %v17821_v58 }
 0x54b   :  { %13667 = vmatmul.mubr.msk.f32.gmra.mrb[28].mxu1 %vm1653_vm7, %v17827_v14  ;;  %v19530_v14 = vld [vmem:[#allocation79_spill] sm:$0xff] }
 0x54c   :  { %13669 = vmatprep.mubr.msk.f32.mxu1 %vm1653_vm7, %v7393_v23  ;;  %v19542_v23 = vld [vmem:[#allocation69_spill] sm:$0xff] }
 0x54f   :  { %13670 = vmatmul.mubr.msk.f32.gmra.mrb[30].mxu1 %vm1653_vm7, %v7395_v7  ;;  %v19543_v7 = vld [vmem:[#allocation70_spill] sm:$0xff] }
 0x550   :  { %13672 = vmatprep.mubr.msk.f32.mxu1 %vm1653_vm7, %v7397_v39 }
 0x553   :  { %13673 = vmatmul.mubr.msk.f32.gmra.mrb[32].mxu1 %vm1653_vm7, %v7396_v30 }
 0x5fa   :  { %v13641_v61 = vpop.f32.mrb[10].mxu1 }
 0x5fb   :  { %v14300_v31 = vadd.f32 %v13641_v61, %v19526_v43  ;;  %v7475_v27 = vpop.f32.mrb[11].mxu1  ;;  %v19544_v43 = vld [vmem:[#allocation71_spill] sm:$0xff] }
 0x5fc   :  { %v14301_v55 = vadd.f32 %v7475_v27, %v19527_v15  ;;  %v19545_v15 = vld [vmem:[#allocation46_spill] sm:$0xff] }
 0x5fe   :  { %v14148_v41 = vpack.c.bf16 %v14300_v31, %v14301_v55  ;;  %v13644_v34 = vpop.f32.mrb[12].mxu1 }
 0x5ff   :  { %v14302_v16 = vadd.f32 %v13644_v34, %v19528_v47  ;;  %v7485_v54 = vpop.f32.mrb[13].mxu1  ;;  %v19546_v47 = vld [vmem:[#allocation47_spill] sm:$0xff] }
 0x600   :  { %v14303_v36 = vadd.f32 %v7485_v54, %v19529_v12  ;;  %14149 = vmatpush1.bf16.msra.mxu0 %v14148_v41  ;;  %v19547_v12 = vld [vmem:[#allocation25_spill] sm:$0xff] }
 0x601   :  { %14150 = vmatprep.subr.bf16.mxu0 %v15052_v60 }
 0x602   :  { %v14151_v44 = vpack.c.bf16 %v14302_v16, %v14303_v36  ;;  %v13647_v58 = vpop.f32.mrb[14].mxu1 }
 0x603   :  { %v14304_v53 = vadd.f32 %v13647_v58, %v19530_v14  ;;  %v7495_v25 = vpop.f32.mrb[15].mxu1  ;;  %v19548_v14 = vld [vmem:[#allocation48_spill] sm:$0xff] }
 0x604   :  { %v14305_v42 = vadd.f32 %v7495_v25, %v19531_v48  ;;  %14152 = vmatpush1.bf16.msra.mxu0 %v14151_v44  ;;  %v19549_v48 = vld [vmem:[#allocation5_spill] sm:$0xff] }
 0x605   :  { %14153 = vmatprep.subr.bf16.mxu0 %v15052_v60 }
 0x606   :  { %v14154_v3 = vpack.c.bf16 %v14304_v53, %v14305_v42  ;;  %v13650_v40 = vpop.f32.mrb[16].mxu1 }
 0x607   :  { %v14306_v4 = vadd.f32 %v13650_v40, %v19532_v46  ;;  %v7505_v24 = vpop.f32.mrb[17].mxu1  ;;  %v11504_v40 = vld [vmem:[%s18854_s6 + $0x20] sm:$0xff] }
 0x608   :  { %v14307_v21 = vadd.f32 %v7505_v24, %v19533_v49  ;;  %14155 = vmatpush1.bf16.msra.mxu0 %v14154_v3  ;;  %v11503_v3 = vld [vmem:[%s18854_s6 + $0x18] sm:$0xff] }
 0x609   :  { %14156 = vmatprep.subr.bf16.mxu0 %v15052_v60  ;;  %v18181_v24 = vpack.c.bf16 %v11504_v40, %v11503_v3  ;;  %v7621_v49 = vld [vmem:[%s18853_s5 + $0x18] sm:$0xff] }
 0x60a   :  { %v14157_v62 = vpack.c.bf16 %v14306_v4, %v14307_v21  ;;  %v13653_v2 = vpop.f32.mrb[18].mxu1  ;;  %v7618_v4 = vld [vmem:[%s18853_s5] sm:$0xff]  ;;  %v7620_v21 = vld [vmem:[%s18853_s5 + $0x10] sm:$0xff] }
 0x60b   :  { %v14308_v13 = vadd.f32 %v13653_v2, %v19534_v1  ;;  %v7515_v26 = vpop.f32.mrb[19].mxu1  ;;  %v7622_v2 = vld [vmem:[%s18853_s5 + $0x20] sm:$0xff]  ;;  %v7625_v1 = vld [vmem:[%s18853_s5 + $0x38] sm:$0xff] }
 0x60c   :  { %v14309_v63 = vadd.f32 %v7515_v26, %v19535_v37  ;;  %14158 = vmatpush1.bf16.msra.mxu0 %v14157_v62  ;;  %v7623_v62 = vld [vmem:[%s18853_s5 + $0x28] sm:$0xff]  ;;  %v7626_v37 = vld [vmem:[%s18853_s5 + $0x40] sm:$0xff] }
 0x60d   :  { %14159 = vmatprep.subr.bf16.mxu0 %v15052_v60  ;;  %v7627_v26 = vld [vmem:[%s18853_s5 + $0x48] sm:$0xff] }
 0x60e   :  { %v14160_v59 = vpack.c.bf16 %v14308_v13, %v14309_v63  ;;  %v13656_v9 = vpop.f32.mrb[20].mxu1  ;;  %v7624_v13 = vld [vmem:[%s18853_s5 + $0x30] sm:$0xff]  ;;  %v7629_v63 = vld [vmem:[%s18853_s5 + $0x58] sm:$0xff] }
 0x60f   :  { %v14310_v57 = vadd.f32 %v13656_v9, %v19536_v11  ;;  %v7525_v50 = vpop.f32.mrb[21].mxu1  ;;  %v7631_v9 = vld [vmem:[%s18853_s5 + $0x68] sm:$0xff]  ;;  %v7630_v11 = vld [vmem:[%s18853_s5 + $0x60] sm:$0xff] }
 0x610   :  { %v14311_v38 = vadd.f32 %v7525_v50, %v19537_v17  ;;  %14161 = vmatpush1.bf16.msra.mxu0 %v14160_v59  ;;  %v7628_v59 = vld [vmem:[%s18853_s5 + $0x50] sm:$0xff]  ;;  %v7635_v17 = vld [vmem:[%s18853_s5 + $0x88] sm:$0xff] }
 0x611   :  { %14162 = vmatprep.subr.bf16.mxu0 %v15052_v60  ;;  %v7632_v50 = vld [vmem:[%s18853_s5 + $0x70] sm:$0xff] }
 0x612   :  { %v14163_v56 = vpack.c.bf16 %v14310_v57, %v14311_v38  ;;  %v13659_v45 = vpop.f32.mrb[22].mxu1  ;;  %v7633_v57 = vld [vmem:[%s18853_s5 + $0x78] sm:$0xff]  ;;  %v7634_v38 = vld [vmem:[%s18853_s5 + $0x80] sm:$0xff] }
 0x613   :  { %v14312_v5 = vadd.f32 %v13659_v45, %v19538_v18  ;;  %v7535_v10 = vpop.f32.mrb[23].mxu1  ;;  %v7636_v45 = vld [vmem:[%s18853_s5 + $0x90] sm:$0xff]  ;;  %v7639_v18 = vld [vmem:[%s18853_s5 + $0xa8] sm:$0xff] }
 0x614   :  { %v14313_v51 = vadd.f32 %v7535_v10, %v19539_v8  ;;  %14164 = vmatpush1.bf16.msra.mxu0 %v14163_v56  ;;  %v7637_v56 = vld [vmem:[%s18853_s5 + $0x98] sm:$0xff]  ;;  %v7640_v8 = vld [vmem:[%s18853_s5 + $0xb0] sm:$0xff] }
 0x615   :  { %14165 = vmatprep.subr.bf16.mxu0 %v15052_v60  ;;  %v7641_v10 = vld [vmem:[%s18853_s5 + $0xb8] sm:$0xff] }
 0x616   :  { %v14166_v52 = vpack.c.bf16 %v14312_v5, %v14313_v51  ;;  %v13662_v35 = vpop.f32.mrb[24].mxu1  ;;  %v7638_v5 = vld [vmem:[%s18853_s5 + $0xa0] sm:$0xff]  ;;  %v7643_v51 = vld [vmem:[%s18853_s5 + $0xc8] sm:$0xff] }
 0x617   :  { %v14315_v6 = vadd.f32 %v19540_v19, %v13662_v35  ;;  %v7545_v28 = vpop.f32.mrb[25].mxu1  ;;  %v7645_v35 = vld [vmem:[%s18853_s5 + $0xd8] sm:$0xff]  ;;  %v7644_v19 = vld [vmem:[%s18853_s5 + $0xd0] sm:$0xff] }
 0x618   :  { %v14317_v33 = vadd.f32 %v19541_v22, %v7545_v28  ;;  %14167 = vmatpush1.bf16.msra.mxu0 %v14166_v52  ;;  %v7642_v52 = vld [vmem:[%s18853_s5 + $0xc0] sm:$0xff]  ;;  %v7649_v22 = vld [vmem:[%s18853_s5 + $0xf8] sm:$0xff] }
 0x619   :  { %14168 = vmatprep.subr.bf16.mxu0 %v15052_v60  ;;  %v7646_v28 = vld [vmem:[%s18853_s5 + $0xe0] sm:$0xff] }
 0x61a   :  { %v14169_v0 = vpack.c.bf16 %v14315_v6, %v14317_v33  ;;  %v13665_v29 = vpop.f32.mrb[26].mxu1  ;;  %v7647_v6 = vld [vmem:[%s18853_s5 + $0xe8] sm:$0xff]  ;;  %v7648_v33 = vld [vmem:[%s18853_s5 + $0xf0] sm:$0xff] }
 0x61b   :  { %v14319_v30 = vadd.f32 %v19542_v23, %v13665_v29  ;;  %v7555_v20 = vpop.f32.mrb[27].mxu1  ;;  %v11505_v29 = vld [vmem:[%s18854_s6 + $0x28] sm:$0xf]  ;;  %v7865_v23 = vld [vmem:[%s18854_s6] sm:$0xff] }
 0x61c   :  { %v14321_v39 = vadd.f32 %v19543_v7, %v7555_v20  ;;  %14170 = vmatpush1.bf16.msra.mxu0 %v14169_v0  ;;  %v15053_v0 = vmov 0.0   ;;  %v7867_v7 = vld [vmem:[%s18854_s6 + $0x10] sm:$0xf] }
 0x61d   :  { %14171 = vmatprep.subr.bf16.mxu0 %v15052_v60  ;;  %13681 = vmatprep.mubr.msk.f32.mxu1 %vm15054_vm11, %v15053_v0 }
 0x61e   :  { %v14172_v32 = vpack.c.bf16 %v14319_v30, %v14321_v39  ;;  %v13668_v61 = vpop.f32.mrb[28].mxu1  ;;  %v7866_v30 = vld [vmem:[%s18854_s6 + $0x8] sm:$0xff] }
 0x61f   :  { %v14323_v31 = vadd.f32 %v19544_v43, %v13668_v61  ;;  %v7565_v27 = vpop.f32.mrb[29].mxu1  ;;  %v18302_v20 = vpack.c.bf16 %v7866_v30, %v7865_v23  ;;  %v11515_v30 = vld [vmem:[%s18854_s6 + $0x58] sm:$0xf] }
 0x620   :  { %v14325_v55 = vadd.f32 %v19545_v15, %v7565_v27  ;;  %14173 = vmatpush1.bf16.msra.mxu0 %v14172_v32 }
 0x621   :  { %14174 = vmatprep.subr.bf16.mxu0 %v15052_v60  ;;  %14186 = vmatpush3.bf16.msra.mxu1 %v18302_v20 }
 0x622   :  { %v14175_v41 = vpack.c.bf16 %v14323_v31, %v14325_v55  ;;  %v13671_v34 = vpop.f32.mrb[30].mxu1  ;;  %13679 = vmatprep.subr.mxu1 %v15053_v0 }
 0x623   :  { %v14327_v16 = vadd.f32 %v19546_v47, %v13671_v34  ;;  %v7575_v54 = vpop.f32.mrb[31].mxu1 }
 0x624   :  { %v14329_v36 = vadd.f32 %v19547_v12, %v7575_v54  ;;  %14176 = vmatpush1.bf16.msra.mxu0 %v14175_v41 }
 0x625   :  { %14177 = vmatprep.subr.bf16.mxu0 %v15052_v60  ;;  %13680 = vmatpush3.msk.msra.mxu1 %vm773_vm0, %v7867_v7  ;;  %v11518_v7 = vld [vmem:[%s18854_s6 + $0x60] sm:$0xff] }
 0x626   :  { %v14178_v44 = vpack.c.bf16 %v14327_v16, %v14329_v36  ;;  %v13674_v58 = vpop.f32.mrb[32].mxu1 }
 0x627   :  { %v14331_v53 = vadd.f32 %v19548_v14, %v13674_v58  ;;  %v7585_v25 = vpop.f32.mrb[33].mxu1 }
 0x628   :  { %v14333_v42 = vadd.f32 %v19549_v48, %v7585_v25  ;;  %14179 = vmatpush1.bf16.msra.mxu0 %v14178_v44 }
 0x629   :  { %14180 = vmatprep.subr.bf16.mxu0 %v15052_v60 }
 0x62a   :  { %v14181_v46 = vpack.c.bf16 %v14331_v53, %v14333_v42 }
 0x62c   :  { %14183 = vmatpush1.bf16.msk.msra.mxu0 %vm14182_vm10, %v14181_v46 }
 0x62d   :  { %14187 = vmatprep.subr.bf16.mxu0 %v15052_v60 }
 0x62f   :  { %7767 = vmatmul.mubr.f32.vlgmr.msra.gmra.mrb[168].mxu0 %v7618_v4 }
 0x630   :  { %11485 = vmatprep.mubr.msk.f32.mxu0 %vm7650_vm9, %v7621_v49  ;;  %14189 = vmatpush3.bf16.msra.mxu0 %v18181_v24 }
 0x631   :  { %13688 = vmatprep.subr.mxu0 %v15053_v0 }
 0x633   :  { %7772 = vmatmul.mubr.f32.gmra.mrb[170].mxu0 %v7620_v21 }
 0x634   :  { %11486 = vmatprep.mubr.msk.f32.mxu0 %vm7650_vm9, %v7623_v62  ;;  %13689 = vmatpush3.msk.msra.mxu0 %vm773_vm0, %v11505_v29 }
 0x635   :  { %14190 = vmatprep.subr.bf16.mxu0 %v15052_v60 }
 0x637   :  { %7777 = vmatmul.mubr.f32.gmra.mrb[172].mxu0 %v7622_v2 }
 0x638   :  { %11487 = vmatprep.mubr.msk.f32.mxu0 %vm7650_vm9, %v7625_v1 }
 0x63b   :  { %7782 = vmatmul.mubr.f32.gmra.mrb[174].mxu0 %v7624_v13  ;;  %v18317_v13 = vld [vmem:[%s18852_s4] ss:$0 sm:$0xff]  ;;  %s15055_s4 = smov [#allocation2]  }
 0x63c   :  { %11488 = vmatprep.mubr.msk.f32.mxu0 %vm7650_vm9, %v7627_v26  ;;  %s10655_s13 = sshll.u32 %s15055_s4, 4  ;;  %s10656_s13 = int_to_ptr.vmem [resolvable:$true] %s10655_s13 }
 0x63d   :  { %p15031_p1 = scmp.lt.s32.totalorder %s10656_s13, %s10656_s13 }
 0x63f   :  { %7787 = vmatmul.mubr.f32.gmra.mrb[176].mxu0 %v7626_v37 }
 0x640   :  { %11489 = vmatprep.mubr.msk.f32.mxu0 %vm7650_vm9, %v7629_v63 }
 0x643   :  { %7792 = vmatmul.mubr.f32.gmra.mrb[178].mxu0 %v7628_v59 }
 0x644   :  { %11490 = vmatprep.mubr.msk.f32.mxu0 %vm7650_vm9, %v7631_v9 }
 0x647   :  { %7797 = vmatmul.mubr.f32.gmra.mrb[180].mxu0 %v7630_v11  ;;  %v11508_v11 = vld [vmem:[%s18854_s6 + $0x30] sm:$0xff] }
 0x648   :  { %11491 = vmatprep.mubr.msk.f32.mxu0 %vm7650_vm9, %v7633_v57  ;;  %v11509_v57 = vld [vmem:[%s18854_s6 + $0x38] sm:$0xff] }
 0x64b   :  { %7802 = vmatmul.mubr.f32.gmra.mrb[182].mxu0 %v7632_v50 }
 0x64c   :  { %11492 = vmatprep.mubr.msk.f32.mxu0 %vm7650_vm9, %v7635_v17 }
 0x64f   :  { %7807 = vmatmul.mubr.f32.gmra.mrb[184].mxu0 %v7634_v38 }
 0x650   :  { %11493 = vmatprep.mubr.msk.f32.mxu0 %vm7650_vm9, %v7637_v56  ;;  %v18330_v56 = vpack.c.bf16 %v11509_v57, %v11508_v11 }
 0x653   :  { %7812 = vmatmul.mubr.f32.gmra.mrb[186].mxu0 %v7636_v45 }
 0x654   :  { %11494 = vmatprep.mubr.msk.f32.mxu0 %vm7650_vm9, %v7639_v18 }
 0x657   :  { %7817 = vmatmul.mubr.f32.gmra.mrb[188].mxu0 %v7638_v5 }
 0x658   :  { %11495 = vmatprep.mubr.msk.f32.mxu0 %vm7650_vm9, %v7641_v10 }
 0x65b   :  { %7822 = vmatmul.mubr.f32.gmra.mrb[190].mxu0 %v7640_v8 }
 0x65c   :  { %11496 = vmatprep.mubr.msk.f32.mxu0 %vm7650_vm9, %v7643_v51 }
 0x65f   :  { %7827 = vmatmul.mubr.f32.gmra.mrb[192].mxu0 %v7642_v52 }
 0x660   :  { %11497 = vmatprep.mubr.msk.f32.mxu0 %vm7650_vm9, %v7645_v35  ;;  %v11510_v35 = vld [vmem:[%s18854_s6 + $0x40] sm:$0xf] }
 0x663   :  { %7832 = vmatmul.mubr.f32.gmra.mrb[194].mxu0 %v7644_v19  ;;  %v11513_v19 = vld [vmem:[%s18854_s6 + $0x48] sm:$0xff] }
 0x664   :  { %11498 = vmatprep.mubr.msk.f32.mxu0 %vm7650_vm9, %v7647_v6  ;;  %v11514_v6 = vld [vmem:[%s18854_s6 + $0x50] sm:$0xff] }
 0x667   :  { %7837 = vmatmul.mubr.f32.gmra.mrb[196].mxu0 %v7646_v28 }
 0x668   :  { %11499 = vmatprep.mubr.msk.f32.mxu0 %vm7650_vm9, %v7649_v22 }
 0x66b   :  { %7842 = vmatmul.mubr.f32.gmra.mrb[198].mxu0 %v7648_v33  ;;  %v18353_v33 = vpack.c.bf16 %v11514_v6, %v11513_v19  ;;  %v11565_v19 = vld [vmem:[%s18854_s6 + $0x148] sm:$0xf]  ;;  %v11568_v6 = vld [vmem:[%s18854_s6 + $0x150] sm:$0xff] }
 0x66c   :  { %13690 = vmatprep.mubr.msk.f32.mxu0 %vm15054_vm11, %v15053_v0 }
 0x702   :  { %v7768_v39 = vpop.f32.mrb[168].mxu0 }
 0x703   :  { %v7770_v32 = vpop.f32.mrb[169].mxu0 }
 0x706   :  { %v7773_v61 = vpop.f32.mrb[170].mxu0 }
 0x707   :  { %v7775_v43 = vpop.f32.mrb[171].mxu0 }
 0x708   :  { %v11520_v43 = vld [vmem:[%s18854_s6 + $0x70] sm:$0xf] }
 0x70a   :  { %v7778_v31 = vpop.f32.mrb[172].mxu0 }
 0x70b   :  { %v7780_v27 = vpop.f32.mrb[173].mxu0 }
 0x70c   :  { %v11524_v27 = vld [vmem:[%s18854_s6 + $0x80] sm:$0xff] }
 0x70e   :  { %v7783_v15 = vpop.f32.mrb[174].mxu0 }
 0x70f   :  { %v7785_v55 = vpop.f32.mrb[175].mxu0 }
 0x712   :  { %v7788_v41 = vpop.f32.mrb[176].mxu0 }
 0x713   :  { %v7849_v34 = vmax.f32 %v7768_v39, %v7788_v41  ;;  %v7790_v47 = vpop.f32.mrb[177].mxu0  ;;  %v11519_v39 = vld [vmem:[%s18854_s6 + $0x68] sm:$0xff] }
 0x714   :  { %v18375_v32 = vpack.c.bf16 %v11519_v39, %v11518_v7  ;;  %v11525_v41 = vld [vmem:[%s18854_s6 + $0x88] sm:$0xf]  ;;  %v11529_v47 = vld [vmem:[%s18854_s6 + $0x98] sm:$0xff]  ;;  %v11574_v39 = vld [vmem:[%s18854_s6 + $0x170] sm:$0xff] }
 0x715   :  { %v11573_v7 = vld [vmem:[%s18854_s6 + $0x168] sm:$0xff] }
 0x716   :  { %v7793_v16 = vpop.f32.mrb[178].mxu0 }
 0x717   :  { %v7850_v54 = vmax.f32 %v7773_v61, %v7793_v16  ;;  %v7795_v12 = vpop.f32.mrb[179].mxu0 }
 0x718   :  { %v11530_v12 = vld [vmem:[%s18854_s6 + $0xa0] sm:$0xf] }
 0x71a   :  { %v7798_v36 = vpop.f32.mrb[180].mxu0 }
 0x71b   :  { %v9261_v44 = vmax.f32 %v7778_v31, %v7798_v36  ;;  %v7800_v58 = vpop.f32.mrb[181].mxu0  ;;  %v11523_v31 = vld [vmem:[%s18854_s6 + $0x78] sm:$0xff]  ;;  %v11533_v36 = vld [vmem:[%s18854_s6 + $0xa8] sm:$0xff] }
 0x71e   :  { %v7803_v14 = vpop.f32.mrb[182].mxu0 }
 0x71f   :  { %v9262_v53 = vmax.f32 %v7783_v15, %v7803_v14  ;;  %v7805_v25 = vpop.f32.mrb[183].mxu0  ;;  %v18394_v15 = vpack.c.bf16 %v11524_v27, %v11523_v31  ;;  %v11575_v31 = vld [vmem:[%s18854_s6 + $0x178] sm:$0xf]  ;;  %v9162_v27 = vld [vmem:[%s18856_s8] sm:$0xff] }
 0x720   :  { %v11538_v25 = vld [vmem:[%s18854_s6 + $0xc0] sm:$0xff] }
 0x722   :  { %v7808_v48 = vpop.f32.mrb[184].mxu0 }
 0x723   :  { %v7810_v42 = vpop.f32.mrb[185].mxu0 }
 0x726   :  { %v7813_v3 = vpop.f32.mrb[186].mxu0 }
 0x727   :  { %v7815_v40 = vpop.f32.mrb[187].mxu0 }
 0x72a   :  { %v7818_v46 = vpop.f32.mrb[188].mxu0 }
 0x72b   :  { %v7820_v4 = vpop.f32.mrb[189].mxu0 }
 0x72c   :  { %v11543_v4 = vld [vmem:[%s18854_s6 + $0xd8] sm:$0xff] }
 0x72e   :  { %v7823_v49 = vpop.f32.mrb[190].mxu0 }
 0x72f   :  { %v7825_v21 = vpop.f32.mrb[191].mxu0 }
 0x732   :  { %v7828_v62 = vpop.f32.mrb[192].mxu0 }
 0x733   :  { %v7851_v2 = vmax.f32 %v7808_v48, %v7828_v62  ;;  %v7830_v1 = vpop.f32.mrb[193].mxu0  ;;  %v11539_v48 = vld [vmem:[%s18854_s6 + $0xc8] sm:$0xff] }
 0x734   :  { %v18451_v42 = vpack.c.bf16 %v11539_v48, %v11538_v25  ;;  %v11548_v1 = vld [vmem:[%s18854_s6 + $0xf0] sm:$0xff] }
 0x735   :  { %v7853_v26 = vmax.f32 %v7849_v34, %v7851_v2  ;;  %v11528_v34 = vld [vmem:[%s18854_s6 + $0x90] sm:$0xff]  ;;  %v11545_v2 = vld [vmem:[%s18854_s6 + $0xe8] sm:$0xf] }
 0x736   :  { %v7833_v37 = vpop.f32.mrb[194].mxu0  ;;  %v18413_v16 = vpack.c.bf16 %v11529_v47, %v11528_v34  ;;  %v9164_v47 = vld [vmem:[%s18856_s8 + $0x10] sm:$0xff] }
 0x737   :  { %v7861_v63 = vadd.f32 %v18317_v13, %v7853_v26  ;;  %v7852_v59 = vmax.f32 %v7813_v3, %v7833_v37  ;;  %v7835_v9 = vpop.f32.mrb[195].mxu0 }
 0x738   :  { %v11554_v9 = vld [vmem:[%s18854_s6 + $0x110] sm:$0xff] }
 0x739   :  { %v18326_v50 = vmax.f32 %v7861_v63, 0.0  ;;  %v18328_v17 = vmax.f32 %v7850_v54, %v7852_v59  ;;  %v11550_v63 = vld [vmem:[%s18854_s6 + $0x100] sm:$0xf]  ;;  %v11553_v59 = vld [vmem:[%s18854_s6 + $0x108] sm:$0xff] }
 0x73a   :  { %v7838_v38 = vpop.f32.mrb[196].mxu0  ;;  %v18512_v11 = vpack.c.bf16 %v11554_v9, %v11553_v59 }
 0x73b   :  { %v9263_v45 = vmax.f32 %v7818_v46, %v7838_v38  ;;  %13682 = vmatmul.mubr.msk.f32.vlgmr.msra.gmra.mrb[34].mxu1 %vm7868_vm12, %v18326_v50  ;;  %v7840_v18 = vpop.f32.mrb[197].mxu0  ;;  %v7950_v5 = vrot.slane %v18326_v50, 1  ;;  %v8031_v23 = vrot.slane %v18326_v50, 2  ;;  %v8112_v61 = vrot.slane %v18326_v50, 3  ;;  %v11540_v46 = vld [vmem:[%s18854_s6 + $0xd0] sm:$0xf] }
 0x73c   :  { %v8193_v55 = vrot.slane %v18326_v50, 4  ;;  %v8274_v54 = vrot.slane %v18326_v50, 5  ;;  %v8355_v14 = vrot.slane %v18326_v50, 6  ;;  %v8436_v3 = vrot.slane %v18326_v50, 7  ;;  %v11555_v50 = vld [vmem:[%s18854_s6 + $0x118] sm:$0xf] }
 0x73d   :  { %v9265_v10 = vmax.f32 %v9261_v44, %v9263_v45  ;;  %13691 = vmatmul.mubr.msk.f32.vlgmr.msra.gmra.mrb[200].mxu0 %vm7868_vm12, %v7950_v5  ;;  %v11534_v44 = vld [vmem:[%s18854_s6 + $0xb0] sm:$0xff]  ;;  %v7862_v40 = vadd.f32 %v18317_v13, %v18328_v17  ;;  %v11558_v17 = vld [vmem:[%s18854_s6 + $0x120] sm:$0xff]  ;;  %v11559_v38 = vld [vmem:[%s18854_s6 + $0x128] sm:$0xff] }
 0x73e   :  { %v7843_v8 = vpop.f32.mrb[198].mxu0  ;;  %14192 = vmatpush3.bf16.msra.mxu0 %v18330_v56  ;;  %13699 = vmatprep.mubr.msk.f32.mxu0 %vm15054_vm11, %v15053_v0  ;;  %v18432_v58 = vpack.c.bf16 %v11534_v44, %v11533_v36  ;;  %v18531_v45 = vpack.c.bf16 %v11559_v38, %v11558_v17  ;;  %v11560_v5 = vld [vmem:[%s18854_s6 + $0x130] sm:$0xf]  ;;  %v9166_v36 = vld [vmem:[%s18856_s8 + $0x20] sm:$0xff]  ;;  %v9167_v44 = vld [vmem:[%s18856_s8 + $0x28] sm:$0xff] }
 0x73f   :  { %v18340_v51 = vadd.f32 %v18317_v13, %v9265_v10  ;;  %v9264_v52 = vmax.f32 %v7823_v49, %v7843_v8  ;;  %13697 = vmatprep.subr.mxu0 %v15053_v0  ;;  %v7845_v28 = vpop.f32.mrb[199].mxu0  ;;  %v11544_v49 = vld [vmem:[%s18854_s6 + $0xe0] sm:$0xff]  ;;  %v18474_v62 = vmax.f32 %v7862_v40, 0.0  ;;  %v11563_v10 = vld [vmem:[%s18854_s6 + $0x138] sm:$0xff] }
 0x740   :  { %v18472_v21 = vpack.c.bf16 %v11544_v49, %v11543_v4  ;;  %v11564_v8 = vld [vmem:[%s18854_s6 + $0x140] sm:$0xff]  ;;  %v11569_v28 = vld [vmem:[%s18854_s6 + $0x158] sm:$0xff] }
 0x741   :  { %v9266_v22 = vmax.f32 %v9262_v53, %v9264_v52  ;;  %v11535_v53 = vld [vmem:[%s18854_s6 + $0xb8] sm:$0xf]  ;;  %v8598_v37 = vrot.slane %v18474_v62, 1  ;;  %v8679_v57 = vrot.slane %v18474_v62, 2  ;;  %v8760_v18 = vrot.slane %v18474_v62, 3 }
 0x742   :  { %13698 = vmatpush3.msk.msra.mxu0 %vm773_vm0, %v11510_v35  ;;  %v18550_v52 = vpack.c.bf16 %v11564_v8, %v11563_v10  ;;  %v8841_v35 = vrot.slane %v18474_v62, 4  ;;  %v9084_v34 = vrot.slane %v18474_v62, 7  ;;  %v11649_v10 = vld [vmem:[%s18854_s6 + $0x160] sm:$0xf] }
 0x743   :  { %v18356_v29 = vadd.f32 %v18317_v13, %v9266_v22  ;;  %14193 = vmatprep.subr.bf16.mxu0 %v15052_v60  ;;  %v11549_v13 = vld [vmem:[%s18854_s6 + $0xf8] sm:$0xff]  ;;  %v18569_v22 = vpack.c.bf16 %v11569_v28, %v11568_v6 }
 0x744   :  { %v18493_v26 = vpack.c.bf16 %v11549_v13, %v11548_v1  ;;  %v9269_v1 = vmax.f32 %v18340_v51, 0.0 }
 0x745   :  { %13700 = vmatmul.mubr.msk.f32.vlgmr.msra.gmra.mrb[200].mxu0 %vm7868_vm12, %v8031_v23  ;;  %v8922_v23 = vrot.slane %v18474_v62, 5 }
 0x746   :  { %14195 = vmatpush3.bf16.msra.mxu0 %v18353_v33  ;;  %13708 = vmatprep.mubr.msk.f32.mxu0 %vm15054_vm11, %v15053_v0  ;;  %v9354_v51 = vrot.slane %v9269_v1, 1  ;;  %v9434_v13 = vrot.slane %v9269_v1, 2  ;;  %v9674_v59 = vrot.slane %v9269_v1, 5  ;;  %v9754_v9 = vrot.slane %v9269_v1, 6 }
 0x747   :  { %13706 = vmatprep.subr.mxu0 %v15053_v0 }
 0x74a   :  { %13707 = vmatpush3.msk.msra.mxu0 %vm773_vm0, %v11515_v30  ;;  %v11570_v30 = vld [vmem:[%s18854_s6 + $0x160] sm:$0xf] }
 0x74b   :  { %14196 = vmatprep.subr.bf16.mxu0 %v15052_v60 }
 0x74d   :  { %13709 = vmatmul.mubr.msk.f32.vlgmr.msra.gmra.mrb[200].mxu0 %vm7868_vm12, %v8112_v61  ;;  %v18588_v61 = vpack.c.bf16 %v11574_v39, %v11573_v7 }
 0x74e   :  { %14198 = vmatpush3.bf16.msra.mxu0 %v18375_v32  ;;  %13717 = vmatprep.mubr.msk.f32.mxu0 %vm15054_vm11, %v15053_v0 }
 0x74f   :  { %13715 = vmatprep.subr.mxu0 %v15053_v0 }
 0x752   :  { %13716 = vmatpush3.msk.msra.mxu0 %vm773_vm0, %v11520_v43  ;;  %v9003_v43 = vrot.slane %v18474_v62, 6 }
 0x753   :  { %14199 = vmatprep.subr.bf16.mxu0 %v15052_v60 }
 0x755   :  { %13718 = vmatmul.mubr.msk.f32.vlgmr.msra.gmra.mrb[200].mxu0 %vm7868_vm12, %v8193_v55  ;;  %v9163_v55 = vld [vmem:[%s18856_s8 + $0x8] sm:$0xff] }
 0x756   :  { %14201 = vmatpush3.bf16.msra.mxu0 %v18394_v15  ;;  %13726 = vmatprep.mubr.msk.f32.mxu0 %vm15054_vm11, %v15053_v0 }
 0x757   :  { %13724 = vmatprep.subr.mxu0 %v15053_v0 }
 0x75a   :  { %13725 = vmatpush3.msk.msra.mxu0 %vm773_vm0, %v11525_v41  ;;  %v18607_v41 = vpack.c.bf16 %v9163_v55, %v9162_v27 }
 0x75b   :  { %14202 = vmatprep.subr.bf16.mxu0 %v15052_v60 }
 0x75d   :  { %13727 = vmatmul.mubr.msk.f32.vlgmr.msra.gmra.mrb[200].mxu0 %vm7868_vm12, %v8274_v54  ;;  %v9165_v54 = vld [vmem:[%s18856_s8 + $0x18] sm:$0xff] }
 0x75e   :  { %14204 = vmatpush3.bf16.msra.mxu0 %v18413_v16  ;;  %13735 = vmatprep.mubr.msk.f32.mxu0 %vm15054_vm11, %v15053_v0 }
 0x75f   :  { %13733 = vmatprep.subr.mxu0 %v15053_v0 }
 0x762   :  { %13734 = vmatpush3.msk.msra.mxu0 %vm773_vm0, %v11530_v12  ;;  %v18619_v12 = vpack.c.bf16 %v9165_v54, %v9164_v47 }
 0x763   :  { %14205 = vmatprep.subr.bf16.mxu0 %v15052_v60 }
 0x765   :  { %13736 = vmatmul.mubr.msk.f32.vlgmr.msra.gmra.mrb[200].mxu0 %vm7868_vm12, %v8355_v14  ;;  %v18631_v14 = vpack.c.bf16 %v9167_v44, %v9166_v36 }
 0x766   :  { %14207 = vmatpush3.bf16.msra.mxu0 %v18432_v58  ;;  %13744 = vmatprep.mubr.msk.f32.mxu0 %vm15054_vm11, %v15053_v0 }
 0x767   :  { %13742 = vmatprep.subr.mxu0 %v15053_v0 }
 0x76a   :  { %13743 = vmatpush3.msk.msra.mxu0 %vm773_vm0, %v11535_v53  ;;  %v9168_v53 = vld [vmem:[%s18856_s8 + $0x30] sm:$0x3] }
 0x76b   :  { %14208 = vmatprep.subr.bf16.mxu0 %v15052_v60 }
 0x76d   :  { %13745 = vmatmul.mubr.msk.f32.vlgmr.msra.gmra.mrb[200].mxu0 %vm7868_vm12, %v8436_v3  ;;  %v18644_v3 = vld [vmem:[%s18855_s7] sm:$0x1] }
 0x76e   :  { %14210 = vmatpush3.bf16.msra.mxu0 %v18451_v42  ;;  %13753 = vmatprep.mubr.msk.f32.mxu0 %vm15054_vm11, %v15053_v0 }
 0x76f   :  { %13751 = vmatprep.subr.mxu0 %v15053_v0 }
 0x772   :  { %13752 = vmatpush3.msk.msra.mxu0 %vm773_vm0, %v11540_v46 }
 0x773   :  { %14211 = vmatprep.subr.bf16.mxu0 %v15052_v60 }
 0x775   :  { %13754 = vmatmul.mubr.msk.f32.vlgmr.msra.gmra.mrb[200].mxu0 %vm7868_vm12, %v18474_v62 }
 0x776   :  { %14213 = vmatpush3.bf16.msra.mxu0 %v18472_v21  ;;  %13762 = vmatprep.mubr.msk.f32.mxu0 %vm15054_vm11, %v15053_v0 }
 0x777   :  { %13760 = vmatprep.subr.mxu0 %v15053_v0 }
 0x77a   :  { %13761 = vmatpush3.msk.msra.mxu0 %vm773_vm0, %v11545_v2  ;;  %v9273_v2 = vld [vmem:[%s18854_s6 + $0x10] sm:$0xf] }
 0x77b   :  { %14214 = vmatprep.subr.bf16.mxu0 %v15052_v60 }
 0x77d   :  { %13763 = vmatmul.mubr.msk.f32.vlgmr.msra.gmra.mrb[200].mxu0 %vm7868_vm12, %v8598_v37  ;;  %v9514_v37 = vrot.slane %v9269_v1, 3 }
 0x77e   :  { %14216 = vmatpush3.bf16.msra.mxu0 %v18493_v26  ;;  %13771 = vmatprep.mubr.msk.f32.mxu0 %vm15054_vm11, %v15053_v0 }
 0x77f   :  { %13769 = vmatprep.subr.mxu0 %v15053_v0 }
 0x782   :  { %13770 = vmatpush3.msk.msra.mxu0 %vm773_vm0, %v11550_v63  ;;  %v9594_v63 = vrot.slane %v9269_v1, 4 }
 0x783   :  { %14217 = vmatprep.subr.bf16.mxu0 %v15052_v60 }
 0x785   :  { %13772 = vmatmul.mubr.msk.f32.vlgmr.msra.gmra.mrb[200].mxu0 %vm7868_vm12, %v8679_v57  ;;  %v9834_v57 = vrot.slane %v9269_v1, 7 }
 0x786   :  { %14219 = vmatpush3.bf16.msra.mxu0 %v18512_v11  ;;  %13780 = vmatprep.mubr.msk.f32.mxu0 %vm15054_vm11, %v15053_v0 }
 0x787   :  { %13778 = vmatprep.subr.mxu0 %v15053_v0 }
 0x78a   :  { %13779 = vmatpush3.msk.msra.mxu0 %vm773_vm0, %v11555_v50  ;;  %v9270_v50 = vmax.f32 %v18356_v29, 0.0  ;;  %v11629_v29 = vld [vmem:[%s18854_s6 + $0x100] sm:$0xf] }
 0x78b   :  { %14220 = vmatprep.subr.bf16.mxu0 %v15052_v60 }
 0x78c   :  { %v9994_v17 = vrot.slane %v9270_v50, 1  ;;  %v10154_v38 = vrot.slane %v9270_v50, 3  ;;  %v10394_v8 = vrot.slane %v9270_v50, 6 }
 0x78d   :  { %13781 = vmatmul.mubr.msk.f32.vlgmr.msra.gmra.mrb[200].mxu0 %vm7868_vm12, %v8760_v18  ;;  %v10234_v18 = vrot.slane %v9270_v50, 4 }
 0x78e   :  { %14222 = vmatpush3.bf16.msra.mxu0 %v18531_v45  ;;  %13789 = vmatprep.mubr.msk.f32.mxu0 %vm15054_vm11, %v15053_v0 }
 0x78f   :  { %13787 = vmatprep.subr.mxu0 %v15053_v0 }
 0x792   :  { %13788 = vmatpush3.msk.msra.mxu0 %vm773_vm0, %v11560_v5  ;;  %v10314_v5 = vrot.slane %v9270_v50, 5 }
 0x793   :  { %14223 = vmatprep.subr.bf16.mxu0 %v15052_v60 }
 0x795   :  { %13790 = vmatmul.mubr.msk.f32.vlgmr.msra.gmra.mrb[200].mxu0 %vm7868_vm12, %v8841_v35  ;;  %v10474_v35 = vrot.slane %v9270_v50, 7 }
 0x796   :  { %14225 = vmatpush3.bf16.msra.mxu0 %v18550_v52  ;;  %13798 = vmatprep.mubr.msk.f32.mxu0 %vm15054_vm11, %v15053_v0 }
 0x797   :  { %13796 = vmatprep.subr.mxu0 %v15053_v0 }
 0x79a   :  { %13797 = vmatpush3.msk.msra.mxu0 %vm773_vm0, %v11565_v19  ;;  %v9169_v19 = vld [vmem:[%s18857_s9] sm:$0x1] }
 0x79b   :  { %14226 = vmatprep.subr.bf16.mxu0 %v15052_v60 }
 0x79d   :  { %13799 = vmatmul.mubr.msk.f32.vlgmr.msra.gmra.mrb[200].mxu0 %vm7868_vm12, %v8922_v23  ;;  %v10558_v23 = vld [vmem:[%s18856_s8 + $0x30] sm:$0x3] }
 0x79e   :  { %14228 = vmatpush3.bf16.msra.mxu0 %v18569_v22  ;;  %13807 = vmatprep.mubr.msk.f32.mxu0 %vm15054_vm11, %v15053_v0 }
 0x79f   :  { %13805 = vmatprep.subr.mxu0 %v15053_v0 }
 0x7a2   :  { %13806 = vmatpush3.msk.msra.mxu0 %vm773_vm0, %v11570_v30 }
 0x7a3   :  { %14229 = vmatprep.subr.bf16.mxu0 %v15052_v60 }
 0x7a5   :  { %13808 = vmatmul.mubr.msk.f32.vlgmr.msra.gmra.mrb[200].mxu0 %vm7868_vm12, %v9003_v43 }
 0x7a6   :  { %14231 = vmatpush3.bf16.msra.mxu0 %v18588_v61  ;;  %13816 = vmatprep.mubr.msk.f32.mxu0 %vm15054_vm11, %v15053_v0 }
 0x7a7   :  { %13814 = vmatprep.subr.mxu0 %v15053_v0 }
 0x7aa   :  { %13815 = vmatpush3.msk.msra.mxu0 %vm773_vm0, %v11575_v31 }
 0x7ab   :  { %14232 = vmatprep.subr.bf16.mxu0 %v15052_v60 }
 0x7ad   :  { %13817 = vmatmul.mubr.msk.f32.vlgmr.msra.gmra.mrb[200].mxu0 %vm7868_vm12, %v9084_v34 }
 0x7ae   :  { %14234 = vmatpush3.bf16.msra.mxu0 %v18607_v41  ;;  %13833 = vmatprep.mubr.msk.f32.mxu0 %vm15054_vm11, %v15053_v0 }
 0x7af   :  { %14235 = vmatprep.subr.bf16.mxu0 %v15052_v60 }
 0x7b2   :  { %14237 = vmatpush3.bf16.msra.mxu0 %v18619_v12 }
 0x7b3   :  { %14238 = vmatprep.subr.bf16.mxu0 %v15052_v60 }
 0x7b6   :  { %14240 = vmatpush3.bf16.msra.mxu0 %v18631_v14 }
 0x7b7   :  { %13831 = vmatprep.subr.mxu0 %v15053_v0 }
 0x7ba   :  { %13832 = vmatpush3.msk.msra.mxu0 %vm1702_vm3, %v9168_v53 }
 0x7bb   :  { %14241 = vmatprep.subr.bf16.mxu0 %v15052_v60 }
 0x80e   :  { %v7941_v25 = vpop.f32.mrb[34].mxu1 }
 0x80f   :  { %v13683_v48 = vpop.f32.mrb[35].mxu1  ;;  %v7945_v40 = vadd.f32 %v7941_v25, %v18644_v3 }
 0x880   :  { %v9156_v46 = vpop.f32.mrb[200].mxu0 }
 0x881   :  { %v14335_v4 = vadd.f32 %v9156_v46, %v7945_v40  ;;  %v13818_v49 = vpop.f32.mrb[201].mxu0 }
 0x883   :  { %v9161_v62 = vmax.f32 %v14335_v4, 0.0 }
 0x885   :  { %13834 = vmatmul.mubr.msk.f32.vlgmr.msra.gmra.mrb[202].mxu0 %vm9170_vm13, %v9161_v62 }
 0x886   :  { %14243 = vmatpush3.bf16.msra.mxu0 %v18302_v20  ;;  %13842 = vmatprep.mubr.msk.f32.mxu0 %vm15054_vm11, %v15053_v0  ;;  %v11584_v20 = vld [vmem:[%s18854_s6 + $0x28] sm:$0xf] }
 0x887   :  { %13840 = vmatprep.subr.mxu0 %v15053_v0 }
 0x88a   :  { %13841 = vmatpush3.msk.msra.mxu0 %vm773_vm0, %v9273_v2 }
 0x88b   :  { %13843 = vmatmul.mubr.msk.f32.vlgmr.msra.gmra.mrb[204].mxu0 %vm7868_vm12, %v9269_v1  ;;  %14244 = vmatprep.subr.bf16.mxu0 %v15052_v60 }
 0x88c   :  { %14246 = vmatpush3.bf16.msra.mxu0 %v18181_v24  ;;  %13851 = vmatprep.mubr.msk.f32.mxu0 %vm15054_vm11, %v15053_v0  ;;  %v11589_v24 = vld [vmem:[%s18854_s6 + $0x40] sm:$0xf] }
 0x88d   :  { %13849 = vmatprep.subr.mxu0 %v15053_v0 }
 0x890   :  { %13850 = vmatpush3.msk.msra.mxu0 %vm773_vm0, %v11584_v20 }
 0x891   :  { %14247 = vmatprep.subr.bf16.mxu0 %v15052_v60 }
 0x893   :  { %13852 = vmatmul.mubr.msk.f32.vlgmr.msra.gmra.mrb[204].mxu0 %vm7868_vm12, %v9354_v51 }
 0x894   :  { %14249 = vmatpush3.bf16.msra.mxu0 %v18330_v56  ;;  %13860 = vmatprep.mubr.msk.f32.mxu0 %vm15054_vm11, %v15053_v0  ;;  %v11594_v56 = vld [vmem:[%s18854_s6 + $0x58] sm:$0xf] }
 0x895   :  { %13858 = vmatprep.subr.mxu0 %v15053_v0 }
 0x898   :  { %13859 = vmatpush3.msk.msra.mxu0 %vm773_vm0, %v11589_v24 }
 0x899   :  { %14250 = vmatprep.subr.bf16.mxu0 %v15052_v60 }
 0x89b   :  { %13861 = vmatmul.mubr.msk.f32.vlgmr.msra.gmra.mrb[204].mxu0 %vm7868_vm12, %v9434_v13 }
 0x89c   :  { %14252 = vmatpush3.bf16.msra.mxu0 %v18353_v33  ;;  %13869 = vmatprep.mubr.msk.f32.mxu0 %vm15054_vm11, %v15053_v0  ;;  %v11599_v33 = vld [vmem:[%s18854_s6 + $0x70] sm:$0xf] }
 0x89d   :  { %13867 = vmatprep.subr.mxu0 %v15053_v0 }
 0x8a0   :  { %13868 = vmatpush3.msk.msra.mxu0 %vm773_vm0, %v11594_v56 }
 0x8a1   :  { %14253 = vmatprep.subr.bf16.mxu0 %v15052_v60 }
 0x8a3   :  { %13870 = vmatmul.mubr.msk.f32.vlgmr.msra.gmra.mrb[204].mxu0 %vm7868_vm12, %v9514_v37 }
 0x8a4   :  { %14255 = vmatpush3.bf16.msra.mxu0 %v18375_v32  ;;  %13878 = vmatprep.mubr.msk.f32.mxu0 %vm15054_vm11, %v15053_v0  ;;  %v11604_v32 = vld [vmem:[%s18854_s6 + $0x88] sm:$0xf] }
 0x8a5   :  { %13876 = vmatprep.subr.mxu0 %v15053_v0 }
 0x8a8   :  { %13877 = vmatpush3.msk.msra.mxu0 %vm773_vm0, %v11599_v33 }
 0x8a9   :  { %14256 = vmatprep.subr.bf16.mxu0 %v15052_v60 }
 0x8ab   :  { %13879 = vmatmul.mubr.msk.f32.vlgmr.msra.gmra.mrb[204].mxu0 %vm7868_vm12, %v9594_v63 }
 0x8ac   :  { %14258 = vmatpush3.bf16.msra.mxu0 %v18394_v15  ;;  %13887 = vmatprep.mubr.msk.f32.mxu0 %vm15054_vm11, %v15053_v0  ;;  %v11609_v15 = vld [vmem:[%s18854_s6 + $0xa0] sm:$0xf] }
 0x8ad   :  { %13885 = vmatprep.subr.mxu0 %v15053_v0 }
 0x8b0   :  { %13886 = vmatpush3.msk.msra.mxu0 %vm773_vm0, %v11604_v32 }
 0x8b1   :  { %14259 = vmatprep.subr.bf16.mxu0 %v15052_v60 }
 0x8b3   :  { %13888 = vmatmul.mubr.msk.f32.vlgmr.msra.gmra.mrb[204].mxu0 %vm7868_vm12, %v9674_v59 }
 0x8b4   :  { %14261 = vmatpush3.bf16.msra.mxu0 %v18413_v16  ;;  %13896 = vmatprep.mubr.msk.f32.mxu0 %vm15054_vm11, %v15053_v0  ;;  %v11614_v16 = vld [vmem:[%s18854_s6 + $0xb8] sm:$0xf] }
 0x8b5   :  { %13894 = vmatprep.subr.mxu0 %v15053_v0 }
 0x8b8   :  { %13895 = vmatpush3.msk.msra.mxu0 %vm773_vm0, %v11609_v15 }
 0x8b9   :  { %14262 = vmatprep.subr.bf16.mxu0 %v15052_v60 }
 0x8bb   :  { %13897 = vmatmul.mubr.msk.f32.vlgmr.msra.gmra.mrb[204].mxu0 %vm7868_vm12, %v9754_v9 }
 0x8bc   :  { %14264 = vmatpush3.bf16.msra.mxu0 %v18432_v58  ;;  %13905 = vmatprep.mubr.msk.f32.mxu0 %vm15054_vm11, %v15053_v0  ;;  %v11619_v58 = vld [vmem:[%s18854_s6 + $0xd0] sm:$0xf] }
 0x8bd   :  { %13903 = vmatprep.subr.mxu0 %v15053_v0 }
 0x8c0   :  { %13904 = vmatpush3.msk.msra.mxu0 %vm773_vm0, %v11614_v16 }
 0x8c1   :  { %14265 = vmatprep.subr.bf16.mxu0 %v15052_v60 }
 0x8c3   :  { %13906 = vmatmul.mubr.msk.f32.vlgmr.msra.gmra.mrb[204].mxu0 %vm7868_vm12, %v9834_v57 }
 0x8c4   :  { %14267 = vmatpush3.bf16.msra.mxu0 %v18451_v42  ;;  %13914 = vmatprep.mubr.msk.f32.mxu0 %vm15054_vm11, %v15053_v0  ;;  %v11624_v42 = vld [vmem:[%s18854_s6 + $0xe8] sm:$0xf] }
 0x8c5   :  { %13912 = vmatprep.subr.mxu0 %v15053_v0 }
 0x8c8   :  { %13913 = vmatpush3.msk.msra.mxu0 %vm773_vm0, %v11619_v58 }
 0x8c9   :  { %14268 = vmatprep.subr.bf16.mxu0 %v15052_v60 }
 0x8cb   :  { %13915 = vmatmul.mubr.msk.f32.vlgmr.msra.gmra.mrb[204].mxu0 %vm7868_vm12, %v9270_v50 }
 0x8cc   :  { %14270 = vmatpush3.bf16.msra.mxu0 %v18472_v21  ;;  %13923 = vmatprep.mubr.msk.f32.mxu0 %vm15054_vm11, %v15053_v0  ;;  %v10074_v21 = vrot.slane %v9270_v50, 2 }
 0x8cd   :  { %13921 = vmatprep.subr.mxu0 %v15053_v0 }
 0x8d0   :  { %13922 = vmatpush3.msk.msra.mxu0 %vm773_vm0, %v11624_v42 }
 0x8d1   :  { %14271 = vmatprep.subr.bf16.mxu0 %v15052_v60 }
 0x8d3   :  { %13924 = vmatmul.mubr.msk.f32.vlgmr.msra.gmra.mrb[204].mxu0 %vm7868_vm12, %v9994_v17 }
 0x8d4   :  { %14273 = vmatpush3.bf16.msra.mxu0 %v18493_v26  ;;  %13932 = vmatprep.mubr.msk.f32.mxu0 %vm15054_vm11, %v15053_v0  ;;  %v11634_v26 = vld [vmem:[%s18854_s6 + $0x118] sm:$0xf] }
 0x8d5   :  { %13930 = vmatprep.subr.mxu0 %v15053_v0 }
 0x8d8   :  { %13931 = vmatpush3.msk.msra.mxu0 %vm773_vm0, %v11629_v29 }
 0x8d9   :  { %14274 = vmatprep.subr.bf16.mxu0 %v15052_v60 }
 0x8db   :  { %13933 = vmatmul.mubr.msk.f32.vlgmr.msra.gmra.mrb[204].mxu0 %vm7868_vm12, %v10074_v21 }
 0x8dc   :  { %14276 = vmatpush3.bf16.msra.mxu0 %v18512_v11  ;;  %13941 = vmatprep.mubr.msk.f32.mxu0 %vm15054_vm11, %v15053_v0  ;;  %v11639_v11 = vld [vmem:[%s18854_s6 + $0x130] sm:$0xf] }
 0x8dd   :  { %13939 = vmatprep.subr.mxu0 %v15053_v0 }
 0x8e0   :  { %13940 = vmatpush3.msk.msra.mxu0 %vm773_vm0, %v11634_v26 }
 0x8e1   :  { %14277 = vmatprep.subr.bf16.mxu0 %v15052_v60 }
 0x8e3   :  { %13942 = vmatmul.mubr.msk.f32.vlgmr.msra.gmra.mrb[204].mxu0 %vm7868_vm12, %v10154_v38 }
 0x8e4   :  { %14279 = vmatpush3.bf16.msra.mxu0 %v18531_v45  ;;  %13950 = vmatprep.mubr.msk.f32.mxu0 %vm15054_vm11, %v15053_v0  ;;  %v11644_v45 = vld [vmem:[%s18854_s6 + $0x148] sm:$0xf] }
 0x8e5   :  { %13948 = vmatprep.subr.mxu0 %v15053_v0 }
 0x8e8   :  { %13949 = vmatpush3.msk.msra.mxu0 %vm773_vm0, %v11639_v11 }
 0x8e9   :  { %14280 = vmatprep.subr.bf16.mxu0 %v15052_v60 }
 0x8eb   :  { %13951 = vmatmul.mubr.msk.f32.vlgmr.msra.gmra.mrb[204].mxu0 %vm7868_vm12, %v10234_v18 }
 0x8ec   :  { %14282 = vmatpush3.bf16.msra.mxu0 %v18550_v52  ;;  %13959 = vmatprep.mubr.msk.f32.mxu0 %vm15054_vm11, %v15053_v0  ;;  %v11654_v52 = vld [vmem:[%s18854_s6 + $0x178] sm:$0xf] }
 0x8ed   :  { %13957 = vmatprep.subr.mxu0 %v15053_v0 }
 0x8f0   :  { %13958 = vmatpush3.msk.msra.mxu0 %vm773_vm0, %v11644_v45 }
 0x8f1   :  { %14283 = vmatprep.subr.bf16.mxu0 %v15052_v60 }
 0x8f3   :  { %13960 = vmatmul.mubr.msk.f32.vlgmr.msra.gmra.mrb[204].mxu0 %vm7868_vm12, %v10314_v5 }
 0x8f4   :  { %14285 = vmatpush3.bf16.msra.mxu0 %v18569_v22  ;;  %13968 = vmatprep.mubr.msk.f32.mxu0 %vm15054_vm11, %v15053_v0 }
 0x8f5   :  { %13966 = vmatprep.subr.mxu0 %v15053_v0 }
 0x8f8   :  { %13967 = vmatpush3.msk.msra.mxu0 %vm773_vm0, %v11649_v10 }
 0x8f9   :  { %14286 = vmatprep.subr.bf16.mxu0 %v15052_v60 }
 0x8fb   :  { %13969 = vmatmul.mubr.msk.f32.vlgmr.msra.gmra.mrb[204].mxu0 %vm7868_vm12, %v10394_v8 }
 0x8fc   :  { %14288 = vmatpush3.bf16.msra.mxu0 %v18588_v61  ;;  %13977 = vmatprep.mubr.msk.f32.mxu0 %vm15054_vm11, %v15053_v0 }
 0x8fd   :  { %13975 = vmatprep.subr.mxu0 %v15053_v0 }
 0x900   :  { %13976 = vmatpush3.msk.msra.mxu0 %vm773_vm0, %v11654_v52 }
 0x901   :  { %14289 = vmatprep.subr.bf16.mxu0 %v15052_v60 }
 0x903   :  { %13978 = vmatmul.mubr.msk.f32.vlgmr.msra.gmra.mrb[204].mxu0 %vm7868_vm12, %v10474_v35 }
 0x904   :  { %14291 = vmatpush3.bf16.msra.mxu0 %v18607_v41  ;;  %13994 = vmatprep.mubr.msk.f32.mxu0 %vm15054_vm11, %v15053_v0 }
 0x905   :  { %14292 = vmatprep.subr.bf16.mxu0 %v15052_v60 }
 0x908   :  { %14294 = vmatpush3.bf16.msra.mxu0 %v18619_v12  ;;  %v10559_v12 = vld [vmem:[%s18857_s9] sm:$0x1]  ;;  %s15026_s9 = scalar_lea.vmem %s10656_s13, 32 }
 0x909   :  { %14295 = vmatprep.subr.bf16.mxu0 %v15052_v60  ;;  %p15027_p0 = scmp.ne.s32.totalorder %s10656_s13, %s15026_s9  ;;  %p15032_p2 = scmp.lt.s32.totalorder %s15026_s9, %s15026_s9 }
 0x90b   :  { %p15033_p3 = por %p15032_p2, %p15031_p1 }
 0x90c   :  { %14297 = vmatpush3.bf16.msra.mxu0 %v18631_v14 }
 0x90d   :  { %13992 = vmatprep.subr.mxu0 %v15053_v0  ;;  %p15034_p4 = pnand %p15033_p3, %p15027_p0 }
 0x910   :  { %13993 = vmatpush3.msk.msra.mxu0 %vm1702_vm3, %v10558_v23 }
 0x958   :  { %v9243_v6 = vpop.f32.mrb[202].mxu0 }
 0x959   :  { %v9244_v28 = vadd.f32 %v9243_v6, %v9169_v19  ;;  %v13835_v22 = vpop.f32.mrb[203].mxu0 }
 0x95b   :  { %v9248_v60 = vsel %vm9247_vm14, %v9244_v28, -inf }
 0x95c   :  { %9249 = vmax.xlane.f32.xlu0 %v9248_v60 }
 0x9d6   :  { %v10546_v30 = vpop.f32.mrb[204].mxu0 }
 0x9d7   :  { %v14336_v0 = vadd.f32 %v10546_v30, %v18644_v3  ;;  %v13979_v7 = vpop.f32.mrb[205].mxu0 }
 0x9d9   :  { %v10551_v39 = vmax.f32 %v14336_v0, 0.0 }
 0x9db   :  { %13995 = vmatmul.mubr.msk.f32.vlgmr.msra.gmra.mrb[206].mxu0 %vm9170_vm13, %v10551_v39 }
 0x9e9   :  { %v9250_v61 = vpop.xlane.xlu0 %9249 }
 0x9ea   :  { %v9251_v43 = vsub.f32 %v9244_v28, %v9250_v61 }
 0x9ec   :  { %v9252_v31 = vmul.f32 1.442695, %v9251_v43 }
 0x9ee   :  { %15017 = vpow2.f32 %v9252_v31 }
 0x9f8   :  { %v15018_v27 = vpop.eup %15017 }
 0x9f9   :  { %v9254_v55 = vsel %vm9247_vm14, %v15018_v27, 0.0 }
 0x9fa   :  { %9255 = vadd.xlane.f32.xlu1 %v9254_v55 }
 0xa87   :  { %v9256_v41 = vpop.xlane.xlu1 %9255 }
 0xa88   :  { %15019 = vlog2.f32 %v9256_v41 }
 0xa92   :  { %v15020_v34 = vpop.eup %15019 }
 0xa93   :  { %v9258_v47 = vmul.f32 0.6931472, %v15020_v34 }
 0xa95   :  { %v9259_v54 = vsub.f32 %v9251_v43, %v9258_v47 }
 0xa97   :  { %9260 = vst.msk [vmem:[#allocation2] sm:$0x1] %vm9247_vm14, %v9259_v54 }
 0xaae   :  { %v10632_v36 = vpop.f32.mrb[206].mxu0 }
 0xaaf   :  { %v10633_v44 = vadd.f32 %v10632_v36, %v10559_v12  ;;  %v13996_v14 = vpop.f32.mrb[207].mxu0 }
 0xab1   :  { %v10636_v53 = vsel %vm9247_vm14, %v10633_v44, -inf }
 0xab2   :  { %10637 = vmax.xlane.f32.xlu0 %v10636_v53 }
 0xb3f   :  { %v10638_v25 = vpop.xlane.xlu0 %10637 }
 0xb40   :  { %v10639_v48 = vsub.f32 %v10633_v44, %v10638_v25 }
 0xb42   :  { %v10640_v3 = vmul.f32 1.442695, %v10639_v48 }
 0xb44   :  { %15021 = vpow2.f32 %v10640_v3 }
 0xb4e   :  { %v15022_v40 = vpop.eup %15021 }
 0xb4f   :  { %v10642_v46 = vsel %vm9247_vm14, %v15022_v40, 0.0 }
 0xb50   :  { %10643 = vadd.xlane.f32.xlu1 %v10642_v46 }
 0xbdd   :  { %v10644_v4 = vpop.xlane.xlu1 %10643 }
 0xbde   :  { %15023 = vlog2.f32 %v10644_v4 }
 0xbe8   :  { %v15024_v49 = vpop.eup %15023 }
 0xbe9   :  { %v10646_v62 = vmul.f32 0.6931472, %v15024_v49 }
 0xbeb   :  { %v10647_v2 = vsub.f32 %v10639_v48, %v10646_v62 }
 0xbed   :  { %10648 = vst.msk [vmem:[#allocation2 + $0x1] sm:$0x1] %vm9247_vm14, %v10647_v2 }
 0xbee   :  { %15037 = shalt.err (!%p15034_p4)
}
 0xbef   :  { %s15038_s15 = scalar_lea.hbm %s18858_s10, 32 }
 0xbf0   :  { %p15039_p5 = scmp.ne.s32.totalorder %s18858_s10, %s15038_s15  ;;  %p15042_p6 = scmp.lt.u32.totalorder %s15038_s15, %s18858_s10 }
 0xbf2   :  { %p15044_p7 = pnand %p15042_p6, %p15039_p5 }
 0xbf4   :  { %15047 = shalt.err (!%p15044_p7)
}
 0xbf5   :  { %10658 = dma.vmem_to_hbm [thread:$0]  %s10656_s13, 32, %s18858_s10, [#allocation3]  }
 0xbf6   :  { %15048 = dma.done.wait [#allocation3], 32  }
 0xbf7   :  { %15049 = vsyncadd [#allocation3], 4294967264 }
 0xbf8   :  { %10662 = vsyncpa [#allocation3], 1 }

</bundles_post_ra>
